<compile_context>
chip_gen: v7x
topology: tpu7x:2x2x1
jax: 0.10.0
libtpu: 0.0.40
codegen_flags: <defaults>
</compile_context>

<pallas_src>
import functools

import jax
import jax.numpy as jnp
from jax import lax
from jax.experimental import pallas as pl
from jax.experimental.pallas import tpu as pltpu

LRELU_SLOPE = 0.2
BN_EPS = 1e-5

MXU_DTYPE = jnp.bfloat16          # MXU operand dtype; accumulation + epilogues stay f32
ACT_DTYPE = jnp.bfloat16          # inter-layer activation storage dtype
LANE = 128
SUBLANE = 8


def _round_up(x, m):
    return (x + m - 1) // m * m


def _vmem_capacity_bytes():
    """Physical per-core VMEM; conservative (v7x, 64 MiB) fallback when no TPU is attached."""
    try:
        cap = int(pltpu.get_tpu_info().vmem_capacity_bytes)
        if cap > 0:
            return cap
    except Exception:
        pass
    return 64 * 1024 * 1024


_VMEM_CAP = _vmem_capacity_bytes()
VMEM_LIMIT = min((_VMEM_CAP * 3) // 4, 112 * 1024 * 1024)   # scoped-VMEM limit we request
FUSE_BYTES_LIMIT = _VMEM_CAP // 2                           # single-block fused-path threshold

_VMEM_SPEC = pl.BlockSpec(memory_space=pltpu.MemorySpace.VMEM)
_PARAMS_NO_GRID = pltpu.CompilerParams(vmem_limit_bytes=VMEM_LIMIT)
_PARAMS_1D = pltpu.CompilerParams(dimension_semantics=("parallel",),
                                  vmem_limit_bytes=VMEM_LIMIT)


# --------------------------------------------------------------------------------------
# Shared in-kernel GEMM helper: MXU dot (f32 accumulate) or, for tiny Cin (the 1x1 first
# conv), a VPU broadcast multiply-accumulate that skips the MXU contraction entirely.
# --------------------------------------------------------------------------------------
def _tile_matmul(p_ref, w_ref, small_k):
    if small_k:
        x = p_ref[...].astype(jnp.float32)
        w = w_ref[...].astype(jnp.float32)
        y = x[:, 0:1] * w[0:1, :]
        for c in range(1, small_k):
            y = y + x[:, c:c + 1] * w[c:c + 1, :]
        return y
    return jnp.dot(p_ref[...], w_ref[...], preferred_element_type=jnp.float32)


# --------------------------------------------------------------------------------------
# Fused single-block kernel: GEMM + (train-mode BatchNorm | bias) + activation.
# Used whenever the whole layer fits in VMEM (true for the shipped toy shapes).
# --------------------------------------------------------------------------------------
def _fused_layer_kernel(*refs, has_bn, act, small_k):
    if has_bn:
        p_ref, w_ref, g_ref, be_ref, o_ref = refs     # conv bias dropped: BN mean cancels it
    else:
        p_ref, w_ref, b_ref, o_ref = refs

    y = _tile_matmul(p_ref, w_ref, small_k)

    if has_bn:
        inv_m = 1.0 / y.shape[0]
        mean = jnp.sum(y, axis=0, keepdims=True) * inv_m
        ex2 = jnp.sum(y * y, axis=0, keepdims=True) * inv_m
        var = ex2 - mean * mean                                   # one-pass variance (f32)
        z = (y - mean) * lax.rsqrt(var + BN_EPS) * g_ref[...] + be_ref[...]
        o_ref[...] = jnp.where(z >= 0, z, LRELU_SLOPE * z).astype(o_ref.dtype)
    else:
        z = y + b_ref[...]
        if act == "lrelu":
            o_ref[...] = jnp.where(z >= 0, z, LRELU_SLOPE * z).astype(o_ref.dtype)
        else:  # sigmoid: exp on the EUP + approx reciprocal (tolerated by test tolerance)
            o_ref[...] = pl.reciprocal(1.0 + jnp.exp(-z), approx=True).astype(o_ref.dtype)


def _fused_layer(patches, w_pad, bias_pad, gamma_pad, beta_pad, has_bn, act, out_dtype):
    M, K = patches.shape
    Np = w_pad.shape[1]
    kernel = functools.partial(_fused_layer_kernel, has_bn=has_bn, act=act,
                               small_k=K if K <= 8 else 0)
    args = (patches, w_pad, gamma_pad, beta_pad) if has_bn else (patches, w_pad, bias_pad)
    return pl.pallas_call(
        kernel,
        out_shape=jax.ShapeDtypeStruct((M, Np), out_dtype),
        in_specs=[_VMEM_SPEC] * len(args),
        out_specs=_VMEM_SPEC,
        compiler_params=_PARAMS_NO_GRID,
    )(*args)


# --------------------------------------------------------------------------------------
# Tiled path (scales to realistic sizes): 1-D parallel grid over M tiles, whole weight
# VMEM-resident, bf16 outputs, per-tile BN partial sums reduced wrapper-side, then a
# pure FMA + LeakyReLU normalize sweep.
# --------------------------------------------------------------------------------------
def _tiled_gemm_bn_kernel(p_ref, w_ref, y_ref, stats_ref, *, small_k):
    y = _tile_matmul(p_ref, w_ref, small_k)
    y_ref[...] = y.astype(y_ref.dtype)
    # Per-M-tile partial stats: row 0 = sum(y), row 1 = sum(y^2), rows 2..7 = 0.
    # (zero-padded M rows contribute exactly 0 because the conv bias is dropped on BN layers)
    row = lax.broadcasted_iota(jnp.int32, (SUBLANE, y.shape[1]), 0)
    s1 = jnp.sum(y, axis=0, keepdims=True)
    s2 = jnp.sum(y * y, axis=0, keepdims=True)
    stats_ref[...] = jnp.where(row == 0, s1, jnp.where(row == 1, s2, 0.0))[None]


def _tiled_gemm_bias_act_kernel(p_ref, w_ref, b_ref, o_ref, *, act, small_k):
    y = _tile_matmul(p_ref, w_ref, small_k) + b_ref[...]
    if act == "lrelu":
        o_ref[...] = jnp.where(y >= 0, y, LRELU_SLOPE * y).astype(o_ref.dtype)
    else:
        o_ref[...] = pl.reciprocal(1.0 + jnp.exp(-y), approx=True).astype(o_ref.dtype)


def _bn_apply_kernel(y_ref, scale_ref, shift_ref, o_ref):
    z = y_ref[...].astype(jnp.float32) * scale_ref[...] + shift_ref[...]
    o_ref[...] = jnp.where(z >= 0, z, LRELU_SLOPE * z).astype(o_ref.dtype)


def _pick_tm(M, Kp, Np, budget):
    """Largest row tile (<=1024) whose resident-weight + double-buffered tiles fit VMEM."""
    tm = min(1024, _round_up(M, SUBLANE))
    while tm > SUBLANE:
        need = (2 * Kp * Np                # resident bf16 weight
                + 2 * (tm * Kp * 2)        # double-buffered bf16 patch tile
                + 2 * (tm * Np * 4)        # double-buffered output tile (<= f32)
                + tm * Np * 4              # f32 GEMM result / epilogue temporaries
                + 2 * (SUBLANE * Np * 4)   # stats tile
                + (2 << 20))               # slack
        if need <= budget:
            break
        tm = _round_up(tm // 2, SUBLANE)
    return max(tm, SUBLANE)


def _tiled_layer(patches, w_pad, bias_pad, gamma_pad, beta_pad, has_bn, act, out_dtype):
    M, K = patches.shape
    Np = w_pad.shape[1]
    Kp = _round_up(K, LANE)
    tm = _pick_tm(M, Kp, Np, VMEM_LIMIT)
    Mp = _round_up(M, tm)
    nm = Mp // tm
    small_k = K if K <= 8 else 0

    p_pad = jnp.pad(patches, ((0, Mp - M), (0, Kp - K)))          # stays bf16
    w_full = jnp.pad(w_pad, ((0, Kp - K), (0, 0)))                # stays bf16

    p_spec = pl.BlockSpec((tm, Kp), lambda m: (m, 0))
    w_spec = pl.BlockSpec((Kp, Np), lambda m: (0, 0))             # whole weight stays resident
    y_spec = pl.BlockSpec((tm, Np), lambda m: (m, 0))

    if has_bn:
        kernel = functools.partial(_tiled_gemm_bn_kernel, small_k=small_k)
        y, stats = pl.pallas_call(
            kernel,
            grid=(nm,),
            in_specs=[p_spec, w_spec],
            out_specs=(y_spec, pl.BlockSpec((1, SUBLANE, Np), lambda m: (m, 0, 0))),
            out_shape=(jax.ShapeDtypeStruct((Mp, Np), ACT_DTYPE),
                       jax.ShapeDtypeStruct((nm, SUBLANE, Np), jnp.float32)),
            compiler_params=_PARAMS_1D,
        )(p_pad, w_full)

        # Reduce per-tile partial sums and fold BN into scale/shift (tiny Np-sized XLA op).
        sum_y = jnp.sum(stats[:, 0, :], axis=0)
        sum_y2 = jnp.sum(stats[:, 1, :], axis=0)
        mean = sum_y / M
        var = sum_y2 / M - mean * mean
        scale = gamma_pad[0] * lax.rsqrt(var + BN_EPS)
        shift = beta_pad[0] - mean * scale

        y = pl.pallas_call(
            _bn_apply_kernel,
            grid=(nm,),
            in_specs=[pl.BlockSpec((tm, Np), lambda m: (m, 0)),
                      pl.BlockSpec((1, Np), lambda m: (0, 0)),
                      pl.BlockSpec((1, Np), lambda m: (0, 0))],
            out_specs=pl.BlockSpec((tm, Np), lambda m: (m, 0)),
            out_shape=jax.ShapeDtypeStruct((Mp, Np), out_dtype),
            compiler_params=_PARAMS_1D,
        )(y, scale.reshape(1, Np), shift.reshape(1, Np))
    else:
        kernel = functools.partial(_tiled_gemm_bias_act_kernel, act=act, small_k=small_k)
        y = pl.pallas_call(
            kernel,
            grid=(nm,),
            in_specs=[p_spec, w_spec, pl.BlockSpec((1, Np), lambda m: (0, 0))],
            out_specs=y_spec,
            out_shape=jax.ShapeDtypeStruct((Mp, Np), out_dtype),
            compiler_params=_PARAMS_1D,
        )(p_pad, w_full, bias_pad)

    return y[:M]


def conv_layer(patches, w_mat, bias, gamma, beta, has_bn, act, out_dtype, force_tiled=False):
    M, K = patches.shape
    N = w_mat.shape[1]
    Np = _round_up(N, LANE)                    # lane-dense kernel outputs, sliced below

    w_pad = jnp.pad(w_mat, ((0, 0), (0, Np - N))).astype(MXU_DTYPE)
    if has_bn:
        bias_pad = None                        # dropped: BN mean subtraction cancels it
        gamma_pad = jnp.pad(gamma, (0, Np - N)).reshape(1, Np).astype(jnp.float32)
        beta_pad = jnp.pad(beta, (0, Np - N)).reshape(1, Np).astype(jnp.float32)
    else:
        bias_pad = jnp.pad(bias, (0, Np - N)).reshape(1, Np).astype(jnp.float32)
        gamma_pad = beta_pad = None

    # rough single-block working set: bf16 operands + f32 intermediates/temporaries
    approx_bytes = 2 * M * K + 2 * K * Np + 12 * M * Np
    if force_tiled or approx_bytes > FUSE_BYTES_LIMIT:
        y = _tiled_layer(patches, w_pad, bias_pad, gamma_pad, beta_pad, has_bn, act, out_dtype)
    else:
        y = _fused_layer(patches, w_pad, bias_pad, gamma_pad, beta_pad, has_bn, act, out_dtype)
    return y[:, :N]


# --------------------------------------------------------------------------------------
# JAX glue (layout plumbing, all in bf16)
# --------------------------------------------------------------------------------------
def im2col(x, kh, kw, stride, pad):
    """x: (N,H,W,C) -> (N*Ho*Wo, kh*kw*C); patch elements ordered (kh, kw, C)."""
    if pad:
        x = jnp.pad(x, ((0, 0), (pad, pad), (pad, pad), (0, 0)))
    N, H, W, C = x.shape
    Ho = (H - kh) // stride + 1
    Wo = (W - kw) // stride + 1
    cols = []
    for i in range(kh):
        for j in range(kw):
            cols.append(x[:, i:i + (Ho - 1) * stride + 1:stride,
                           j:j + (Wo - 1) * stride + 1:stride, :])
    p = jnp.stack(cols, axis=3)            # (N, Ho, Wo, kh*kw, C)
    return p.reshape(N * Ho * Wo, kh * kw * C), (N, Ho, Wo)


def make_specs(in_c, layers=4, filters=16):
    """Static per-layer conv specs matching the PyTorch module."""
    specs = [(1, 1, 1, 0, in_c, filters, False, "lrelu")]
    f_mult = 1
    for _ in range(layers - 1):
        p_f_mult, f_mult = f_mult, f_mult * 2
        # NOTE: the module's stride-1 'else' branch is dead code (loop bound), so every
        # intermediate conv is k4 s2 p1 -- reproduced faithfully here.
        specs.append((4, 4, 2, 1, filters * p_f_mult, filters * f_mult, True, "lrelu"))
    specs.append((4, 4, 1, 1, filters * f_mult, 1, False, "sigmoid"))
    return tuple(specs)


def make_params(key, specs):
    """Deterministic synthetic parameters (HWIO weights) for every conv/BN layer."""
    params = []
    for (kh, kw, _s, _p, cin, cout, has_bn, _act) in specs:
        key, k1, k2, k3, k4 = jax.random.split(key, 5)
        scale = (kh * kw * cin) ** -0.5
        w = jax.random.uniform(k1, (kh, kw, cin, cout), jnp.float32, -scale, scale)
        b = jax.random.uniform(k2, (cout,), jnp.float32, -scale, scale)
        gamma = 1.0 + 0.1 * jax.random.normal(k3, (cout,), jnp.float32) if has_bn else None
        beta = 0.1 * jax.random.normal(k4, (cout,), jnp.float32) if has_bn else None
        params.append(dict(w=w, b=b, gamma=gamma, beta=beta))
    return params


def discriminator_forward(x_nchw, params, specs, force_tiled=False):
    x = jnp.transpose(x_nchw, (0, 2, 3, 1)).astype(ACT_DTYPE)     # NCHW -> NHWC, bf16 once
    n_layers = len(specs)
    for idx, (p, (kh, kw, s, pad, _cin, cout, has_bn, act)) in enumerate(zip(params, specs)):
        patches, (n, ho, wo) = im2col(x, kh, kw, s, pad)
        w_mat = p["w"].reshape(-1, cout)                          # (kh*kw*Cin, Cout)
        out_dtype = jnp.float32 if idx == n_layers - 1 else ACT_DTYPE
        y = conv_layer(patches, w_mat, p["b"], p["gamma"], p["beta"],
                       has_bn, act, out_dtype, force_tiled=force_tiled)
        x = y.reshape(n, ho, wo, cout)
    return jnp.transpose(x, (0, 3, 1, 2))                         # NHWC -> NCHW


# --------------------------------------------------------------------------------------
# Pure-JAX (f32) reference mirroring the PyTorch module forward
# --------------------------------------------------------------------------------------
def reference_forward(x_nchw, params, specs):
    x = jnp.transpose(x_nchw, (0, 2, 3, 1))
    for p, (_kh, _kw, s, pad, _cin, _cout, has_bn, act) in zip(params, specs):
        y = lax.conv_general_dilated(
            x, p["w"], window_strides=(s, s),
            padding=[(pad, pad), (pad, pad)],
            dimension_numbers=("NHWC", "HWIO", "NHWC"))
        y = y + p["b"]
        if has_bn:
            mean = jnp.mean(y, axis=(0, 1, 2), keepdims=True)
            var = jnp.mean((y - mean) ** 2, axis=(0, 1, 2), keepdims=True)
            y = (y - mean) * lax.rsqrt(var + BN_EPS) * p["gamma"] + p["beta"]
            y = jnp.where(y >= 0, y, LRELU_SLOPE * y)
        elif act == "lrelu":
            y = jnp.where(y >= 0, y, LRELU_SLOPE * y)
        else:
            y = jax.nn.sigmoid(y)
        x = y
    return jnp.transpose(x, (0, 3, 1, 2))


if __name__ == "__main__":
    IN_C, LAYERS, FILTERS = 4, 4, 16          # Discriminator(in_c=4, layers=4, filters=16)
    key = jax.random.PRNGKey(0)
    kx, kp = jax.random.split(key)
    x = jax.random.normal(kx, (2, IN_C, 16, 16), jnp.float32)     # NCHW, like the PyTorch input
    specs = make_specs(IN_C, LAYERS, FILTERS)
    params = make_params(kp, specs)

    fwd = jax.jit(lambda xx, pp: discriminator_forward(xx, pp, specs, force_tiled=False))
    fwd_tiled = jax.jit(lambda xx, pp: discriminator_forward(xx, pp, specs, force_tiled=True))

    out = jax.block_until_ready(fwd(x, params))              # fused per-layer path (toy sizes)
    out_tiled = jax.block_until_ready(fwd_tiled(x, params))  # exercises the scalable tiled path
    ref = jax.block_until_ready(reference_forward(x, params, specs))

    assert out.shape == (2, 1, 1, 1), out.shape               # 16 -> 16 -> 8 -> 4 -> 2 -> 1
    assert bool(jnp.all(jnp.isfinite(out)))
    # bf16 activations/MXU operands + approx reciprocal -> compare loosely against f32 reference.
    assert bool(jnp.allclose(out, ref, atol=4e-2, rtol=4e-2)), (out, ref)
    assert bool(jnp.allclose(out_tiled, ref, atol=4e-2, rtol=4e-2)), (out_tiled, ref)
    print("KERNEL_OK")
</pallas_src>

<mosaic_0001>
module attributes {stable_mosaic.version = 11 : i64} {
  func.func @_fused_layer_kernel(%arg0: memref<512x4xbf16, #tpu.memory_space<vmem>>, %arg1: memref<4x128xbf16, #tpu.memory_space<vmem>>, %arg2: memref<1x128xf32, #tpu.memory_space<vmem>>, %arg3: memref<512x128xbf16, #tpu.memory_space<vmem>>) attributes {dimension_semantics = [], scalar_prefetch = 0 : i64, scratch_operands = 0 : i64, tpu.core_type = #tpu.core_type<tc>} {
    %c0 = arith.constant 0 : index
    %c0_0 = arith.constant 0 : index
    %0 = vector.load %arg0[%c0, %c0_0] : memref<512x4xbf16, #tpu.memory_space<vmem>>, vector<512x4xbf16>
    %1 = arith.extf %0 : vector<512x4xbf16> to vector<512x4xf32>
    %c0_1 = arith.constant 0 : index
    %c0_2 = arith.constant 0 : index
    %2 = vector.load %arg1[%c0_1, %c0_2] : memref<4x128xbf16, #tpu.memory_space<vmem>>, vector<4x128xbf16>
    %3 = arith.extf %2 : vector<4x128xbf16> to vector<4x128xf32>
    %4 = vector.extract_strided_slice %1 {offsets = [0, 0], sizes = [512, 1], strides = [1, 1]} : vector<512x4xf32> to vector<512x1xf32>
    %5 = vector.extract_strided_slice %3 {offsets = [0, 0], sizes = [1, 128], strides = [1, 1]} : vector<4x128xf32> to vector<1x128xf32>
    %6 = vector.broadcast %4 : vector<512x1xf32> to vector<512x128xf32>
    %7 = vector.broadcast %5 : vector<1x128xf32> to vector<512x128xf32>
    %8 = arith.mulf %6, %7 : vector<512x128xf32>
    %9 = vector.extract_strided_slice %1 {offsets = [0, 1], sizes = [512, 1], strides = [1, 1]} : vector<512x4xf32> to vector<512x1xf32>
    %10 = vector.extract_strided_slice %3 {offsets = [1, 0], sizes = [1, 128], strides = [1, 1]} : vector<4x128xf32> to vector<1x128xf32>
    %11 = vector.broadcast %9 : vector<512x1xf32> to vector<512x128xf32>
    %12 = vector.broadcast %10 : vector<1x128xf32> to vector<512x128xf32>
    %13 = arith.mulf %11, %12 : vector<512x128xf32>
    %14 = arith.addf %8, %13 : vector<512x128xf32>
    %15 = vector.extract_strided_slice %1 {offsets = [0, 2], sizes = [512, 1], strides = [1, 1]} : vector<512x4xf32> to vector<512x1xf32>
    %16 = vector.extract_strided_slice %3 {offsets = [2, 0], sizes = [1, 128], strides = [1, 1]} : vector<4x128xf32> to vector<1x128xf32>
    %17 = vector.broadcast %15 : vector<512x1xf32> to vector<512x128xf32>
    %18 = vector.broadcast %16 : vector<1x128xf32> to vector<512x128xf32>
    %19 = arith.mulf %17, %18 : vector<512x128xf32>
    %20 = arith.addf %14, %19 : vector<512x128xf32>
    %21 = vector.extract_strided_slice %1 {offsets = [0, 3], sizes = [512, 1], strides = [1, 1]} : vector<512x4xf32> to vector<512x1xf32>
    %22 = vector.extract_strided_slice %3 {offsets = [3, 0], sizes = [1, 128], strides = [1, 1]} : vector<4x128xf32> to vector<1x128xf32>
    %23 = vector.broadcast %21 : vector<512x1xf32> to vector<512x128xf32>
    %24 = vector.broadcast %22 : vector<1x128xf32> to vector<512x128xf32>
    %25 = arith.mulf %23, %24 : vector<512x128xf32>
    %26 = arith.addf %20, %25 : vector<512x128xf32>
    %c0_3 = arith.constant 0 : index
    %c0_4 = arith.constant 0 : index
    %27 = vector.load %arg2[%c0_3, %c0_4] : memref<1x128xf32, #tpu.memory_space<vmem>>, vector<1x128xf32>
    %28 = vector.broadcast %27 : vector<1x128xf32> to vector<512x128xf32>
    %29 = arith.addf %26, %28 : vector<512x128xf32>
    %cst = arith.constant 0.000000e+00 : f32
    %30 = vector.broadcast %cst : f32 to vector<512x128xf32>
    %31 = arith.cmpf oge, %29, %30 : vector<512x128xf32>
    %cst_5 = arith.constant 2.000000e-01 : f32
    %32 = vector.broadcast %cst_5 : f32 to vector<512x128xf32>
    %33 = arith.mulf %32, %29 : vector<512x128xf32>
    %34 = arith.select %31, %29, %33 : vector<512x128xi1>, vector<512x128xf32>
    %35 = arith.truncf %34 : vector<512x128xf32> to vector<512x128xbf16>
    %c0_6 = arith.constant 0 : index
    %c0_7 = arith.constant 0 : index
    %36 = vector.load %arg3[%c0_6, %c0_7] : memref<512x128xbf16, #tpu.memory_space<vmem>>, vector<512x128xbf16>
    tpu.vector_store %arg3[%c0_6, %c0_7], %35 {strides = array<i32>} : memref<512x128xbf16, #tpu.memory_space<vmem>>, vector<512x128xbf16>,
    return
  }
}

module attributes {stable_mosaic.version = 11 : i64} {
  func.func @_fused_layer_kernel(%arg0: memref<128x256xbf16, #tpu.memory_space<vmem>>, %arg1: memref<256x128xbf16, #tpu.memory_space<vmem>>, %arg2: memref<1x128xf32, #tpu.memory_space<vmem>>, %arg3: memref<1x128xf32, #tpu.memory_space<vmem>>, %arg4: memref<128x128xbf16, #tpu.memory_space<vmem>>) attributes {dimension_semantics = [], scalar_prefetch = 0 : i64, scratch_operands = 0 : i64, tpu.core_type = #tpu.core_type<tc>} {
    %c0 = arith.constant 0 : index
    %c0_0 = arith.constant 0 : index
    %0 = vector.load %arg0[%c0, %c0_0] : memref<128x256xbf16, #tpu.memory_space<vmem>>, vector<128x256xbf16>
    %c0_1 = arith.constant 0 : index
    %c0_2 = arith.constant 0 : index
    %1 = vector.load %arg1[%c0_1, %c0_2] : memref<256x128xbf16, #tpu.memory_space<vmem>>, vector<256x128xbf16>
    %cst = arith.constant dense<0.000000e+00> : vector<128x128xf32>
    %2 = tpu.matmul %0, %1, %cst {dimension_numbers = #tpu.dot_dimension_numbers<[1], [0], [0], [1], [0, 0, 1, 1], [], []>} : vector<128x256xbf16>, vector<256x128xbf16>, vector<128x128xf32> -> vector<128x128xf32>
    %cst_3 = arith.constant dense<0.000000e+00> : vector<128xf32>
    %3 = vector.multi_reduction <add>, %2, %cst_3 [0] : vector<128x128xf32> to vector<128xf32>
    %4 = vector.shape_cast %3 : vector<128xf32> to vector<1x128xf32>
    %cst_4 = arith.constant 7.812500e-03 : f32
    %5 = vector.broadcast %cst_4 : f32 to vector<1x128xf32>
    %6 = arith.mulf %4, %5 : vector<1x128xf32>
    %7 = arith.mulf %2, %2 : vector<128x128xf32>
    %cst_5 = arith.constant dense<0.000000e+00> : vector<128xf32>
    %8 = vector.multi_reduction <add>, %7, %cst_5 [0] : vector<128x128xf32> to vector<128xf32>
    %9 = vector.shape_cast %8 : vector<128xf32> to vector<1x128xf32>
    %cst_6 = arith.constant 7.812500e-03 : f32
    %10 = vector.broadcast %cst_6 : f32 to vector<1x128xf32>
    %11 = arith.mulf %9, %10 : vector<1x128xf32>
    %12 = arith.mulf %6, %6 : vector<1x128xf32>
    %13 = arith.subf %11, %12 : vector<1x128xf32>
    %14 = vector.broadcast %6 : vector<1x128xf32> to vector<128x128xf32>
    %15 = arith.subf %2, %14 : vector<128x128xf32>
    %cst_7 = arith.constant 9.99999974E-6 : f32
    %16 = vector.broadcast %cst_7 : f32 to vector<1x128xf32>
    %17 = arith.addf %13, %16 : vector<1x128xf32>
    %18 = math.rsqrt %17 : vector<1x128xf32>
    %19 = vector.broadcast %18 : vector<1x128xf32> to vector<128x128xf32>
    %20 = arith.mulf %15, %19 : vector<128x128xf32>
    %c0_8 = arith.constant 0 : index
    %c0_9 = arith.constant 0 : index
    %21 = vector.load %arg2[%c0_8, %c0_9] : memref<1x128xf32, #tpu.memory_space<vmem>>, vector<1x128xf32>
    %22 = vector.broadcast %21 : vector<1x128xf32> to vector<128x128xf32>
    %23 = arith.mulf %20, %22 : vector<128x128xf32>
    %c0_10 = arith.constant 0 : index
    %c0_11 = arith.constant 0 : index
    %24 = vector.load %arg3[%c0_10, %c0_11] : memref<1x128xf32, #tpu.memory_space<vmem>>, vector<1x128xf32>
    %25 = vector.broadcast %24 : vector<1x128xf32> to vector<128x128xf32>
    %26 = arith.addf %23, %25 : vector<128x128xf32>
    %cst_12 = arith.constant 0.000000e+00 : f32
    %27 = vector.broadcast %cst_12 : f32 to vector<128x128xf32>
    %28 = arith.cmpf oge, %26, %27 : vector<128x128xf32>
    %cst_13 = arith.constant 2.000000e-01 : f32
    %29 = vector.broadcast %cst_13 : f32 to vector<128x128xf32>
    %30 = arith.mulf %29, %26 : vector<128x128xf32>
    %31 = arith.select %28, %26, %30 : vector<128x128xi1>, vector<128x128xf32>
    %32 = arith.truncf %31 : vector<128x128xf32> to vector<128x128xbf16>
    %c0_14 = arith.constant 0 : index
    %c0_15 = arith.constant 0 : index
    %33 = vector.load %arg4[%c0_14, %c0_15] : memref<128x128xbf16, #tpu.memory_space<vmem>>, vector<128x128xbf16>
    tpu.vector_store %arg4[%c0_14, %c0_15], %32 {strides = array<i32>} : memref<128x128xbf16, #tpu.memory_space<vmem>>, vector<128x128xbf16>,
    return
  }
}

module attributes {stable_mosaic.version = 11 : i64} {
  func.func @_fused_layer_kernel(%arg0: memref<32x512xbf16, #tpu.memory_space<vmem>>, %arg1: memref<512x128xbf16, #tpu.memory_space<vmem>>, %arg2: memref<1x128xf32, #tpu.memory_space<vmem>>, %arg3: memref<1x128xf32, #tpu.memory_space<vmem>>, %arg4: memref<32x128xbf16, #tpu.memory_space<vmem>>) attributes {dimension_semantics = [], scalar_prefetch = 0 : i64, scratch_operands = 0 : i64, tpu.core_type = #tpu.core_type<tc>} {
    %c0 = arith.constant 0 : index
    %c0_0 = arith.constant 0 : index
    %0 = vector.load %arg0[%c0, %c0_0] : memref<32x512xbf16, #tpu.memory_space<vmem>>, vector<32x512xbf16>
    %c0_1 = arith.constant 0 : index
    %c0_2 = arith.constant 0 : index
    %1 = vector.load %arg1[%c0_1, %c0_2] : memref<512x128xbf16, #tpu.memory_space<vmem>>, vector<512x128xbf16>
    %cst = arith.constant dense<0.000000e+00> : vector<32x128xf32>
    %2 = tpu.matmul %0, %1, %cst {dimension_numbers = #tpu.dot_dimension_numbers<[1], [0], [0], [1], [0, 0, 1, 1], [], []>} : vector<32x512xbf16>, vector<512x128xbf16>, vector<32x128xf32> -> vector<32x128xf32>
    %cst_3 = arith.constant dense<0.000000e+00> : vector<128xf32>
    %3 = vector.multi_reduction <add>, %2, %cst_3 [0] : vector<32x128xf32> to vector<128xf32>
    %4 = vector.shape_cast %3 : vector<128xf32> to vector<1x128xf32>
    %cst_4 = arith.constant 3.125000e-02 : f32
    %5 = vector.broadcast %cst_4 : f32 to vector<1x128xf32>
    %6 = arith.mulf %4, %5 : vector<1x128xf32>
    %7 = arith.mulf %2, %2 : vector<32x128xf32>
    %cst_5 = arith.constant dense<0.000000e+00> : vector<128xf32>
    %8 = vector.multi_reduction <add>, %7, %cst_5 [0] : vector<32x128xf32> to vector<128xf32>
    %9 = vector.shape_cast %8 : vector<128xf32> to vector<1x128xf32>
    %cst_6 = arith.constant 3.125000e-02 : f32
    %10 = vector.broadcast %cst_6 : f32 to vector<1x128xf32>
    %11 = arith.mulf %9, %10 : vector<1x128xf32>
    %12 = arith.mulf %6, %6 : vector<1x128xf32>
    %13 = arith.subf %11, %12 : vector<1x128xf32>
    %14 = vector.broadcast %6 : vector<1x128xf32> to vector<32x128xf32>
    %15 = arith.subf %2, %14 : vector<32x128xf32>
    %cst_7 = arith.constant 9.99999974E-6 : f32
    %16 = vector.broadcast %cst_7 : f32 to vector<1x128xf32>
    %17 = arith.addf %13, %16 : vector<1x128xf32>
    %18 = math.rsqrt %17 : vector<1x128xf32>
    %19 = vector.broadcast %18 : vector<1x128xf32> to vector<32x128xf32>
    %20 = arith.mulf %15, %19 : vector<32x128xf32>
    %c0_8 = arith.constant 0 : index
    %c0_9 = arith.constant 0 : index
    %21 = vector.load %arg2[%c0_8, %c0_9] : memref<1x128xf32, #tpu.memory_space<vmem>>, vector<1x128xf32>
    %22 = vector.broadcast %21 : vector<1x128xf32> to vector<32x128xf32>
    %23 = arith.mulf %20, %22 : vector<32x128xf32>
    %c0_10 = arith.constant 0 : index
    %c0_11 = arith.constant 0 : index
    %24 = vector.load %arg3[%c0_10, %c0_11] : memref<1x128xf32, #tpu.memory_space<vmem>>, vector<1x128xf32>
    %25 = vector.broadcast %24 : vector<1x128xf32> to vector<32x128xf32>
    %26 = arith.addf %23, %25 : vector<32x128xf32>
    %cst_12 = arith.constant 0.000000e+00 : f32
    %27 = vector.broadcast %cst_12 : f32 to vector<32x128xf32>
    %28 = arith.cmpf oge, %26, %27 : vector<32x128xf32>
    %cst_13 = arith.constant 2.000000e-01 : f32
    %29 = vector.broadcast %cst_13 : f32 to vector<32x128xf32>
    %30 = arith.mulf %29, %26 : vector<32x128xf32>
    %31 = arith.select %28, %26, %30 : vector<32x128xi1>, vector<32x128xf32>
    %32 = arith.truncf %31 : vector<32x128xf32> to vector<32x128xbf16>
    %c0_14 = arith.constant 0 : index
    %c0_15 = arith.constant 0 : index
    %33 = vector.load %arg4[%c0_14, %c0_15] : memref<32x128xbf16, #tpu.memory_space<vmem>>, vector<32x128xbf16>
    tpu.vector_store %arg4[%c0_14, %c0_15], %32 {strides = array<i32>} : memref<32x128xbf16, #tpu.memory_space<vmem>>, vector<32x128xbf16>,
    return
  }
}

module attributes {stable_mosaic.version = 11 : i64} {
  func.func @_fused_layer_kernel(%arg0: memref<8x1024xbf16, #tpu.memory_space<vmem>>, %arg1: memref<1024x128xbf16, #tpu.memory_space<vmem>>, %arg2: memref<1x128xf32, #tpu.memory_space<vmem>>, %arg3: memref<1x128xf32, #tpu.memory_space<vmem>>, %arg4: memref<8x128xbf16, #tpu.memory_space<vmem>>) attributes {dimension_semantics = [], scalar_prefetch = 0 : i64, scratch_operands = 0 : i64, tpu.core_type = #tpu.core_type<tc>} {
    %c0 = arith.constant 0 : index
    %c0_0 = arith.constant 0 : index
    %0 = vector.load %arg0[%c0, %c0_0] : memref<8x1024xbf16, #tpu.memory_space<vmem>>, vector<8x1024xbf16>
    %c0_1 = arith.constant 0 : index
    %c0_2 = arith.constant 0 : index
    %1 = vector.load %arg1[%c0_1, %c0_2] : memref<1024x128xbf16, #tpu.memory_space<vmem>>, vector<1024x128xbf16>
    %cst = arith.constant dense<0.000000e+00> : vector<8x128xf32>
    %2 = tpu.matmul %0, %1, %cst {dimension_numbers = #tpu.dot_dimension_numbers<[1], [0], [0], [1], [0, 0, 1, 1], [], []>} : vector<8x1024xbf16>, vector<1024x128xbf16>, vector<8x128xf32> -> vector<8x128xf32>
    %cst_3 = arith.constant dense<0.000000e+00> : vector<128xf32>
    %3 = vector.multi_reduction <add>, %2, %cst_3 [0] : vector<8x128xf32> to vector<128xf32>
    %4 = vector.shape_cast %3 : vector<128xf32> to vector<1x128xf32>
    %cst_4 = arith.constant 1.250000e-01 : f32
    %5 = vector.broadcast %cst_4 : f32 to vector<1x128xf32>
    %6 = arith.mulf %4, %5 : vector<1x128xf32>
    %7 = arith.mulf %2, %2 : vector<8x128xf32>
    %cst_5 = arith.constant dense<0.000000e+00> : vector<128xf32>
    %8 = vector.multi_reduction <add>, %7, %cst_5 [0] : vector<8x128xf32> to vector<128xf32>
    %9 = vector.shape_cast %8 : vector<128xf32> to vector<1x128xf32>
    %cst_6 = arith.constant 1.250000e-01 : f32
    %10 = vector.broadcast %cst_6 : f32 to vector<1x128xf32>
    %11 = arith.mulf %9, %10 : vector<1x128xf32>
    %12 = arith.mulf %6, %6 : vector<1x128xf32>
    %13 = arith.subf %11, %12 : vector<1x128xf32>
    %14 = vector.broadcast %6 : vector<1x128xf32> to vector<8x128xf32>
    %15 = arith.subf %2, %14 : vector<8x128xf32>
    %cst_7 = arith.constant 9.99999974E-6 : f32
    %16 = vector.broadcast %cst_7 : f32 to vector<1x128xf32>
    %17 = arith.addf %13, %16 : vector<1x128xf32>
    %18 = math.rsqrt %17 : vector<1x128xf32>
    %19 = vector.broadcast %18 : vector<1x128xf32> to vector<8x128xf32>
    %20 = arith.mulf %15, %19 : vector<8x128xf32>
    %c0_8 = arith.constant 0 : index
    %c0_9 = arith.constant 0 : index
    %21 = vector.load %arg2[%c0_8, %c0_9] : memref<1x128xf32, #tpu.memory_space<vmem>>, vector<1x128xf32>
    %22 = vector.broadcast %21 : vector<1x128xf32> to vector<8x128xf32>
    %23 = arith.mulf %20, %22 : vector<8x128xf32>
    %c0_10 = arith.constant 0 : index
    %c0_11 = arith.constant 0 : index
    %24 = vector.load %arg3[%c0_10, %c0_11] : memref<1x128xf32, #tpu.memory_space<vmem>>, vector<1x128xf32>
    %25 = vector.broadcast %24 : vector<1x128xf32> to vector<8x128xf32>
    %26 = arith.addf %23, %25 : vector<8x128xf32>
    %cst_12 = arith.constant 0.000000e+00 : f32
    %27 = vector.broadcast %cst_12 : f32 to vector<8x128xf32>
    %28 = arith.cmpf oge, %26, %27 : vector<8x128xf32>
    %cst_13 = arith.constant 2.000000e-01 : f32
    %29 = vector.broadcast %cst_13 : f32 to vector<8x128xf32>
    %30 = arith.mulf %29, %26 : vector<8x128xf32>
    %31 = arith.select %28, %26, %30 : vector<8x128xi1>, vector<8x128xf32>
    %32 = arith.truncf %31 : vector<8x128xf32> to vector<8x128xbf16>
    %c0_14 = arith.constant 0 : index
    %c0_15 = arith.constant 0 : index
    %33 = vector.load %arg4[%c0_14, %c0_15] : memref<8x128xbf16, #tpu.memory_space<vmem>>, vector<8x128xbf16>
    tpu.vector_store %arg4[%c0_14, %c0_15], %32 {strides = array<i32>} : memref<8x128xbf16, #tpu.memory_space<vmem>>, vector<8x128xbf16>,
    return
  }
}

module attributes {stable_mosaic.version = 11 : i64} {
  func.func @_fused_layer_kernel(%arg0: memref<2x2048xbf16, #tpu.memory_space<vmem>>, %arg1: memref<2048x128xbf16, #tpu.memory_space<vmem>>, %arg2: memref<1x128xf32, #tpu.memory_space<vmem>>, %arg3: memref<2x128xf32, #tpu.memory_space<vmem>>) attributes {dimension_semantics = [], scalar_prefetch = 0 : i64, scratch_operands = 0 : i64, tpu.core_type = #tpu.core_type<tc>} {
    %c0 = arith.constant 0 : index
    %c0_0 = arith.constant 0 : index
    %0 = vector.load %arg0[%c0, %c0_0] : memref<2x2048xbf16, #tpu.memory_space<vmem>>, vector<2x2048xbf16>
    %c0_1 = arith.constant 0 : index
    %c0_2 = arith.constant 0 : index
    %1 = vector.load %arg1[%c0_1, %c0_2] : memref<2048x128xbf16, #tpu.memory_space<vmem>>, vector<2048x128xbf16>
    %cst = arith.constant dense<0.000000e+00> : vector<2x128xf32>
    %2 = tpu.matmul %0, %1, %cst {dimension_numbers = #tpu.dot_dimension_numbers<[1], [0], [0], [1], [0, 0, 1, 1], [], []>} : vector<2x2048xbf16>, vector<2048x128xbf16>, vector<2x128xf32> -> vector<2x128xf32>
    %c0_3 = arith.constant 0 : index
    %c0_4 = arith.constant 0 : index
    %3 = vector.load %arg2[%c0_3, %c0_4] : memref<1x128xf32, #tpu.memory_space<vmem>>, vector<1x128xf32>
    %4 = vector.broadcast %3 : vector<1x128xf32> to vector<2x128xf32>
    %5 = arith.addf %2, %4 : vector<2x128xf32>
    %cst_5 = arith.constant 0.000000e+00 : f32
    %6 = vector.broadcast %cst_5 : f32 to vector<2x128xf32>
    %7 = arith.subf %6, %5 : vector<2x128xf32>
    %8 = math.exp %7 : vector<2x128xf32>
    %cst_6 = arith.constant 1.000000e+00 : f32
    %9 = vector.broadcast %cst_6 : f32 to vector<2x128xf32>
    %10 = arith.addf %9, %8 : vector<2x128xf32>
    %11 = tpu.reciprocal %10 {approx = true} : vector<2x128xf32> -> vector<2x128xf32>
    %c0_7 = arith.constant 0 : index
    %c0_8 = arith.constant 0 : index
    %12 = vector.load %arg3[%c0_7, %c0_8] : memref<2x128xf32, #tpu.memory_space<vmem>>, vector<2x128xf32>
    tpu.vector_store %arg3[%c0_7, %c0_8], %11 {strides = array<i32>} : memref<2x128xf32, #tpu.memory_space<vmem>>, vector<2x128xf32>,
    return
  }
}

</mosaic_0001>

<bundles_post_ra>
// kernel: _lambda_.5
= control target key start
LH: loop header
LB: loop body
LE: loop exit
PB: predicated region body
PF: predicated region fallthrough
CT: control target
= control target key end

     0   :  { %v3415_v0 = vmov 0   ;;  %s4864_s0 = inlined_call_operand.vmem [shape: bf16[512,4], index: 0, kind: input, shape index: {}]   ;;  %s4865_s1 = inlined_call_operand.vmem [shape: bf16[4,128], index: 1, kind: input, shape index: {}]   ;;  %s4866_s2 = inlined_call_operand.vmem [shape: f32[1,128], index: 2, kind: input, shape index: {}]   ;;  %s4867_s3 = inlined_call_operand.vmem [shape: bf16[512,128], index: 3, kind: output, shape index: {}]  }
   0x1   :  { %2777 = vset.pattern.permute.xlu1 %v3415_v0  ;;  %2766 = vset.pattern.permute.xlu0 %v3415_v0  ;;  %v2701_v1 = vld [vmem:[%s4864_s0 + $0x10] sm:$0xff]   ;;  %v2413_v2 = vld [vmem:[%s4864_s0] sm:$0xff]   ;;  %v2702_v3 = vld [vmem:[%s4864_s0 + $0x18] sm:$0xff]  }
   0x2   :  { %v2422_v4 = vunpack.c.l.bf16 %v2701_v1  ;;  %v2423_v5 = vunpack.c.h.bf16 %v2701_v1  ;;  %v2414_v6 = vunpack.c.l.bf16 %v2413_v2  ;;  %v2415_v7 = vunpack.c.h.bf16 %v2413_v2  ;;  %v2700_v8 = vld [vmem:[%s4864_s0 + $0x8] sm:$0xff]   ;;  %v2703_v14 = vld [vmem:[%s4864_s0 + $0x20] sm:$0xff]   ;;  %v2706_v23 = vld [vmem:[%s4864_s0 + $0x38] sm:$0xff]  }
   0x3   :  { %v2704_v9 = vld [vmem:[%s4864_s0 + $0x28] sm:$0xff]   ;;  %v2426_v10 = vunpack.c.l.bf16 %v2702_v3  ;;  %v2427_v11 = vunpack.c.h.bf16 %v2702_v3  ;;  %v2418_v12 = vunpack.c.l.bf16 %v2700_v8  ;;  %v2419_v13 = vunpack.c.h.bf16 %v2700_v8  ;;  %v2705_v24 = vld [vmem:[%s4864_s0 + $0x30] sm:$0xff]   ;;  %v2707_v32 = vld [vmem:[%s4864_s0 + $0x40] sm:$0xff]  }
   0x4   :  { %v3457_v15 = vpack.i.bf16 %v2423_v5, %v2422_v4  ;;  %v3459_v16 = vpack.i.bf16 %v2415_v7, %v2414_v6  ;;  %v2434_v17 = vunpack.c.l.bf16 %v2704_v9  ;;  %v2435_v18 = vunpack.c.h.bf16 %v2704_v9  ;;  %v2708_v31 = vld [vmem:[%s4864_s0 + $0x48] sm:$0xff]   ;;  %v2710_v39 = vld [vmem:[%s4864_s0 + $0x58] sm:$0xff]   ;;  %v2709_v40 = vld [vmem:[%s4864_s0 + $0x50] sm:$0xff]  }
   0x5   :  { %v3463_v19 = vpack.i.bf16 %v2427_v11, %v2426_v10  ;;  %v3465_v20 = vpack.i.bf16 %v2419_v13, %v2418_v12  ;;  %v2430_v21 = vunpack.c.l.bf16 %v2703_v14  ;;  %v2431_v22 = vunpack.c.h.bf16 %v2703_v14  ;;  %v2712_v47 = vld [vmem:[%s4864_s0 + $0x68] sm:$0xff]   ;;  %v2711_v48 = vld [vmem:[%s4864_s0 + $0x60] sm:$0xff]   ;;  %v2714_v55 = vld [vmem:[%s4864_s0 + $0x78] sm:$0xff]  }
   0x6   :  { %2779 = vperm.xlu1 %2777, %v3457_v15   ;;  %2768 = vperm.xlu0 %2766, %v3459_v16   ;;  %v3473_v25 = vpack.i.bf16 %v2435_v18, %v2434_v17  ;;  %v2442_v26 = vunpack.c.l.bf16 %v2706_v23  ;;  %v2443_v28 = vunpack.c.h.bf16 %v2706_v23  ;;  %v2438_v29 = vunpack.c.l.bf16 %v2705_v24  ;;  %v2713_v56 = vld [vmem:[%s4864_s0 + $0x70] sm:$0xff]   ;;  %v2716_v63 = vld [vmem:[%s4864_s0 + $0x88] sm:$0xff]   ;;  %v2715_v0 = vld [vmem:[%s4864_s0 + $0x80] sm:$0xff]  }
   0x7   :  { %v3477_v27 = vpack.i.bf16 %v2431_v22, %v2430_v21  ;;  %v2439_v30 = vunpack.c.h.bf16 %v2705_v24  ;;  %v2450_v33 = vunpack.c.l.bf16 %v2708_v31  ;;  %v2451_v34 = vunpack.c.h.bf16 %v2708_v31  ;;  %v2718_v7 = vld [vmem:[%s4864_s0 + $0x98] sm:$0xff]   ;;  %v2717_v8 = vld [vmem:[%s4864_s0 + $0x90] sm:$0xff]   ;;  %v2720_v17 = vld [vmem:[%s4864_s0 + $0xa8] sm:$0xff]  }
   0x8   :  { %v3487_v35 = vpack.i.bf16 %v2443_v28, %v2442_v26  ;;  %v2446_v37 = vunpack.c.l.bf16 %v2707_v32  ;;  %v2447_v38 = vunpack.c.h.bf16 %v2707_v32  ;;  %v2458_v42 = vunpack.c.l.bf16 %v2710_v39  ;;  %v2719_v18 = vld [vmem:[%s4864_s0 + $0xa0] sm:$0xff]  }
   0x9   :  { %v3489_v36 = vpack.i.bf16 %v2439_v30, %v2438_v29  ;;  %v3497_v41 = vpack.i.bf16 %v2451_v34, %v2450_v33  ;;  %v2459_v44 = vunpack.c.h.bf16 %v2710_v39  ;;  %v2454_v45 = vunpack.c.l.bf16 %v2709_v40  ;;  %v2722_v29 = vld [vmem:[%s4864_s0 + $0xb8] sm:$0xff]   ;;  %v2721_v30 = vld [vmem:[%s4864_s0 + $0xb0] sm:$0xff]   ;;  %v2724_v39 = vld [vmem:[%s4864_s0 + $0xc8] sm:$0xff]  }
   0xa   :  { %2784 = vperm.xlu1 %2777, %v3463_v19   ;;  %2773 = vperm.xlu0 %2766, %v3465_v20   ;;  %v3501_v43 = vpack.i.bf16 %v2447_v38, %v2446_v37  ;;  %v2455_v46 = vunpack.c.h.bf16 %v2709_v40  ;;  %v2466_v49 = vunpack.c.l.bf16 %v2712_v47  ;;  %v2467_v50 = vunpack.c.h.bf16 %v2712_v47  ;;  %v2723_v40 = vld [vmem:[%s4864_s0 + $0xc0] sm:$0xff]  }
   0xb   :  { %v3511_v51 = vpack.i.bf16 %v2459_v44, %v2458_v42  ;;  %v2462_v53 = vunpack.c.l.bf16 %v2711_v48  ;;  %v2463_v54 = vunpack.c.h.bf16 %v2711_v48  ;;  %v2474_v58 = vunpack.c.l.bf16 %v2714_v55 }
   0xc   :  { %v3513_v52 = vpack.i.bf16 %v2455_v46, %v2454_v45  ;;  %v3521_v57 = vpack.i.bf16 %v2467_v50, %v2466_v49  ;;  %v2475_v60 = vunpack.c.h.bf16 %v2714_v55  ;;  %v2470_v61 = vunpack.c.l.bf16 %v2713_v56  ;;  %v2726_v49 = vld [vmem:[%s4864_s0 + $0xd8] sm:$0xff]   ;;  %v2725_v50 = vld [vmem:[%s4864_s0 + $0xd0] sm:$0xff]  }
   0xd   :  { %v3525_v59 = vpack.i.bf16 %v2463_v54, %v2462_v53  ;;  %v2471_v62 = vunpack.c.h.bf16 %v2713_v56  ;;  %v2482_v1 = vunpack.c.l.bf16 %v2716_v63  ;;  %v2483_v2 = vunpack.c.h.bf16 %v2716_v63 }
   0xe   :  { %2794 = vperm.xlu1 %2777, %v3473_v25   ;;  %2789 = vperm.xlu0 %2766, %v3477_v27   ;;  %v3535_v3 = vpack.i.bf16 %v2475_v60, %v2474_v58  ;;  %v2478_v5 = vunpack.c.l.bf16 %v2715_v0  ;;  %v2479_v6 = vunpack.c.h.bf16 %v2715_v0  ;;  %v2490_v10 = vunpack.c.l.bf16 %v2718_v7 }
   0xf   :  { %v3537_v4 = vpack.i.bf16 %v2471_v62, %v2470_v61  ;;  %v3545_v9 = vpack.i.bf16 %v2483_v2, %v2482_v1  ;;  %v2491_v12 = vunpack.c.h.bf16 %v2718_v7  ;;  %v2486_v13 = vunpack.c.l.bf16 %v2717_v8  ;;  %v2728_v61 = vld [vmem:[%s4864_s0 + $0xe8] sm:$0xff]   ;;  %v2727_v62 = vld [vmem:[%s4864_s0 + $0xe0] sm:$0xff]   ;;  %v2730_v7 = vld [vmem:[%s4864_s0 + $0xf8] sm:$0xff]  }
  0x10   :  { %v3549_v11 = vpack.i.bf16 %v2479_v6, %v2478_v5  ;;  %v2487_v14 = vunpack.c.h.bf16 %v2717_v8  ;;  %v2498_v21 = vunpack.c.l.bf16 %v2720_v17  ;;  %v2499_v22 = vunpack.c.h.bf16 %v2720_v17  ;;  %v2729_v8 = vld [vmem:[%s4864_s0 + $0xf0] sm:$0xff]  }
  0x11   :  { %v3559_v23 = vpack.i.bf16 %v2491_v12, %v2490_v10  ;;  %v2494_v26 = vunpack.c.l.bf16 %v2719_v18  ;;  %v2495_v28 = vunpack.c.h.bf16 %v2719_v18  ;;  %v2506_v32 = vunpack.c.l.bf16 %v2722_v29 }
  0x12   :  { %2804 = vperm.xlu1 %2777, %v3487_v35   ;;  %2799 = vperm.xlu0 %2766, %v3489_v36   ;;  %4895 = vst [vmem:[#allocation2_spill] sm:$0xff] %v3549_v11  ;;  %v3561_v24 = vpack.i.bf16 %v2487_v14, %v2486_v13  ;;  %v3569_v31 = vpack.i.bf16 %v2499_v22, %v2498_v21  ;;  %v2507_v34 = vunpack.c.h.bf16 %v2722_v29  ;;  %v2502_v37 = vunpack.c.l.bf16 %v2721_v30 }
  0x13   :  { %4896 = vst [vmem:[#allocation3_spill] sm:$0xff] %v3559_v23  ;;  %v3573_v33 = vpack.i.bf16 %v2495_v28, %v2494_v26  ;;  %v2503_v38 = vunpack.c.h.bf16 %v2721_v30  ;;  %v2514_v42 = vunpack.c.l.bf16 %v2724_v39  ;;  %v2515_v44 = vunpack.c.h.bf16 %v2724_v39 }
  0x14   :  { %4897 = vst [vmem:[#allocation4_spill] sm:$0xff] %v3561_v24  ;;  %4898 = vst [vmem:[#allocation5_spill] sm:$0xff] %v3569_v31  ;;  %v3583_v45 = vpack.i.bf16 %v2507_v34, %v2506_v32  ;;  %v2510_v47 = vunpack.c.l.bf16 %v2723_v40  ;;  %v2511_v48 = vunpack.c.h.bf16 %v2723_v40  ;;  %v2522_v54 = vunpack.c.l.bf16 %v2726_v49 }
  0x15   :  { %4899 = vst [vmem:[#allocation6_spill] sm:$0xff] %v3573_v33  ;;  %v3585_v46 = vpack.i.bf16 %v2503_v38, %v2502_v37  ;;  %v3593_v53 = vpack.i.bf16 %v2515_v44, %v2514_v42  ;;  %v2523_v56 = vunpack.c.h.bf16 %v2726_v49  ;;  %v2518_v58 = vunpack.c.l.bf16 %v2725_v50 }
  0x16   :  { %2814 = vperm.xlu1 %2777, %v3497_v41   ;;  %2809 = vperm.xlu0 %2766, %v3501_v43   ;;  %4900 = vst [vmem:[#allocation7_spill] sm:$0xff] %v3583_v45  ;;  %v3597_v55 = vpack.i.bf16 %v2511_v48, %v2510_v47  ;;  %v2519_v60 = vunpack.c.h.bf16 %v2725_v50  ;;  %v2530_v63 = vunpack.c.l.bf16 %v2728_v61  ;;  %v2531_v0 = vunpack.c.h.bf16 %v2728_v61 }
  0x17   :  { %4901 = vst [vmem:[#allocation8_spill] sm:$0xff] %v3585_v46  ;;  %4902 = vst [vmem:[#allocation9_spill] sm:$0xff] %v3593_v53  ;;  %v3607_v1 = vpack.i.bf16 %v2523_v56, %v2522_v54  ;;  %v2526_v5 = vunpack.c.l.bf16 %v2727_v62  ;;  %v2527_v6 = vunpack.c.h.bf16 %v2727_v62  ;;  %v2538_v12 = vunpack.c.l.bf16 %v2730_v7 }
  0x18   :  { %4903 = vst [vmem:[#allocation10_spill] sm:$0xff] %v3597_v55  ;;  %v3609_v2 = vpack.i.bf16 %v2519_v60, %v2518_v58  ;;  %v3617_v10 = vpack.i.bf16 %v2531_v0, %v2530_v63  ;;  %v2539_v14 = vunpack.c.h.bf16 %v2730_v7  ;;  %v2534_v17 = vunpack.c.l.bf16 %v2729_v8 }
  0x19   :  { %4904 = vst [vmem:[#allocation11_spill] sm:$0xff] %v3607_v1  ;;  %v3621_v13 = vpack.i.bf16 %v2527_v6, %v2526_v5  ;;  %v2535_v18 = vunpack.c.h.bf16 %v2729_v8  ;;  %v3416_v26 = vmov 1   ;;  %v3417_v30 = vmov 2  }
  0x1a   :  { %2824 = vperm.xlu1 %2777, %v3511_v51   ;;  %2819 = vperm.xlu0 %2766, %v3513_v52   ;;  %4905 = vst [vmem:[#allocation12_spill] sm:$0xff] %v3609_v2  ;;  %4906 = vst [vmem:[#allocation13_spill] sm:$0xff] %v3617_v10  ;;  %v3625_v21 = vpack.i.bf16 %v2539_v14, %v2538_v12  ;;  %v464_v7 = vlaneseq }
  0x1b   :  { %4907 = vst [vmem:[#allocation14_spill] sm:$0xff] %v3621_v13  ;;  %v3627_v22 = vpack.i.bf16 %v2535_v18, %v2534_v17  ;;  %v142_v17 = vld [vmem:[%s4865_s1] sm:$0x3] }
  0x1c   :  { %4908 = vst [vmem:[#allocation15_spill] sm:$0xff] %v3625_v21  ;;  %v3739_v14 = vshrl.u32 %v464_v7, 7 }
  0x1d   :  { %4909 = vst [vmem:[#allocation16_spill] sm:$0xff] %v3627_v22 }
  0x1e   :  { %2834 = vperm.xlu1 %2777, %v3521_v57   ;;  %2829 = vperm.xlu0 %2766, %v3525_v59  }
  0x22   :  { %2844 = vperm.xlu1 %2777, %v3535_v3   ;;  %2839 = vperm.xlu0 %2766, %v3537_v4  }
  0x26   :  { %2854 = vperm.xlu1 %2777, %v3545_v9   ;;  %2849 = vperm.xlu0 %2766, %v3549_v11  }
  0x2a   :  { %2864 = vperm.xlu1 %2777, %v3559_v23   ;;  %2859 = vperm.xlu0 %2766, %v3561_v24  }
  0x2e   :  { %2874 = vperm.xlu1 %2777, %v3569_v31   ;;  %2869 = vperm.xlu0 %2766, %v3573_v33  }
  0x32   :  { %2884 = vperm.xlu1 %2777, %v3583_v45   ;;  %2879 = vperm.xlu0 %2766, %v3585_v46  }
  0x36   :  { %2894 = vperm.xlu1 %2777, %v3593_v53   ;;  %2889 = vperm.xlu0 %2766, %v3597_v55  }
  0x3a   :  { %2904 = vperm.xlu1 %2777, %v3607_v1   ;;  %2899 = vperm.xlu0 %2766, %v3609_v2  }
  0x3e   :  { %2914 = vperm.xlu1 %2777, %v3617_v10   ;;  %2909 = vperm.xlu0 %2766, %v3621_v13  }
  0x42   :  { %2924 = vperm.xlu1 %2777, %v3625_v21   ;;  %2919 = vperm.xlu0 %2766, %v3627_v22  }
  0x46   :  { %2934 = vset.pattern.permute.xlu1 %v3416_v26  ;;  %2928 = vset.pattern.permute.xlu0 %v3416_v26 }
  0x47   :  { %2936 = vperm.xlu1 %2934, %v3465_v20   ;;  %2930 = vperm.xlu0 %2928, %v3459_v16  }
  0x4b   :  { %2941 = vperm.xlu1 %2934, %v3457_v15   ;;  %2946 = vperm.xlu0 %2928, %v3463_v19  }
  0x4f   :  { %2951 = vperm.xlu1 %2934, %v3477_v27   ;;  %2956 = vperm.xlu0 %2928, %v3473_v25  }
  0x53   :  { %2961 = vperm.xlu1 %2934, %v3489_v36   ;;  %2966 = vperm.xlu0 %2928, %v3487_v35  }
  0x57   :  { %2971 = vperm.xlu1 %2934, %v3501_v43   ;;  %2976 = vperm.xlu0 %2928, %v3497_v41  }
  0x5b   :  { %2981 = vperm.xlu1 %2934, %v3513_v52   ;;  %2986 = vperm.xlu0 %2928, %v3511_v51  }
  0x5f   :  { %2991 = vperm.xlu1 %2934, %v3525_v59   ;;  %2996 = vperm.xlu0 %2928, %v3521_v57  }
  0x63   :  { %3001 = vperm.xlu1 %2934, %v3537_v4   ;;  %3006 = vperm.xlu0 %2928, %v3535_v3  }
  0x67   :  { %3011 = vperm.xlu1 %2934, %v3549_v11   ;;  %3016 = vperm.xlu0 %2928, %v3545_v9  }
  0x6b   :  { %3021 = vperm.xlu1 %2934, %v3561_v24   ;;  %3026 = vperm.xlu0 %2928, %v3559_v23  }
  0x6f   :  { %3031 = vperm.xlu1 %2934, %v3573_v33   ;;  %3036 = vperm.xlu0 %2928, %v3569_v31  }
  0x73   :  { %3041 = vperm.xlu1 %2934, %v3585_v46   ;;  %3046 = vperm.xlu0 %2928, %v3583_v45  }
  0x77   :  { %3051 = vperm.xlu1 %2934, %v3597_v55   ;;  %3056 = vperm.xlu0 %2928, %v3593_v53  }
  0x7b   :  { %3061 = vperm.xlu1 %2934, %v3609_v2   ;;  %3066 = vperm.xlu0 %2928, %v3607_v1  }
  0x7f   :  { %3071 = vperm.xlu1 %2934, %v3621_v13   ;;  %3076 = vperm.xlu0 %2928, %v3617_v10  }
  0x83   :  { %3081 = vperm.xlu1 %2934, %v3627_v22   ;;  %3086 = vperm.xlu0 %2928, %v3625_v21  }
  0x85   :  { %v3663_v28 = vpop.permute.xlu1 %2779  ;;  %v3665_v29 = vpop.permute.xlu0 %2768 }
  0x87   :  { %3090 = vset.pattern.permute.xlu1 %v3417_v30  ;;  %3096 = vset.pattern.permute.xlu0 %v3417_v30  ;;  %v3750_v30 = vunpack.c.l.bf16 %v142_v17 }
  0x88   :  { %3092 = vperm.xlu1 %3090, %v3459_v16   ;;  %3098 = vperm.xlu0 %3096, %v3465_v20  }
  0x89   :  { %v3669_v32 = vpop.permute.xlu1 %2784  ;;  %v3671_v34 = vpop.permute.xlu0 %2773 }
  0x8c   :  { %3103 = vperm.xlu1 %3090, %v3457_v15   ;;  %3113 = vperm.xlu0 %3096, %v3477_v27  }
  0x8d   :  { %v3675_v37 = vpop.permute.xlu1 %2794  ;;  %v3677_v38 = vpop.permute.xlu0 %2789 }
  0x90   :  { %3108 = vperm.xlu1 %3090, %v3463_v19   ;;  %3123 = vperm.xlu0 %3096, %v3489_v36  }
  0x91   :  { %v3681_v39 = vpop.permute.xlu1 %2804  ;;  %v3683_v40 = vpop.permute.xlu0 %2799 }
  0x94   :  { %3118 = vperm.xlu1 %3090, %v3473_v25   ;;  %3133 = vperm.xlu0 %3096, %v3501_v43  }
  0x95   :  { %v3687_v42 = vpop.permute.xlu1 %2814  ;;  %v3689_v44 = vpop.permute.xlu0 %2809 }
  0x98   :  { %3128 = vperm.xlu1 %3090, %v3487_v35   ;;  %3143 = vperm.xlu0 %3096, %v3513_v52  }
  0x99   :  { %v3693_v47 = vpop.permute.xlu1 %2824  ;;  %v3695_v48 = vpop.permute.xlu0 %2819 }
  0x9c   :  { %3138 = vperm.xlu1 %3090, %v3497_v41   ;;  %3153 = vperm.xlu0 %3096, %v3525_v59  }
  0x9d   :  { %v3699_v49 = vpop.permute.xlu1 %2834  ;;  %v3701_v50 = vpop.permute.xlu0 %2829 }
  0xa0   :  { %3148 = vperm.xlu1 %3090, %v3511_v51   ;;  %3163 = vperm.xlu0 %3096, %v3537_v4  }
  0xa1   :  { %v3705_v54 = vpop.permute.xlu1 %2844  ;;  %v3707_v56 = vpop.permute.xlu0 %2839 }
  0xa4   :  { %3158 = vperm.xlu1 %3090, %v3521_v57   ;;  %3173 = vperm.xlu0 %3096, %v3549_v11  }
  0xa5   :  { %v3711_v58 = vpop.permute.xlu1 %2854  ;;  %v3713_v60 = vpop.permute.xlu0 %2849 }
  0xa8   :  { %3168 = vperm.xlu1 %3090, %v3535_v3   ;;  %3183 = vperm.xlu0 %3096, %v3561_v24   ;;  %v790_v24 = vsub.s32 1, %v3739_v14 }
  0xa9   :  { %v3717_v61 = vpop.permute.xlu1 %2864  ;;  %v3719_v62 = vpop.permute.xlu0 %2859 }
  0xac   :  { %3178 = vperm.xlu1 %3090, %v3545_v9   ;;  %3193 = vperm.xlu0 %3096, %v3573_v33  }
  0xad   :  { %v3723_v63 = vpop.permute.xlu1 %2874  ;;  %v3725_v0 = vpop.permute.xlu0 %2869 }
  0xb0   :  { %3188 = vperm.xlu1 %3090, %v3559_v23   ;;  %3203 = vperm.xlu0 %3096, %v3585_v46   ;;  %v3772_v23 = vrot.slane %v3750_v30, %v790_v24  ;;  %v2782_v24 = vunpack.i.h.bf16 %v3663_v28 }
  0xb1   :  { %v3729_v5 = vpop.permute.xlu1 %2884  ;;  %v3731_v6 = vpop.permute.xlu0 %2879 }
  0xb4   :  { %3198 = vperm.xlu1 %3090, %v3569_v31   ;;  %3213 = vperm.xlu0 %3096, %v3597_v55   ;;  %v466_v55 = vsub.s32 0, %v3739_v14 }
  0xb5   :  { %v3735_v8 = vpop.permute.xlu1 %2894  ;;  %v3737_v12 = vpop.permute.xlu0 %2889 }
  0xb6   :  { %v3758_v33 = vrot.slane %v3750_v30, %v466_v55 }
  0xb8   :  { %3208 = vperm.xlu1 %3090, %v3583_v45   ;;  %3223 = vperm.xlu0 %3096, %v3609_v2  }
  0xb9   :  { %v3746_v18 = vpop.permute.xlu1 %2904  ;;  %v3748_v26 = vpop.permute.xlu0 %2899 }
  0xbc   :  { %3218 = vperm.xlu1 %3090, %v3593_v53   ;;  %3233 = vperm.xlu0 %3096, %v3621_v13  }
  0xbd   :  { %v3755_v7 = vpop.permute.xlu1 %2914  ;;  %v2910_v46 = vpop.permute.xlu0 %2909 }
  0xbe   :  { %v2912_v45 = vunpack.i.h.bf16 %v2910_v46  ;;  %v2911_v2 = vunpack.i.l.bf16 %v2910_v46 }
  0xc0   :  { %v3762_v31 = vmul.f32 %v2912_v45, %v3758_v33  ;;  %v3765_v17 = vmul.f32 %v2911_v2, %v3758_v33  ;;  %3228 = vperm.xlu1 %3090, %v3607_v1   ;;  %3243 = vperm.xlu0 %3096, %v3627_v22   ;;  %v3418_v2 = vmov 3  }
  0xc1   :  { %v3769_v13 = vpop.permute.xlu1 %2924  ;;  %v2920_v53 = vpop.permute.xlu0 %2919 }
  0xc2   :  { %4910 = vst [vmem:[#allocation17_spill] sm:$0xff] %v3762_v31  ;;  %4911 = vst [vmem:[#allocation18_spill] sm:$0xff] %v3765_v17  ;;  %v2922_v11 = vunpack.i.h.bf16 %v2920_v53  ;;  %v2921_v55 = vunpack.i.l.bf16 %v2920_v53  ;;  %v2771_v53 = vunpack.i.h.bf16 %v3665_v29  ;;  %v2787_v17 = vunpack.i.h.bf16 %v3669_v32 }
  0xc4   :  { %v3775_v46 = vmul.f32 %v2922_v11, %v3758_v33  ;;  %v3778_v45 = vmul.f32 %v2921_v55, %v3758_v33  ;;  %3238 = vperm.xlu1 %3090, %v3617_v10   ;;  %3252 = vset.pattern.permute.xlu0 %v3418_v2  ;;  %v2781_v11 = vunpack.i.l.bf16 %v3663_v28  ;;  %v2770_v55 = vunpack.i.l.bf16 %v3665_v29 }
  0xc5   :  { %3254 = vperm.xlu0 %3252, %v3459_v16   ;;  %v1178_v16 = vsub.s32 2, %v3739_v14  ;;  %v2776_v10 = vunpack.i.h.bf16 %v3671_v34  ;;  %v3801_v28 = vmul.f32 %v2782_v24, %v3758_v33 }
  0xc6   :  { %4912 = vst [vmem:[#allocation19_spill] sm:$0xff] %v3775_v46  ;;  %4913 = vst [vmem:[#allocation20_spill] sm:$0xff] %v3778_v45  ;;  %v3782_v22 = vpop.permute.xlu1 %2936  ;;  %v3784_v31 = vpop.permute.xlu0 %2930  ;;  %v3804_v29 = vmul.f32 %v2781_v11, %v3758_v33  ;;  %v3811_v1 = vmul.f32 %v2770_v55, %v3758_v33 }
  0xc7   :  { %4915 = vst [vmem:[#allocation22_spill] sm:$0xff] %v3801_v28  ;;  %v3825_v55 = vrot.slane %v3750_v30, %v1178_v16  ;;  %v2806_v28 = vunpack.i.l.bf16 %v3681_v39 }
  0xc8   :  { %3248 = vperm.xlu1 %3090, %v3625_v21   ;;  %v2786_v21 = vunpack.i.l.bf16 %v3669_v32  ;;  %4916 = vst [vmem:[#allocation23_spill] sm:$0xff] %v3804_v29  ;;  %v2797_v32 = vunpack.i.h.bf16 %v3675_v37  ;;  %v2791_v29 = vunpack.i.l.bf16 %v3677_v38 }
  0xc9   :  { %3270 = vperm.xlu0 %3252, %v3463_v19   ;;  %v3807_v19 = vmul.f32 %v2771_v53, %v3758_v33  ;;  %v2792_v53 = vunpack.i.h.bf16 %v3677_v38  ;;  %4919 = vst [vmem:[#allocation26_spill] sm:$0xff] %v3825_v55  ;;  %v2801_v38 = vunpack.i.l.bf16 %v3683_v40 }
  0xca   :  { %v3792_v46 = vpop.permute.xlu1 %2941  ;;  %v3794_v45 = vpop.permute.xlu0 %2946 }
  0xcb   :  { %4914 = vst [vmem:[#allocation21_spill] sm:$0xff] %v3794_v45  ;;  %v2775_v45 = vunpack.i.l.bf16 %v3671_v34  ;;  %v3828_v34 = vmul.f32 %v2787_v17, %v3758_v33  ;;  %v3845_v17 = vmul.f32 %v2797_v32, %v3758_v33  ;;  %v3857_v55 = vmul.f32 %v2792_v53, %v3758_v33 }
  0xcc   :  { %3258 = vset.pattern.permute.xlu1 %v3418_v2  ;;  %v2796_v2 = vunpack.i.l.bf16 %v3675_v37  ;;  %v3831_v37 = vmul.f32 %v2786_v21, %v3758_v33  ;;  %v2812_v32 = vunpack.i.h.bf16 %v3689_v44 }
  0xcd   :  { %3260 = vperm.xlu1 %3258, %v3465_v20   ;;  %3280 = vperm.xlu0 %3252, %v3473_v25   ;;  %v2807_v20 = vunpack.i.h.bf16 %v3681_v39  ;;  %v3834_v25 = vmul.f32 %v2776_v10, %v3758_v33  ;;  %v3842_v16 = vmul.f32 %v2775_v45, %v3758_v33  ;;  %4920 = vst [vmem:[#allocation27_spill] sm:$0xff] %v3845_v17  ;;  %v2816_v10 = vunpack.i.l.bf16 %v3687_v42 }
  0xce   :  { %v3817_v24 = vpop.permute.xlu1 %2951  ;;  %v3819_v11 = vpop.permute.xlu0 %2956  ;;  %v3848_v21 = vmul.f32 %v2796_v2, %v3758_v33  ;;  %v2811_v2 = vunpack.i.l.bf16 %v3689_v44  ;;  %v3871_v17 = vmul.f32 %v2806_v28, %v3758_v33  ;;  %v2836_v28 = vunpack.i.l.bf16 %v3699_v49 }
  0xcf   :  { %4917 = vst [vmem:[#allocation24_spill] sm:$0xff] %v3817_v24  ;;  %4918 = vst [vmem:[#allocation25_spill] sm:$0xff] %v3819_v11  ;;  %v2802_v11 = vunpack.i.h.bf16 %v3683_v40  ;;  %v2817_v24 = vunpack.i.h.bf16 %v3687_v42  ;;  %v3863_v45 = vmul.f32 %v2807_v20, %v3758_v33  ;;  %v2827_v42 = vunpack.i.h.bf16 %v3693_v47 }
  0xd0   :  { %4921 = vst [vmem:[#allocation28_spill] sm:$0xff] %v3848_v21  ;;  %v2822_v21 = vunpack.i.h.bf16 %v3695_v48  ;;  %4924 = vst [vmem:[#allocation31_spill] sm:$0xff] %v3871_v17  ;;  %v3884_v44 = vmul.f32 %v2816_v10, %v3758_v33  ;;  %v2831_v10 = vunpack.i.l.bf16 %v3701_v50  ;;  %v2847_v17 = vunpack.i.h.bf16 %v3705_v54 }
  0xd1   :  { %3265 = vperm.xlu1 %3258, %v3457_v15   ;;  %3290 = vperm.xlu0 %3252, %v3487_v35   ;;  %v3860_v15 = vmul.f32 %v2791_v29, %v3758_v33  ;;  %4923 = vst [vmem:[#allocation30_spill] sm:$0xff] %v3863_v45  ;;  %v2826_v35 = vunpack.i.l.bf16 %v3693_v47  ;;  %v3874_v53 = vmul.f32 %v2802_v11, %v3758_v33  ;;  %v2821_v47 = vunpack.i.l.bf16 %v3695_v48 }
  0xd2   :  { %v3852_v39 = vpop.permute.xlu1 %2961  ;;  %v3854_v40 = vpop.permute.xlu0 %2966  ;;  %v3877_v29 = vmul.f32 %v2801_v38, %v3758_v33  ;;  %v3880_v20 = vmul.f32 %v2817_v24, %v3758_v33  ;;  %4926 = vst [vmem:[#allocation33_spill] sm:$0xff] %v3884_v44  ;;  %v2837_v45 = vunpack.i.h.bf16 %v3699_v49  ;;  %v3895_v24 = vmul.f32 %v2812_v32, %v3758_v33 }
  0xd3   :  { %4922 = vst [vmem:[#allocation29_spill] sm:$0xff] %v3854_v40  ;;  %v3901_v48 = vmul.f32 %v2811_v2, %v3758_v33  ;;  %v3904_v49 = vmul.f32 %v2827_v42, %v3758_v33  ;;  %v3910_v40 = vmul.f32 %v2822_v21, %v3758_v33  ;;  %v2846_v32 = vunpack.i.l.bf16 %v3705_v54 }
  0xd4   :  { %4925 = vst [vmem:[#allocation32_spill] sm:$0xff] %v3880_v20  ;;  %4927 = vst [vmem:[#allocation34_spill] sm:$0xff] %v3895_v24  ;;  %v2842_v44 = vunpack.i.h.bf16 %v3707_v56  ;;  %v2857_v20 = vunpack.i.h.bf16 %v3711_v58  ;;  %v3918_v2 = vmul.f32 %v2821_v47, %v3758_v33  ;;  %v3921_v42 = vmul.f32 %v2837_v45, %v3758_v33 }
  0xd5   :  { %3275 = vperm.xlu1 %3258, %v3477_v27   ;;  %3300 = vperm.xlu0 %3252, %v3497_v41   ;;  %v2832_v27 = vunpack.i.h.bf16 %v3701_v50  ;;  %4928 = vst [vmem:[#allocation35_spill] sm:$0xff] %v3901_v48  ;;  %4929 = vst [vmem:[#allocation36_spill] sm:$0xff] %v3904_v49  ;;  %v3907_v41 = vmul.f32 %v2826_v35, %v3758_v33  ;;  %v2841_v50 = vunpack.i.l.bf16 %v3707_v56  ;;  %v2856_v21 = vunpack.i.l.bf16 %v3711_v58 }
  0xd6   :  { %v3890_v11 = vpop.permute.xlu1 %2971  ;;  %v3892_v38 = vpop.permute.xlu0 %2976  ;;  %4931 = vst [vmem:[#allocation38_spill] sm:$0xff] %v3910_v40  ;;  %4932 = vst [vmem:[#allocation39_spill] sm:$0xff] %v3918_v2  ;;  %v3924_v35 = vmul.f32 %v2836_v28, %v3758_v33  ;;  %v3939_v45 = vmul.f32 %v2847_v17, %v3758_v33  ;;  %v2852_v47 = vunpack.i.h.bf16 %v3713_v60  ;;  %v2851_v28 = vunpack.i.l.bf16 %v3713_v60  ;;  %v4949_v2 = vld [vmem:[#allocation3_spill] sm:$0xff] }
  0xd7   :  { %4930 = vst [vmem:[#allocation37_spill] sm:$0xff] %v3907_v41  ;;  %4933 = vst [vmem:[#allocation40_spill] sm:$0xff] %v3921_v42  ;;  %v3933_v41 = vmul.f32 %v2832_v27, %v3758_v33  ;;  %v2867_v58 = vunpack.i.h.bf16 %v3717_v61  ;;  %v3947_v42 = vmul.f32 %v2846_v32, %v3758_v33  ;;  %v3950_v27 = vmul.f32 %v2842_v44, %v3758_v33 }
  0xd8   :  { %4934 = vst [vmem:[#allocation41_spill] sm:$0xff] %v3924_v35  ;;  %4938 = vst [vmem:[#allocation45_spill] sm:$0xff] %v3939_v45  ;;  %v2862_v35 = vunpack.i.h.bf16 %v3719_v62  ;;  %v3956_v17 = vmul.f32 %v2857_v20, %v3758_v33  ;;  %v3960_v60 = vmul.f32 %v2856_v21, %v3758_v33  ;;  %v2877_v45 = vunpack.i.h.bf16 %v3723_v63 }
  0xd9   :  { %3285 = vperm.xlu1 %3258, %v3489_v36   ;;  %3310 = vperm.xlu0 %3252, %v3511_v51   ;;  %4936 = vst [vmem:[#allocation43_spill] sm:$0xff] %v3933_v41  ;;  %v3936_v36 = vmul.f32 %v2831_v10, %v3758_v33  ;;  %v2866_v51 = vunpack.i.l.bf16 %v3717_v61  ;;  %4939 = vst [vmem:[#allocation46_spill] sm:$0xff] %v3947_v42  ;;  %v3953_v10 = vmul.f32 %v2841_v50, %v3758_v33 }
  0xda   :  { %v3928_v54 = vpop.permute.xlu1 %2981  ;;  %v3930_v56 = vpop.permute.xlu0 %2986  ;;  %4940 = vst [vmem:[#allocation47_spill] sm:$0xff] %v3950_v27  ;;  %4942 = vst [vmem:[#allocation49_spill] sm:$0xff] %v3956_v17  ;;  %v2861_v61 = vunpack.i.l.bf16 %v3719_v62  ;;  %v2876_v32 = vunpack.i.l.bf16 %v3723_v63  ;;  %v501_v20 = vmul.f32 %v2852_v47, %v3758_v33  ;;  %v2872_v17 = vunpack.i.h.bf16 %v3725_v0 }
  0xdb   :  { %4935 = vst [vmem:[#allocation42_spill] sm:$0xff] %v3930_v56  ;;  %4937 = vst [vmem:[#allocation44_spill] sm:$0xff] %v3936_v36  ;;  %v2887_v21 = vunpack.i.h.bf16 %v3729_v5  ;;  %v500_v62 = vmul.f32 %v2851_v28, %v3758_v33  ;;  %v3979_v63 = vmul.f32 %v2866_v51, %v3758_v33  ;;  %v2886_v42 = vunpack.i.l.bf16 %v3729_v5 }
  0xdc   :  { %4941 = vst [vmem:[#allocation48_spill] sm:$0xff] %v3953_v10  ;;  %4943 = vst [vmem:[#allocation50_spill] sm:$0xff] %v3960_v60  ;;  %v3976_v60 = vmul.f32 %v2867_v58, %v3758_v33  ;;  %v2882_v47 = vunpack.i.h.bf16 %v3731_v6  ;;  %v2881_v27 = vunpack.i.l.bf16 %v3731_v6  ;;  %v3990_v28 = vmul.f32 %v2861_v61, %v3758_v33 }
  0xdd   :  { %3295 = vperm.xlu1 %3258, %v3501_v43   ;;  %3320 = vperm.xlu0 %3252, %v3521_v57   ;;  %v2871_v43 = vunpack.i.l.bf16 %v3725_v0  ;;  %v3982_v57 = vmul.f32 %v2862_v35, %v3758_v33  ;;  %v2897_v0 = vunpack.i.h.bf16 %v3735_v8  ;;  %v3993_v58 = vmul.f32 %v2877_v45, %v3758_v33 }
  0xde   :  { %v3966_v44 = vpop.permute.xlu1 %2991  ;;  %v3968_v50 = vpop.permute.xlu0 %2996  ;;  %v3996_v51 = vmul.f32 %v2876_v32, %v3758_v33  ;;  %v2896_v35 = vunpack.i.l.bf16 %v3735_v8  ;;  %v4005_v10 = vmul.f32 %v2872_v17, %v3758_v33  ;;  %v4011_v45 = vmul.f32 %v2887_v21, %v3758_v33 }
  0xdf   :  { %4944 = vst [vmem:[#allocation51_spill] sm:$0xff] %v3966_v44  ;;  %4945 = vst [vmem:[#allocation52_spill] sm:$0xff] %v3968_v50  ;;  %v2892_v61 = vunpack.i.h.bf16 %v3737_v12  ;;  %v2891_v32 = vunpack.i.l.bf16 %v3737_v12  ;;  %v2907_v8 = vunpack.i.h.bf16 %v3746_v18  ;;  %v2902_v41 = vunpack.i.h.bf16 %v3748_v26 }
  0xe0   :  { %v4022_v17 = vmul.f32 %v2882_v47, %v3758_v33  ;;  %v4028_v21 = vmul.f32 %v2897_v0, %v3758_v33  ;;  %v4032_v12 = vmul.f32 %v2896_v35, %v3758_v33  ;;  %v2917_v36 = vunpack.i.h.bf16 %v3755_v7 }
  0xe1   :  { %3305 = vperm.xlu1 %3258, %v3513_v52   ;;  %3330 = vperm.xlu0 %3252, %v3535_v3   ;;  %v4008_v52 = vmul.f32 %v2871_v43, %v3758_v33  ;;  %v2906_v3 = vunpack.i.l.bf16 %v3746_v18  ;;  %v4025_v43 = vmul.f32 %v2881_v27, %v3758_v33  ;;  %v2901_v18 = vunpack.i.l.bf16 %v3748_v26 }
  0xe2   :  { %v4000_v5 = vpop.permute.xlu1 %3001  ;;  %v4002_v6 = vpop.permute.xlu0 %3006  ;;  %v4041_v27 = vmul.f32 %v2892_v61, %v3758_v33  ;;  %v2927_v0 = vunpack.i.h.bf16 %v3769_v13  ;;  %v4045_v35 = vmul.f32 %v2891_v32, %v3758_v33  ;;  %v4048_v26 = vmul.f32 %v2907_v8, %v3758_v33 }
  0xe3   :  { %4946 = vst [vmem:[#allocation53_spill] sm:$0xff] %v4000_v5  ;;  %4947 = vst [vmem:[#allocation54_spill] sm:$0xff] %v4002_v6  ;;  %v4019_v6 = vmul.f32 %v2886_v42, %v3758_v33  ;;  %v2916_v42 = vunpack.i.l.bf16 %v3755_v7  ;;  %v4051_v7 = vmul.f32 %v2906_v3, %v3758_v33  ;;  %v2938_v61 = vunpack.i.l.bf16 %v3782_v22 }
  0xe4   :  { %v4062_v32 = vmul.f32 %v2901_v18, %v3758_v33  ;;  %v4065_v8 = vmul.f32 %v2917_v36, %v3758_v33  ;;  %v1566_v18 = vsub.s32 3, %v3739_v14  ;;  %v2932_v56 = vunpack.i.l.bf16 %v3784_v31 }
  0xe5   :  { %3315 = vperm.xlu1 %3258, %v3525_v59   ;;  %3340 = vperm.xlu0 %3252, %v3545_v9   ;;  %v4054_v9 = vmul.f32 %v2902_v41, %v3758_v33  ;;  %v4068_v3 = vmul.f32 %v2916_v42, %v3758_v33  ;;  %v2926_v41 = vunpack.i.l.bf16 %v3769_v13  ;;  %v794_v13 = vmul.f32 %v2938_v61, %v3772_v23 }
  0xe6   :  { %v3012_v47 = vpop.permute.xlu1 %3011  ;;  %v4038_v49 = vpop.permute.xlu0 %3016 }
  0xe7   :  { %4948 = vst [vmem:[#allocation55_spill] sm:$0xff] %v4038_v49  ;;  %v3014_v59 = vunpack.i.h.bf16 %v3012_v47  ;;  %v3013_v5 = vunpack.i.l.bf16 %v3012_v47  ;;  %v2939_v49 = vunpack.i.h.bf16 %v3782_v22 }
  0xe9   :  { %v825_v40 = vmul.f32 %v3014_v59, %v3772_v23  ;;  %v824_v47 = vmul.f32 %v3013_v5, %v3772_v23  ;;  %3325 = vperm.xlu1 %3258, %v3537_v4   ;;  %3350 = vperm.xlu0 %3252, %v4949_v2   ;;  %v4073_v59 = vmul.f32 %v2927_v0, %v3758_v33  ;;  %v2933_v2 = vunpack.i.h.bf16 %v3784_v31  ;;  %v4952_v0 = vld [vmem:[#allocation2_spill] sm:$0xff] }
  0xea   :  { %v3022_v22 = vpop.permute.xlu1 %3021  ;;  %v3027_v50 = vpop.permute.xlu0 %3026  ;;  %v795_v44 = vmul.f32 %v2939_v49, %v3772_v23 }
  0xeb   :  { %v4075_v5 = vadd.f32 %v824_v47, %v500_v62  ;;  %v4077_v4 = vadd.f32 %v825_v40, %v501_v20  ;;  %v3024_v36 = vunpack.i.h.bf16 %v3022_v22  ;;  %v3023_v24 = vunpack.i.l.bf16 %v3022_v22  ;;  %v4953_v47 = vld [vmem:[#allocation5_spill] sm:$0xff] }
  0xec   :  { %v3029_v48 = vunpack.i.h.bf16 %v3027_v50  ;;  %v3028_v42 = vunpack.i.l.bf16 %v3027_v50 }
  0xed   :  { %4950 = vst [vmem:[#allocation3_spill] sm:$0xff] %v4075_v5  ;;  %4951 = vst [vmem:[#allocation56_spill] sm:$0xff] %v4077_v4  ;;  %3335 = vperm.xlu1 %3258, %v4952_v0   ;;  %v829_v62 = vmul.f32 %v3024_v36, %v3772_v23  ;;  %v828_v40 = vmul.f32 %v3023_v24, %v3772_v23  ;;  %3360 = vperm.xlu0 %3252, %v4953_v47  }
  0xee   :  { %v831_v14 = vmul.f32 %v3029_v48, %v3772_v23  ;;  %v830_v20 = vmul.f32 %v3028_v42, %v3772_v23  ;;  %v3032_v50 = vpop.permute.xlu1 %3031  ;;  %v3037_v49 = vpop.permute.xlu0 %3036 }
  0xef   :  { %v3034_v22 = vunpack.i.h.bf16 %v3032_v50  ;;  %v3033_v61 = vunpack.i.l.bf16 %v3032_v50  ;;  %v3039_v4 = vunpack.i.h.bf16 %v3037_v49  ;;  %v3038_v5 = vunpack.i.l.bf16 %v3037_v49  ;;  %v4954_v49 = vld [vmem:[#allocation4_spill] sm:$0xff] }
  0xf0   :  { %v4091_v31 = vadd.f32 %v828_v40, %v3990_v28  ;;  %v4094_v0 = vadd.f32 %v829_v62, %v3982_v57  ;;  %v4097_v24 = vadd.f32 %v831_v14, %v3976_v60  ;;  %v4100_v48 = vadd.f32 %v830_v20, %v3979_v63  ;;  %v4955_v62 = vld [vmem:[#allocation7_spill] sm:$0xff] }
  0xf1   :  { %v833_v36 = vmul.f32 %v3034_v22, %v3772_v23  ;;  %v832_v42 = vmul.f32 %v3033_v61, %v3772_v23  ;;  %v835_v47 = vmul.f32 %v3039_v4, %v3772_v23  ;;  %v834_v50 = vmul.f32 %v3038_v5, %v3772_v23  ;;  %3345 = vperm.xlu1 %3258, %v4954_v49  }
  0xf2   :  { %v4108_v28 = vmul.f32 %v2926_v41, %v3758_v33  ;;  %v793_v57 = vmul.f32 %v2933_v2, %v3772_v23  ;;  %v792_v60 = vmul.f32 %v2932_v56, %v3772_v23  ;;  %3370 = vperm.xlu0 %3252, %v4955_v62   ;;  %v3042_v63 = vpop.permute.xlu1 %3041  ;;  %v3047_v40 = vpop.permute.xlu0 %3046  ;;  %v4114_v14 = vrot.slane %v3750_v30, %v1566_v18  ;;  %v4957_v18 = vld [vmem:[#allocation6_spill] sm:$0xff] }
  0xf3   :  { %v4117_v4 = vadd.f32 %v832_v42, %v4008_v52  ;;  %v4120_v5 = vadd.f32 %v833_v36, %v4005_v10  ;;  %v4123_v33 = vadd.f32 %v835_v47, %v3993_v58  ;;  %v4126_v41 = vadd.f32 %v834_v50, %v3996_v51  ;;  %v4958_v47 = vld [vmem:[#allocation9_spill] sm:$0xff] }
  0xf4   :  { %4956 = vst [vmem:[#allocation2_spill] sm:$0xff] %v4114_v14  ;;  %v3044_v56 = vunpack.i.h.bf16 %v3042_v63  ;;  %v3043_v2 = vunpack.i.l.bf16 %v3042_v63  ;;  %v3049_v20 = vunpack.i.h.bf16 %v3047_v40  ;;  %v3048_v22 = vunpack.i.l.bf16 %v3047_v40 }
  0xf5   :  { %v4129_v61 = vadd.f32 %v794_v13, %v3842_v16  ;;  %v4132_v30 = vadd.f32 %v795_v44, %v3834_v25  ;;  %v2944_v52 = vunpack.i.h.bf16 %v3792_v46  ;;  %v2943_v10 = vunpack.i.l.bf16 %v3792_v46  ;;  %3355 = vperm.xlu1 %3258, %v4957_v18   ;;  %v4959_v18 = vld [vmem:[#allocation8_spill] sm:$0xff] }
  0xf6   :  { %v837_v58 = vmul.f32 %v3044_v56, %v3772_v23  ;;  %v836_v51 = vmul.f32 %v3043_v2, %v3772_v23  ;;  %v839_v36 = vmul.f32 %v3049_v20, %v3772_v23  ;;  %v838_v42 = vmul.f32 %v3048_v22, %v3772_v23  ;;  %3380 = vperm.xlu0 %3252, %v4958_v47   ;;  %v3052_v16 = vpop.permute.xlu1 %3051  ;;  %v3057_v13 = vpop.permute.xlu0 %3056 }
  0xf7   :  { %v3054_v25 = vunpack.i.h.bf16 %v3052_v16  ;;  %v3053_v44 = vunpack.i.l.bf16 %v3052_v16  ;;  %v3059_v50 = vunpack.i.h.bf16 %v3057_v13  ;;  %v3058_v49 = vunpack.i.l.bf16 %v3057_v13 }
  0xf8   :  { %v4143_v46 = vadd.f32 %v836_v51, %v4025_v43  ;;  %v4146_v62 = vadd.f32 %v837_v58, %v4022_v17  ;;  %v4149_v63 = vadd.f32 %v839_v36, %v4011_v45  ;;  %v4152_v40 = vadd.f32 %v838_v42, %v4019_v6  ;;  %v4960_v45 = vld [vmem:[#allocation21_spill] sm:$0xff]  ;;  %v4961_v51 = vld [vmem:[#allocation11_spill] sm:$0xff] }
  0xf9   :  { %v841_v56 = vmul.f32 %v3054_v25, %v3772_v23  ;;  %v840_v2 = vmul.f32 %v3053_v44, %v3772_v23  ;;  %v843_v20 = vmul.f32 %v3059_v50, %v3772_v23  ;;  %v842_v22 = vmul.f32 %v3058_v49, %v3772_v23  ;;  %3365 = vperm.xlu1 %3258, %v4959_v18   ;;  %v4962_v49 = vld [vmem:[#allocation24_spill] sm:$0xff] }
  0xfa   :  { %v4160_v43 = vadd.f32 %v792_v60, %v3811_v1  ;;  %v4163_v17 = vadd.f32 %v793_v57, %v3807_v19  ;;  %v2949_v58 = vunpack.i.h.bf16 %v4960_v45  ;;  %v2948_v6 = vunpack.i.l.bf16 %v4960_v45  ;;  %3390 = vperm.xlu0 %3252, %v4961_v51   ;;  %v3062_v36 = vpop.permute.xlu1 %3061  ;;  %v3067_v42 = vpop.permute.xlu0 %3066 }
  0xfb   :  { %v4169_v47 = vadd.f32 %v840_v2, %v4045_v35  ;;  %v4172_v16 = vadd.f32 %v841_v56, %v4041_v27  ;;  %v4175_v1 = vadd.f32 %v843_v20, %v4028_v21  ;;  %v4178_v19 = vadd.f32 %v842_v22, %v4032_v12  ;;  %v4963_v27 = vld [vmem:[#allocation10_spill] sm:$0xff]  ;;  %v4964_v22 = vld [vmem:[#allocation13_spill] sm:$0xff] }
  0xfc   :  { %v3064_v57 = vunpack.i.h.bf16 %v3062_v36  ;;  %v3063_v60 = vunpack.i.l.bf16 %v3062_v36  ;;  %v3069_v13 = vunpack.i.h.bf16 %v3067_v42  ;;  %v3068_v25 = vunpack.i.l.bf16 %v3067_v42 }
  0xfd   :  { %v797_v44 = vmul.f32 %v2944_v52, %v3772_v23  ;;  %v796_v50 = vmul.f32 %v2943_v10, %v3772_v23  ;;  %v2954_v35 = vunpack.i.h.bf16 %v4962_v49  ;;  %v2953_v2 = vunpack.i.l.bf16 %v4962_v49  ;;  %3375 = vperm.xlu1 %3258, %v4963_v27  }
  0xfe   :  { %v845_v21 = vmul.f32 %v3064_v57, %v3772_v23  ;;  %v844_v56 = vmul.f32 %v3063_v60, %v3772_v23  ;;  %v847_v12 = vmul.f32 %v3069_v13, %v3772_v23  ;;  %v846_v20 = vmul.f32 %v3068_v25, %v3772_v23  ;;  %3400 = vperm.xlu0 %3252, %v4964_v22   ;;  %v3072_v18 = vpop.permute.xlu1 %3071  ;;  %v3077_v52 = vpop.permute.xlu0 %3076 }
  0xff   :  { %v3074_v45 = vunpack.i.h.bf16 %v3072_v18  ;;  %v3073_v10 = vunpack.i.l.bf16 %v3072_v18  ;;  %v3079_v51 = vunpack.i.h.bf16 %v3077_v52  ;;  %v3078_v36 = vunpack.i.l.bf16 %v3077_v52  ;;  %v4967_v18 = vld [vmem:[#allocation12_spill] sm:$0xff] }
 0x100   :  { %v4191_v42 = vadd.f32 %v844_v56, %v4062_v32  ;;  %v4194_v49 = vadd.f32 %v845_v21, %v4054_v9  ;;  %v4197_v57 = vadd.f32 %v847_v12, %v4048_v26  ;;  %v4200_v60 = vadd.f32 %v846_v20, %v4051_v7  ;;  %v4968_v7 = vld [vmem:[#allocation15_spill] sm:$0xff]  ;;  %v4969_v20 = vld [vmem:[#allocation18_spill] sm:$0xff] }
 0x101   :  { %v849_v13 = vmul.f32 %v3074_v45, %v3772_v23  ;;  %v848_v25 = vmul.f32 %v3073_v10, %v3772_v23  ;;  %v851_v27 = vmul.f32 %v3079_v51, %v3772_v23  ;;  %v850_v22 = vmul.f32 %v3078_v36, %v3772_v23  ;;  %3385 = vperm.xlu1 %3258, %v4967_v18   ;;  %v4970_v45 = vld [vmem:[#allocation17_spill] sm:$0xff] }
 0x102   :  { %4965 = vst [vmem:[#allocation5_spill] sm:$0xff] %v4197_v57  ;;  %4966 = vst [vmem:[#allocation4_spill] sm:$0xff] %v4200_v60  ;;  %v799_v32 = vmul.f32 %v2949_v58, %v3772_v23  ;;  %v798_v9 = vmul.f32 %v2948_v6, %v3772_v23  ;;  %v2964_v26 = vunpack.i.h.bf16 %v3852_v39  ;;  %v2963_v21 = vunpack.i.l.bf16 %v3852_v39  ;;  %3410 = vperm.xlu0 %3252, %v4968_v7   ;;  %v3082_v56 = vpop.permute.xlu1 %3081  ;;  %v3087_v12 = vpop.permute.xlu0 %3086  ;;  %v4973_v57 = vld [vmem:[#allocation25_spill] sm:$0xff] }
 0x103   :  { %v4213_v52 = vadd.f32 %v848_v25, %v4969_v20  ;;  %v4216_v10 = vadd.f32 %v849_v13, %v4970_v45  ;;  %v4219_v51 = vadd.f32 %v851_v27, %v4065_v8  ;;  %v4222_v58 = vadd.f32 %v850_v22, %v4068_v3  ;;  %v4974_v13 = vld [vmem:[#allocation14_spill] sm:$0xff]  ;;  %v4976_v45 = vld [vmem:[#allocation23_spill] sm:$0xff]  ;;  %v4977_v20 = vld [vmem:[#allocation20_spill] sm:$0xff] }
 0x104   :  { %v3084_v6 = vunpack.i.h.bf16 %v3082_v56  ;;  %v3083_v36 = vunpack.i.l.bf16 %v3082_v56  ;;  %v3089_v18 = vunpack.i.h.bf16 %v3087_v12  ;;  %v3088_v39 = vunpack.i.l.bf16 %v3087_v12  ;;  %v4975_v56 = vld [vmem:[#allocation22_spill] sm:$0xff] }
 0x105   :  { %4971 = vst [vmem:[#allocation7_spill] sm:$0xff] %v4219_v51  ;;  %4972 = vst [vmem:[#allocation6_spill] sm:$0xff] %v4222_v58  ;;  %v801_v7 = vmul.f32 %v2954_v35, %v3772_v23  ;;  %v800_v14 = vmul.f32 %v2953_v2, %v3772_v23  ;;  %3395 = vperm.xlu1 %3258, %v4974_v13   ;;  %v861_v12 = vadd.f32 %v797_v44, %v4975_v56 }
 0x106   :  { %v853_v8 = vmul.f32 %v3084_v6, %v3772_v23  ;;  %v852_v27 = vmul.f32 %v3083_v36, %v3772_v23  ;;  %v855_v3 = vmul.f32 %v3089_v18, %v3772_v23  ;;  %v854_v22 = vmul.f32 %v3088_v39, %v3772_v23  ;;  %v4979_v6 = vld [vmem:[#allocation19_spill] sm:$0xff] }
 0x107   :  { %v860_v35 = vadd.f32 %v796_v50, %v4976_v45  ;;  %v805_v2 = vmul.f32 %v2964_v26, %v3772_v23  ;;  %v804_v25 = vmul.f32 %v2963_v21, %v3772_v23  ;;  %v4237_v51 = vpop.permute.xlu1 %3092  ;;  %v3099_v44 = vpop.permute.xlu0 %3098  ;;  %v4252_v50 = vadd.f32 %v799_v32, %v3828_v34  ;;  %v4986_v32 = vld [vmem:[#allocation26_spill] sm:$0xff] }
 0x108   :  { %v4240_v13 = vadd.f32 %v852_v27, %v4977_v20  ;;  %v4243_v58 = vadd.f32 %v853_v8, %v4979_v6  ;;  %v4246_v36 = vadd.f32 %v855_v3, %v4073_v59  ;;  %v4249_v18 = vadd.f32 %v854_v22, %v4108_v28  ;;  %v4985_v20 = vld [vmem:[#allocation16_spill] sm:$0xff] }
 0x109   :  { %4983 = vst [vmem:[#allocation24_spill] sm:$0xff] %v4252_v50  ;;  %v4255_v26 = vadd.f32 %v798_v9, %v3831_v37  ;;  %v3101_v21 = vunpack.i.h.bf16 %v3099_v44  ;;  %v3100_v39 = vunpack.i.l.bf16 %v3099_v44  ;;  %3405 = vperm.xlu1 %3258, %v4985_v20   ;;  %v864_v8 = vadd.f32 %v800_v14, %v3860_v15 }
 0x10a   :  { %4978 = vst [vmem:[#allocation9_spill] sm:$0xff] %v4240_v13  ;;  %4980 = vst [vmem:[#allocation8_spill] sm:$0xff] %v4243_v58  ;;  %v865_v27 = vadd.f32 %v801_v7, %v3857_v55  ;;  %v2974_v59 = vunpack.i.h.bf16 %v3890_v11  ;;  %v2973_v28 = vunpack.i.l.bf16 %v3890_v11  ;;  %v2979_v3 = vunpack.i.h.bf16 %v3892_v38 }
 0x10b   :  { %4981 = vst [vmem:[#allocation21_spill] sm:$0xff] %v4246_v36  ;;  %4982 = vst [vmem:[#allocation11_spill] sm:$0xff] %v4249_v18  ;;  %v2978_v34 = vunpack.i.l.bf16 %v3892_v38  ;;  %v1183_v22 = vmul.f32 %v3101_v21, %v4986_v32  ;;  %v1182_v37 = vmul.f32 %v3100_v39, %v4986_v32  ;;  %v3104_v9 = vpop.permute.xlu1 %3103  ;;  %v868_v56 = vadd.f32 %v804_v25, %v3877_v29  ;;  %v3114_v55 = vpop.permute.xlu0 %3113  ;;  %v5003_v18 = vld [vmem:[#allocation38_spill] sm:$0xff] }
 0x10c   :  { %4984 = vst [vmem:[#allocation10_spill] sm:$0xff] %v4255_v26  ;;  %v869_v45 = vadd.f32 %v805_v2, %v3874_v53  ;;  %v3106_v15 = vunpack.i.h.bf16 %v3104_v9  ;;  %v3105_v14 = vunpack.i.l.bf16 %v3104_v9  ;;  %v2984_v7 = vunpack.i.h.bf16 %v3928_v54 }
 0x10d   :  { %v2983_v11 = vunpack.i.l.bf16 %v3928_v54  ;;  %v4271_v6 = vadd.f32 %v1182_v37, %v4129_v61  ;;  %v4274_v38 = vadd.f32 %v1183_v22, %v4132_v30  ;;  %v3116_v29 = vunpack.i.h.bf16 %v3114_v55 }
 0x10e   :  { %v1185_v44 = vmul.f32 %v3106_v15, %v4986_v32  ;;  %v1184_v21 = vmul.f32 %v3105_v14, %v4986_v32  ;;  %v3115_v25 = vunpack.i.l.bf16 %v3114_v55  ;;  %v809_v53 = vmul.f32 %v2974_v59, %v3772_v23  ;;  %v4991_v15 = vld [vmem:[#allocation42_spill] sm:$0xff] }
 0x10f   :  { %4987 = vst [vmem:[#allocation13_spill] sm:$0xff] %v4271_v6  ;;  %4988 = vst [vmem:[#allocation12_spill] sm:$0xff] %v4274_v38  ;;  %v808_v2 = vmul.f32 %v2973_v28, %v3772_v23  ;;  %v811_v39 = vmul.f32 %v2979_v3, %v3772_v23  ;;  %v810_v54 = vmul.f32 %v2978_v34, %v3772_v23  ;;  %v4282_v20 = vpop.permute.xlu1 %3108  ;;  %v3124_v9 = vpop.permute.xlu0 %3123  ;;  %v2989_v14 = vunpack.i.h.bf16 %v4991_v15  ;;  %v4997_v6 = vld [vmem:[#allocation52_spill] sm:$0xff] }
 0x110   :  { %v4284_v61 = vadd.f32 %v1185_v44, %v861_v12  ;;  %v4286_v30 = vadd.f32 %v1184_v21, %v860_v35  ;;  %v1189_v22 = vmul.f32 %v3116_v29, %v4986_v32  ;;  %v1188_v37 = vmul.f32 %v3115_v25, %v4986_v32  ;;  %v4994_v35 = vld [vmem:[#allocation51_spill] sm:$0xff] }
 0x111   :  { %v2988_v59 = vunpack.i.l.bf16 %v4991_v15  ;;  %v3126_v28 = vunpack.i.h.bf16 %v3124_v9  ;;  %v3125_v55 = vunpack.i.l.bf16 %v3124_v9  ;;  %v813_v3 = vmul.f32 %v2984_v7, %v3772_v23  ;;  %v4995_v15 = vld [vmem:[#allocation35_spill] sm:$0xff] }
 0x112   :  { %4989 = vst [vmem:[#allocation15_spill] sm:$0xff] %v4284_v61  ;;  %4990 = vst [vmem:[#allocation18_spill] sm:$0xff] %v4286_v30  ;;  %v812_v34 = vmul.f32 %v2983_v11, %v3772_v23  ;;  %v4294_v38 = vadd.f32 %v1188_v37, %v864_v8  ;;  %v4296_v12 = vadd.f32 %v1189_v22, %v865_v27  ;;  %v2994_v44 = vunpack.i.h.bf16 %v4994_v35  ;;  %v4996_v61 = vld [vmem:[#allocation34_spill] sm:$0xff]  ;;  %v4998_v22 = vld [vmem:[#allocation32_spill] sm:$0xff] }
 0x113   :  { %v2993_v21 = vunpack.i.l.bf16 %v4994_v35  ;;  %v1193_v29 = vmul.f32 %v3126_v28, %v4986_v32  ;;  %v1192_v25 = vmul.f32 %v3125_v55, %v4986_v32  ;;  %v4302_v30 = vpop.permute.xlu1 %3118  ;;  %v872_v9 = vadd.f32 %v808_v2, %v4995_v15  ;;  %v3134_v27 = vpop.permute.xlu0 %3133 }
 0x114   :  { %4992 = vst [vmem:[#allocation17_spill] sm:$0xff] %v4294_v38  ;;  %4993 = vst [vmem:[#allocation25_spill] sm:$0xff] %v4296_v12  ;;  %v873_v7 = vadd.f32 %v809_v53, %v4996_v61  ;;  %v2999_v11 = vunpack.i.h.bf16 %v4997_v6  ;;  %v2998_v8 = vunpack.i.l.bf16 %v4997_v6  ;;  %v875_v37 = vadd.f32 %v811_v39, %v4998_v22  ;;  %v4999_v38 = vld [vmem:[#allocation33_spill] sm:$0xff]  ;;  %v5002_v53 = vld [vmem:[#allocation39_spill] sm:$0xff] }
 0x115   :  { %v874_v12 = vadd.f32 %v810_v54, %v4999_v38  ;;  %v4310_v35 = vadd.f32 %v1192_v25, %v868_v56  ;;  %v4312_v28 = vadd.f32 %v1193_v29, %v869_v45  ;;  %v815_v55 = vmul.f32 %v2989_v14, %v3772_v23 }
 0x116   :  { %v814_v36 = vmul.f32 %v2988_v59, %v3772_v23  ;;  %v3136_v2 = vunpack.i.h.bf16 %v3134_v27  ;;  %v3135_v15 = vunpack.i.l.bf16 %v3134_v27  ;;  %v876_v61 = vadd.f32 %v812_v34, %v5002_v53  ;;  %v5004_v59 = vld [vmem:[#allocation53_spill] sm:$0xff] }
 0x117   :  { %5000 = vst [vmem:[#allocation14_spill] sm:$0xff] %v4310_v35  ;;  %5001 = vst [vmem:[#allocation22_spill] sm:$0xff] %v4312_v28  ;;  %v877_v50 = vadd.f32 %v813_v3, %v5003_v18  ;;  %v817_v6 = vmul.f32 %v2994_v44, %v3772_v23  ;;  %v816_v39 = vmul.f32 %v2993_v21, %v3772_v23  ;;  %v4320_v22 = vpop.permute.xlu1 %3128  ;;  %v3144_v14 = vpop.permute.xlu0 %3143  ;;  %v3004_v29 = vunpack.i.h.bf16 %v5004_v59  ;;  %v5005_v44 = vld [vmem:[#allocation36_spill] sm:$0xff]  ;;  %v5006_v21 = vld [vmem:[#allocation37_spill] sm:$0xff] }
 0x118   :  { %v819_v56 = vmul.f32 %v2999_v11, %v3772_v23  ;;  %v818_v45 = vmul.f32 %v2998_v8, %v3772_v23  ;;  %v1197_v38 = vmul.f32 %v3136_v2, %v4986_v32  ;;  %v1196_v54 = vmul.f32 %v3135_v15, %v4986_v32  ;;  %v5008_v8 = vld [vmem:[#allocation44_spill] sm:$0xff]  ;;  %v5009_v2 = vld [vmem:[#allocation43_spill] sm:$0xff] }
 0x119   :  { %v3003_v34 = vunpack.i.l.bf16 %v5004_v59  ;;  %v3146_v18 = vunpack.i.h.bf16 %v3144_v14  ;;  %v3145_v3 = vunpack.i.l.bf16 %v3144_v14  ;;  %v879_v25 = vadd.f32 %v815_v55, %v5005_v44  ;;  %v5010_v59 = vld [vmem:[#allocation40_spill] sm:$0xff]  ;;  %v5011_v14 = vld [vmem:[#allocation41_spill] sm:$0xff] }
 0x11a   :  { %v878_v27 = vadd.f32 %v814_v36, %v5006_v21  ;;  %v4330_v53 = vadd.f32 %v1196_v54, %v872_v9  ;;  %v4332_v11 = vadd.f32 %v1197_v38, %v873_v7  ;;  %v880_v35 = vadd.f32 %v816_v39, %v5008_v8 }
 0x11b   :  { %v881_v28 = vadd.f32 %v817_v6, %v5009_v2  ;;  %v1201_v15 = vmul.f32 %v3146_v18, %v4986_v32  ;;  %v1200_v26 = vmul.f32 %v3145_v3, %v4986_v32  ;;  %v3139_v58 = vpop.permute.xlu1 %3138  ;;  %v883_v13 = vadd.f32 %v819_v56, %v5010_v59  ;;  %v3154_v36 = vpop.permute.xlu0 %3153  ;;  %v5014_v56 = vld [vmem:[#allocation54_spill] sm:$0xff] }
 0x11c   :  { %5007 = vst [vmem:[#allocation23_spill] sm:$0xff] %v4330_v53  ;;  %v882_v60 = vadd.f32 %v818_v45, %v5011_v14  ;;  %v3141_v55 = vunpack.i.h.bf16 %v3139_v58  ;;  %v3140_v44 = vunpack.i.l.bf16 %v3139_v58  ;;  %v821_v9 = vmul.f32 %v3004_v29, %v3772_v23  ;;  %v5015_v58 = vld [vmem:[#allocation55_spill] sm:$0xff] }
 0x11d   :  { %v820_v7 = vmul.f32 %v3003_v34, %v3772_v23  ;;  %v4342_v38 = vadd.f32 %v1200_v26, %v876_v61  ;;  %v4344_v39 = vadd.f32 %v1201_v15, %v877_v50  ;;  %v3156_v18 = vunpack.i.h.bf16 %v3154_v36 }
 0x11e   :  { %v1199_v6 = vmul.f32 %v3141_v55, %v4986_v32  ;;  %v1198_v54 = vmul.f32 %v3140_v44, %v4986_v32  ;;  %v3155_v3 = vunpack.i.l.bf16 %v3154_v36  ;;  %v3009_v21 = vunpack.i.h.bf16 %v5014_v56  ;;  %v5016_v36 = vld [vmem:[#allocation48_spill] sm:$0xff] }
 0x11f   :  { %5012 = vst [vmem:[#allocation20_spill] sm:$0xff] %v4342_v38  ;;  %5013 = vst [vmem:[#allocation19_spill] sm:$0xff] %v4344_v39  ;;  %v3008_v45 = vunpack.i.l.bf16 %v5014_v56  ;;  %v3019_v8 = vunpack.i.h.bf16 %v5015_v58  ;;  %v3018_v29 = vunpack.i.l.bf16 %v5015_v58  ;;  %v3149_v2 = vpop.permute.xlu1 %3148  ;;  %v1205_v50 = vmul.f32 %v3156_v18, %v4986_v32  ;;  %v3164_v15 = vpop.permute.xlu0 %3163  ;;  %v5017_v38 = vld [vmem:[#allocation47_spill] sm:$0xff] }
 0x120   :  { %v4352_v34 = vadd.f32 %v1198_v54, %v874_v12  ;;  %v4354_v26 = vadd.f32 %v1199_v6, %v875_v37  ;;  %v1204_v61 = vmul.f32 %v3155_v3, %v4986_v32  ;;  %v3151_v59 = vunpack.i.h.bf16 %v3149_v2 }
 0x121   :  { %v3150_v14 = vunpack.i.l.bf16 %v3149_v2  ;;  %v3166_v55 = vunpack.i.h.bf16 %v3164_v15  ;;  %v3165_v44 = vunpack.i.l.bf16 %v3164_v15  ;;  %v884_v56 = vadd.f32 %v820_v7, %v5016_v36 }
 0x122   :  { %v885_v39 = vadd.f32 %v821_v9, %v5017_v38  ;;  %v4360_v53 = vadd.f32 %v1204_v61, %v880_v35  ;;  %v4362_v58 = vadd.f32 %v1205_v50, %v881_v28  ;;  %v1203_v12 = vmul.f32 %v3151_v59, %v4986_v32 }
 0x123   :  { %v1202_v37 = vmul.f32 %v3150_v14, %v4986_v32  ;;  %v1209_v6 = vmul.f32 %v3166_v55, %v4986_v32  ;;  %v1208_v54 = vmul.f32 %v3165_v44, %v4986_v32  ;;  %v3159_v18 = vpop.permute.xlu1 %3158  ;;  %v823_v3 = vmul.f32 %v3009_v21, %v3772_v23  ;;  %v3174_v9 = vpop.permute.xlu0 %3173  ;;  %v5021_v21 = vld [vmem:[#allocation29_spill] sm:$0xff] }
 0x124   :  { %5018 = vst [vmem:[#allocation16_spill] sm:$0xff] %v4362_v58  ;;  %v822_v2 = vmul.f32 %v3008_v45, %v3772_v23  ;;  %v3161_v7 = vunpack.i.h.bf16 %v3159_v18  ;;  %v3160_v15 = vunpack.i.l.bf16 %v3159_v18  ;;  %v4372_v28 = vadd.f32 %v1203_v12, %v879_v25 }
 0x125   :  { %v4370_v35 = vadd.f32 %v1202_v37, %v878_v27  ;;  %v4374_v38 = vadd.f32 %v1208_v54, %v884_v56  ;;  %v4376_v50 = vadd.f32 %v1209_v6, %v885_v39  ;;  %v3176_v14 = vunpack.i.h.bf16 %v3174_v9 }
 0x126   :  { %v1207_v61 = vmul.f32 %v3161_v7, %v4986_v32  ;;  %v1206_v59 = vmul.f32 %v3160_v15, %v4986_v32  ;;  %v3175_v55 = vunpack.i.l.bf16 %v3174_v9  ;;  %v2969_v44 = vunpack.i.h.bf16 %v5021_v21  ;;  %v5022_v9 = vld [vmem:[#allocation45_spill] sm:$0xff] }
 0x127   :  { %5019 = vst [vmem:[#allocation26_spill] sm:$0xff] %v4374_v38  ;;  %5020 = vst [vmem:[#allocation42_spill] sm:$0xff] %v4376_v50  ;;  %v2968_v45 = vunpack.i.l.bf16 %v5021_v21  ;;  %v827_v36 = vmul.f32 %v3019_v8, %v3772_v23  ;;  %v826_v27 = vmul.f32 %v3018_v29, %v3772_v23  ;;  %v3169_v25 = vpop.permute.xlu1 %3168  ;;  %v1213_v39 = vmul.f32 %v3176_v14, %v4986_v32  ;;  %v3184_v6 = vpop.permute.xlu0 %3183  ;;  %v5023_v50 = vld [vmem:[#allocation46_spill] sm:$0xff]  ;;  %v5024_v38 = vld [vmem:[#allocation3_spill] sm:$0xff] }
 0x128   :  { %v4384_v12 = vadd.f32 %v1206_v59, %v882_v60  ;;  %v4386_v56 = vadd.f32 %v1207_v61, %v883_v13  ;;  %v1212_v37 = vmul.f32 %v3175_v55, %v4986_v32  ;;  %v3171_v54 = vunpack.i.h.bf16 %v3169_v25  ;;  %v5025_v60 = vld [vmem:[#allocation56_spill] sm:$0xff] }
 0x129   :  { %v3170_v18 = vunpack.i.l.bf16 %v3169_v25  ;;  %v3186_v7 = vunpack.i.h.bf16 %v3184_v6  ;;  %v3185_v15 = vunpack.i.l.bf16 %v3184_v6  ;;  %v887_v21 = vadd.f32 %v823_v3, %v5022_v9  ;;  %v5026_v6 = vld [vmem:[#allocation49_spill] sm:$0xff]  ;;  %v5027_v3 = vld [vmem:[#allocation50_spill] sm:$0xff] }
 0x12a   :  { %v886_v8 = vadd.f32 %v822_v2, %v5023_v50  ;;  %v4393_v29 = vadd.f32 %v1212_v37, %v5024_v38  ;;  %v4396_v59 = vadd.f32 %v1213_v39, %v5025_v60  ;;  %v1211_v13 = vmul.f32 %v3171_v54, %v4986_v32 }
 0x12b   :  { %v1210_v61 = vmul.f32 %v3170_v18, %v4986_v32  ;;  %v1217_v14 = vmul.f32 %v3186_v7, %v4986_v32  ;;  %v1216_v55 = vmul.f32 %v3185_v15, %v4986_v32  ;;  %v3179_v25 = vpop.permute.xlu1 %3178  ;;  %v891_v58 = vadd.f32 %v827_v36, %v5026_v6  ;;  %v3194_v38 = vpop.permute.xlu0 %3193 }
 0x12c   :  { %v890_v9 = vadd.f32 %v826_v27, %v5027_v3  ;;  %v3181_v2 = vunpack.i.h.bf16 %v3179_v25  ;;  %v3180_v50 = vunpack.i.l.bf16 %v3179_v25  ;;  %v4406_v39 = vadd.f32 %v1211_v13, %v887_v21 }
 0x12d   :  { %v4404_v37 = vadd.f32 %v1210_v61, %v886_v8  ;;  %v4409_v54 = vadd.f32 %v1216_v55, %v4091_v31  ;;  %v4412_v18 = vadd.f32 %v1217_v14, %v4094_v0  ;;  %v3196_v36 = vunpack.i.h.bf16 %v3194_v38 }
 0x12e   :  { %v1215_v7 = vmul.f32 %v3181_v2, %v4986_v32  ;;  %v1214_v15 = vmul.f32 %v3180_v50, %v4986_v32  ;;  %v3195_v60 = vunpack.i.l.bf16 %v3194_v38  ;;  %v5028_v27 = vunpack.i.h.bf16 %v4973_v57 }
 0x12f   :  { %v5029_v21 = vunpack.i.l.bf16 %v4973_v57  ;;  %v807_v31 = vmul.f32 %v2969_v44, %v3772_v23  ;;  %v806_v13 = vmul.f32 %v2968_v45, %v3772_v23  ;;  %v3189_v0 = vpop.permute.xlu1 %3188  ;;  %v1221_v55 = vmul.f32 %v3196_v36, %v4986_v32  ;;  %v3204_v3 = vpop.permute.xlu0 %3203 }
 0x130   :  { %v803_v25 = vmul.f32 %v5028_v27, %v3772_v23  ;;  %v4424_v61 = vadd.f32 %v1214_v15, %v890_v9  ;;  %v4426_v14 = vadd.f32 %v1215_v7, %v891_v58  ;;  %v1220_v6 = vmul.f32 %v3195_v60, %v4986_v32  ;;  %v5030_v60 = vld [vmem:[#allocation27_spill] sm:$0xff] }
 0x131   :  { %v802_v8 = vmul.f32 %v5029_v21, %v3772_v23  ;;  %v3191_v2 = vunpack.i.h.bf16 %v3189_v0  ;;  %v3190_v50 = vunpack.i.l.bf16 %v3189_v0  ;;  %v3206_v38 = vunpack.i.h.bf16 %v3204_v3  ;;  %v5031_v0 = vld [vmem:[#allocation28_spill] sm:$0xff] }
 0x132   :  { %v3205_v27 = vunpack.i.l.bf16 %v3204_v3  ;;  %v3095_v57 = vunpack.i.h.bf16 %v4237_v51  ;;  %v3094_v44 = vunpack.i.l.bf16 %v4237_v51  ;;  %v4433_v23 = vadd.f32 %v1220_v6, %v4117_v4 }
 0x133   :  { %v4436_v45 = vadd.f32 %v1221_v55, %v4120_v5  ;;  %v1219_v58 = vmul.f32 %v3191_v2, %v4986_v32  ;;  %v1218_v9 = vmul.f32 %v3190_v50, %v4986_v32  ;;  %v1225_v7 = vmul.f32 %v3206_v38, %v4986_v32  ;;  %v3199_v36 = vpop.permute.xlu1 %3198  ;;  %v3214_v3 = vpop.permute.xlu0 %3213 }
 0x134   :  { %v1224_v15 = vmul.f32 %v3205_v27, %v4986_v32  ;;  %v4443_v21 = vadd.f32 %v803_v25, %v5030_v60  ;;  %v4446_v51 = vadd.f32 %v802_v8, %v5031_v0  ;;  %v3201_v4 = vunpack.i.h.bf16 %v3199_v36 }
 0x135   :  { %v3200_v6 = vunpack.i.l.bf16 %v3199_v36  ;;  %v4449_v5 = vadd.f32 %v1218_v9, %v4100_v48  ;;  %v4452_v55 = vadd.f32 %v1219_v58, %v4097_v24  ;;  %v4458_v50 = vadd.f32 %v1225_v7, %v4146_v62  ;;  %v5032_v36 = vld [vmem:[#allocation30_spill] sm:$0xff]  ;;  %v5033_v48 = vld [vmem:[#allocation31_spill] sm:$0xff] }
 0x136   :  { %v4455_v2 = vadd.f32 %v1224_v15, %v4143_v46  ;;  %v1223_v25 = vmul.f32 %v3201_v4, %v4986_v32  ;;  %v3216_v38 = vunpack.i.h.bf16 %v3214_v3  ;;  %v3215_v27 = vunpack.i.l.bf16 %v3214_v3 }
 0x137   :  { %v1222_v8 = vmul.f32 %v3200_v6, %v4986_v32  ;;  %v4463_v60 = vadd.f32 %v807_v31, %v5032_v36  ;;  %v4466_v9 = vadd.f32 %v806_v13, %v5033_v48  ;;  %v1181_v24 = vmul.f32 %v3095_v57, %v4986_v32  ;;  %v3209_v58 = vpop.permute.xlu1 %3208  ;;  %v3224_v31 = vpop.permute.xlu0 %3223 }
 0x138   :  { %v1180_v46 = vmul.f32 %v3094_v44, %v4986_v32  ;;  %v4474_v7 = vadd.f32 %v1223_v25, %v4123_v33  ;;  %v1229_v15 = vmul.f32 %v3216_v38, %v4986_v32  ;;  %v1228_v0 = vmul.f32 %v3215_v27, %v4986_v32 }
 0x139   :  { %v4471_v62 = vadd.f32 %v1222_v8, %v4126_v41  ;;  %v3211_v4 = vunpack.i.h.bf16 %v3209_v58  ;;  %v3210_v6 = vunpack.i.l.bf16 %v3209_v58  ;;  %v3226_v13 = vunpack.i.h.bf16 %v3224_v31 }
 0x13a   :  { %v3225_v3 = vunpack.i.l.bf16 %v3224_v31  ;;  %v3111_v57 = vunpack.i.h.bf16 %v4282_v20  ;;  %v3110_v44 = vunpack.i.l.bf16 %v4282_v20  ;;  %v4481_v36 = vadd.f32 %v1228_v0, %v4169_v47 }
 0x13b   :  { %v4484_v41 = vadd.f32 %v1229_v15, %v4172_v16  ;;  %v1227_v33 = vmul.f32 %v3211_v4, %v4986_v32  ;;  %v1226_v25 = vmul.f32 %v3210_v6, %v4986_v32  ;;  %v1233_v8 = vmul.f32 %v3226_v13, %v4986_v32  ;;  %v3219_v27 = vpop.permute.xlu1 %3218  ;;  %v3234_v0 = vpop.permute.xlu0 %3233 }
 0x13c   :  { %v1232_v38 = vmul.f32 %v3225_v3, %v4986_v32  ;;  %v4491_v48 = vadd.f32 %v1180_v46, %v4160_v43  ;;  %v4494_v20 = vadd.f32 %v1181_v24, %v4163_v17  ;;  %v3221_v47 = vunpack.i.h.bf16 %v3219_v27 }
 0x13d   :  { %5034 = vst [vmem:[#allocation51_spill] sm:$0xff] %v4484_v41  ;;  %v3220_v58 = vunpack.i.l.bf16 %v3219_v27  ;;  %v4497_v16 = vadd.f32 %v1226_v25, %v4152_v40  ;;  %v4500_v15 = vadd.f32 %v1227_v33, %v4149_v63  ;;  %v4506_v4 = vadd.f32 %v1233_v8, %v4194_v49 }
 0x13e   :  { %v4503_v31 = vadd.f32 %v1232_v38, %v4191_v42  ;;  %v1231_v43 = vmul.f32 %v3221_v47, %v4986_v32  ;;  %v3236_v24 = vunpack.i.h.bf16 %v3234_v0  ;;  %v3235_v46 = vunpack.i.l.bf16 %v3234_v0 }
 0x13f   :  { %5036 = vst [vmem:[#allocation34_spill] sm:$0xff] %v4506_v4  ;;  %v1230_v17 = vmul.f32 %v3220_v58, %v4986_v32  ;;  %v1187_v6 = vmul.f32 %v3111_v57, %v4986_v32  ;;  %v1186_v40 = vmul.f32 %v3110_v44, %v4986_v32  ;;  %v3121_v13 = vunpack.i.h.bf16 %v4302_v30  ;;  %v3229_v3 = vpop.permute.xlu1 %3228  ;;  %v3244_v8 = vpop.permute.xlu0 %3243 }
 0x140   :  { %5035 = vst [vmem:[#allocation35_spill] sm:$0xff] %v4503_v31  ;;  %v3120_v63 = vunpack.i.l.bf16 %v4302_v30  ;;  %v4518_v49 = vadd.f32 %v1231_v43, %v4175_v1  ;;  %v1237_v33 = vmul.f32 %v3236_v24, %v4986_v32  ;;  %v1236_v25 = vmul.f32 %v3235_v46, %v4986_v32 }
 0x141   :  { %v4515_v42 = vadd.f32 %v1230_v17, %v4178_v19  ;;  %v3231_v38 = vunpack.i.h.bf16 %v3229_v3  ;;  %v3230_v57 = vunpack.i.l.bf16 %v3229_v3  ;;  %v3246_v27 = vunpack.i.h.bf16 %v3244_v8 }
 0x142   :  { %v3245_v44 = vunpack.i.l.bf16 %v3244_v8  ;;  %v3131_v47 = vunpack.i.h.bf16 %v4320_v22  ;;  %v3130_v30 = vunpack.i.l.bf16 %v4320_v22  ;;  %v4525_v58 = vadd.f32 %v1236_v25, %v4213_v52  ;;  %v5039_v52 = vld [vmem:[#allocation4_spill] sm:$0xff] }
 0x143   :  { %v4528_v19 = vadd.f32 %v1237_v33, %v4216_v10  ;;  %v1235_v1 = vmul.f32 %v3231_v38, %v4986_v32  ;;  %v1234_v0 = vmul.f32 %v3230_v57, %v4986_v32  ;;  %v1241_v43 = vmul.f32 %v3246_v27, %v4986_v32  ;;  %v3239_v24 = vpop.permute.xlu1 %3238  ;;  %v5040_v10 = vld [vmem:[#allocation5_spill] sm:$0xff]  ;;  %v5043_v57 = vld [vmem:[#allocation8_spill] sm:$0xff] }
 0x144   :  { %5037 = vst [vmem:[#allocation52_spill] sm:$0xff] %v4525_v58  ;;  %v1240_v17 = vmul.f32 %v3245_v44, %v4986_v32  ;;  %v1191_v46 = vmul.f32 %v3121_v13, %v4986_v32  ;;  %v1190_v3 = vmul.f32 %v3120_v63, %v4986_v32  ;;  %v3241_v22 = vunpack.i.h.bf16 %v3239_v24  ;;  %v5041_v38 = vld [vmem:[#allocation9_spill] sm:$0xff]  ;;  %v3255_v44 = vpop.permute.xlu0 %3254 }
 0x145   :  { %5038 = vst [vmem:[#allocation32_spill] sm:$0xff] %v4528_v19  ;;  %v3240_v8 = vunpack.i.l.bf16 %v3239_v24  ;;  %v4537_v25 = vadd.f32 %v1234_v0, %v5039_v52  ;;  %v4540_v33 = vadd.f32 %v1235_v1, %v5040_v10  ;;  %v4546_v27 = vadd.f32 %v1241_v43, %v5043_v57  ;;  %v5045_v24 = vld [vmem:[#allocation10_spill] sm:$0xff]  ;;  %v5046_v0 = vld [vmem:[#allocation24_spill] sm:$0xff]  ;;  %v5049_v43 = vld [vmem:[#allocation7_spill] sm:$0xff] }
 0x146   :  { %v4543_v58 = vadd.f32 %v1240_v17, %v5041_v38  ;;  %v1239_v19 = vmul.f32 %v3241_v22, %v4986_v32  ;;  %v3257_v63 = vunpack.i.h.bf16 %v3255_v44  ;;  %v3256_v31 = vunpack.i.l.bf16 %v3255_v44  ;;  %v5047_v38 = vld [vmem:[#allocation6_spill] sm:$0xff] }
 0x147   :  { %5044 = vst [vmem:[#allocation39_spill] sm:$0xff] %v4546_v27  ;;  %v1238_v13 = vmul.f32 %v3240_v8, %v4986_v32  ;;  %v1250_v4 = vadd.f32 %v1186_v40, %v5045_v24  ;;  %v1251_v52 = vadd.f32 %v1187_v6, %v5046_v0  ;;  %v1195_v1 = vmul.f32 %v3131_v47, %v4986_v32  ;;  %v3249_v17 = vpop.permute.xlu1 %3248  ;;  %v5051_v22 = vld [vmem:[#allocation2_spill] sm:$0xff] }
 0x148   :  { %5042 = vst [vmem:[#allocation33_spill] sm:$0xff] %v4543_v58  ;;  %v1194_v10 = vmul.f32 %v3130_v30, %v4986_v32  ;;  %v4558_v57 = vadd.f32 %v1239_v19, %v5049_v43  ;;  %v1569_v27 = vmul.f32 %v3257_v63, %v5051_v22  ;;  %v1568_v8 = vmul.f32 %v3256_v31, %v5051_v22  ;;  %v4567_v6 = vld [vmem:[%s4866_s2] ss:$0 sm:$0xff] }
 0x149   :  { %v4555_v58 = vadd.f32 %v1238_v13, %v5047_v38  ;;  %v1254_v44 = vadd.f32 %v1190_v3, %v4446_v51  ;;  %v1255_v40 = vadd.f32 %v1191_v46, %v4443_v21  ;;  %v3251_v47 = vunpack.i.h.bf16 %v3249_v17  ;;  %v3271_v13 = vpop.permute.xlu0 %3270  ;;  %v5052_v38 = vld [vmem:[#allocation11_spill] sm:$0xff] }
 0x14a   :  { %5050 = vst [vmem:[#allocation53_spill] sm:$0xff] %v4558_v57  ;;  %v3250_v30 = vunpack.i.l.bf16 %v3249_v17  ;;  %v1632_v24 = vadd.f32 %v1568_v8, %v4491_v48  ;;  %v1633_v19 = vadd.f32 %v1569_v27, %v4494_v20  ;;  %v3273_v0 = vunpack.i.h.bf16 %v3271_v13 }
 0x14b   :  { %5048 = vst [vmem:[#allocation38_spill] sm:$0xff] %v4555_v58  ;;  %v3272_v63 = vunpack.i.l.bf16 %v3271_v13  ;;  %v4572_v31 = vadd.f32 %v1194_v10, %v4466_v9  ;;  %v4575_v51 = vadd.f32 %v1195_v1, %v4463_v60  ;;  %v1243_v21 = vmul.f32 %v3251_v47, %v4986_v32  ;;  %v5054_v9 = vld [vmem:[#allocation21_spill] sm:$0xff]  ;;  %v5057_v58 = vld [vmem:[#allocation12_spill] sm:$0xff] }
 0x14c   :  { %v1242_v46 = vmul.f32 %v3250_v30, %v4986_v32  ;;  %v1703_v3 = vadd.f32 %v4567_v6, %v1632_v24  ;;  %v1704_v17 = vadd.f32 %v4567_v6, %v1633_v19  ;;  %v1575_v48 = vmul.f32 %v3273_v0, %v5051_v22  ;;  %v3261_v27 = vpop.permute.xlu1 %3260 }
 0x14d   :  { %v1574_v20 = vmul.f32 %v3272_v63, %v5051_v22  ;;  %v4587_v10 = vadd.f32 %v1243_v21, %v5054_v9  ;;  %v3263_v60 = vunpack.i.h.bf16 %v3261_v27  ;;  %v3262_v1 = vunpack.i.l.bf16 %v3261_v27  ;;  %v3281_v8 = vpop.permute.xlu0 %3280 }
 0x14e   :  { %v4584_v43 = vadd.f32 %v1242_v46, %v5052_v38  ;;  %vm1767_vm0 = vcmp.ge.f32.partialorder %v1703_v3, 0.0  ;;  %vm1768_vm1 = vcmp.ge.f32.partialorder %v1704_v17, 0.0  ;;  %v1831_v32 = vmul.f32 0.2, %v1703_v3 }
 0x14f   :  { %5055 = vst [vmem:[#allocation37_spill] sm:$0xff] %v4587_v10  ;;  %v1832_v47 = vmul.f32 0.2, %v1704_v17  ;;  %v1638_v30 = vadd.f32 %v1574_v20, %v1250_v4  ;;  %v1639_v13 = vadd.f32 %v1575_v48, %v1251_v52  ;;  %v1571_v24 = vmul.f32 %v3263_v60, %v5051_v22  ;;  %v5056_v10 = vld [vmem:[#allocation13_spill] sm:$0xff] }
 0x150   :  { %5053 = vst [vmem:[#allocation36_spill] sm:$0xff] %v4584_v43  ;;  %v1570_v19 = vmul.f32 %v3262_v1, %v5051_v22  ;;  %v1895_v0 = vsel %vm1767_vm0, %v1703_v3, %v1831_v32  ;;  %v3283_v46 = vunpack.i.h.bf16 %v3281_v8  ;;  %v3282_v38 = vunpack.i.l.bf16 %v3281_v8  ;;  %v3266_v43 = vpop.permute.xlu1 %3265 }
 0x151   :  { %v1896_v63 = vsel %vm1768_vm1, %v1704_v17, %v1832_v47  ;;  %v1709_v9 = vadd.f32 %v4567_v6, %v1638_v30  ;;  %v1710_v27 = vadd.f32 %v4567_v6, %v1639_v13  ;;  %v1635_v41 = vadd.f32 %v1571_v24, %v5057_v58  ;;  %v3291_v30 = vpop.permute.xlu0 %3290 }
 0x152   :  { %v2543_v21 = vpack.c.bf16 %v1896_v63, %v1895_v0  ;;  %v1634_v57 = vadd.f32 %v1570_v19, %v5056_v10  ;;  %v1579_v4 = vmul.f32 %v3283_v46, %v5051_v22  ;;  %v1578_v52 = vmul.f32 %v3282_v38, %v5051_v22 }
 0x153   :  { %v3268_v48 = vunpack.i.h.bf16 %v3266_v43  ;;  %vm1773_vm2 = vcmp.ge.f32.partialorder %v1709_v9, 0.0  ;;  %vm1774_vm3 = vcmp.ge.f32.partialorder %v1710_v27, 0.0  ;;  %v1837_v3 = vmul.f32 0.2, %v1709_v9 }
 0x154   :  { %2544 = vst [vmem:[%s4867_s3] sm:$0xff] %v2543_v21   ;;  %v1838_v17 = vmul.f32 0.2, %v1710_v27  ;;  %v1705_v20 = vadd.f32 %v4567_v6, %v1634_v57  ;;  %v1706_v60 = vadd.f32 %v4567_v6, %v1635_v41  ;;  %v1642_v10 = vadd.f32 %v1578_v52, %v1254_v44  ;;  %v3276_v41 = vpop.permute.xlu1 %3275  ;;  %v5059_v52 = vld [vmem:[#allocation18_spill] sm:$0xff] }
 0x155   :  { %v1643_v1 = vadd.f32 %v1579_v4, %v1255_v40  ;;  %v1901_v58 = vsel %vm1773_vm2, %v1709_v9, %v1837_v3  ;;  %v1573_v32 = vmul.f32 %v3268_v48, %v5051_v22  ;;  %v3267_v47 = vunpack.i.l.bf16 %v3266_v43  ;;  %v5058_v40 = vld [vmem:[#allocation15_spill] sm:$0xff] }
 0x156   :  { %v1902_v8 = vsel %vm1774_vm3, %v1710_v27, %v1838_v17  ;;  %vm1769_vm4 = vcmp.ge.f32.partialorder %v1705_v20, 0.0  ;;  %vm1770_vm5 = vcmp.ge.f32.partialorder %v1706_v60, 0.0  ;;  %v1833_v24 = vmul.f32 0.2, %v1705_v20 }
 0x157   :  { %v2558_v13 = vpack.c.bf16 %v1902_v8, %v1901_v58  ;;  %v1834_v19 = vmul.f32 0.2, %v1706_v60  ;;  %v1713_v0 = vadd.f32 %v4567_v6, %v1642_v10  ;;  %v1714_v63 = vadd.f32 %v4567_v6, %v1643_v1 }
 0x158   :  { %v1572_v57 = vmul.f32 %v3267_v47, %v5051_v22  ;;  %v1897_v44 = vsel %vm1769_vm4, %v1705_v20, %v1833_v24  ;;  %v1637_v43 = vadd.f32 %v1573_v32, %v5058_v40  ;;  %v3293_v46 = vunpack.i.h.bf16 %v3291_v30  ;;  %v3301_v32 = vpop.permute.xlu0 %3300 }
 0x159   :  { %2733 = vst [vmem:[%s4867_s3 + $0x18] sm:$0xff] %v2558_v13   ;;  %v3292_v38 = vunpack.i.l.bf16 %v3291_v30  ;;  %v1898_v21 = vsel %vm1770_vm5, %v1706_v60, %v1834_v19  ;;  %vm1777_vm6 = vcmp.ge.f32.partialorder %v1713_v0, 0.0  ;;  %vm1778_vm7 = vcmp.ge.f32.partialorder %v1714_v63, 0.0  ;;  %v3286_v19 = vpop.permute.xlu1 %3285 }
 0x15a   :  { %v1841_v9 = vmul.f32 0.2, %v1713_v0  ;;  %v2548_v27 = vpack.c.bf16 %v1898_v21, %v1897_v44  ;;  %v1842_v4 = vmul.f32 0.2, %v1714_v63  ;;  %v1636_v48 = vadd.f32 %v1572_v57, %v5059_v52  ;;  %v5061_v52 = vld [vmem:[#allocation17_spill] sm:$0xff] }
 0x15b   :  { %v1708_v3 = vadd.f32 %v4567_v6, %v1637_v43  ;;  %v1583_v10 = vmul.f32 %v3293_v46, %v5051_v22  ;;  %v1582_v1 = vmul.f32 %v3292_v38, %v5051_v22  ;;  %v3278_v20 = vunpack.i.h.bf16 %v3276_v41  ;;  %v5060_v43 = vld [vmem:[#allocation25_spill] sm:$0xff] }
 0x15c   :  { %v1905_v17 = vsel %vm1777_vm6, %v1713_v0, %v1841_v9  ;;  %2731 = vst [vmem:[%s4867_s3 + $0x8] sm:$0xff] %v2548_v27   ;;  %v1906_v60 = vsel %vm1778_vm7, %v1714_v63, %v1842_v4  ;;  %v1707_v58 = vadd.f32 %v4567_v6, %v1636_v48  ;;  %v3277_v44 = vunpack.i.l.bf16 %v3276_v41 }
 0x15d   :  { %vm1772_vm8 = vcmp.ge.f32.partialorder %v1708_v3, 0.0  ;;  %v1836_v8 = vmul.f32 0.2, %v1708_v3  ;;  %v2568_v47 = vpack.c.bf16 %v1906_v60, %v1905_v17  ;;  %v1646_v30 = vadd.f32 %v1582_v1, %v4572_v31 }
 0x15e   :  { %v1647_v13 = vadd.f32 %v1583_v10, %v4575_v51  ;;  %v1577_v24 = vmul.f32 %v3278_v20, %v5051_v22  ;;  %vm1771_vm9 = vcmp.ge.f32.partialorder %v1707_v58, 0.0  ;;  %v1835_v0 = vmul.f32 0.2, %v1707_v58 }
 0x15f   :  { %v1900_v57 = vsel %vm1772_vm8, %v1708_v3, %v1836_v8  ;;  %2735 = vst [vmem:[%s4867_s3 + $0x28] sm:$0xff] %v2568_v47   ;;  %v1717_v63 = vadd.f32 %v4567_v6, %v1646_v30  ;;  %v3303_v31 = vunpack.i.h.bf16 %v3301_v32  ;;  %v1576_v51 = vmul.f32 %v3277_v44, %v5051_v22  ;;  %v3311_v47 = vpop.permute.xlu0 %3310 }
 0x160   :  { %v1718_v40 = vadd.f32 %v4567_v6, %v1647_v13  ;;  %v1641_v46 = vadd.f32 %v1577_v24, %v5060_v43  ;;  %v1899_v38 = vsel %vm1771_vm9, %v1707_v58, %v1835_v0  ;;  %v3302_v21 = vunpack.i.l.bf16 %v3301_v32  ;;  %v5062_v43 = vld [vmem:[#allocation22_spill] sm:$0xff] }
 0x161   :  { %v3288_v9 = vunpack.i.h.bf16 %v3286_v19  ;;  %v2553_v27 = vpack.c.bf16 %v1900_v57, %v1899_v38  ;;  %vm1781_vm10 = vcmp.ge.f32.partialorder %v1717_v63, 0.0  ;;  %v1845_v41 = vmul.f32 0.2, %v1717_v63  ;;  %v3296_v57 = vpop.permute.xlu1 %3295 }
 0x162   :  { %vm1782_vm11 = vcmp.ge.f32.partialorder %v1718_v40, 0.0  ;;  %v1846_v4 = vmul.f32 0.2, %v1718_v40  ;;  %v1640_v48 = vadd.f32 %v1576_v51, %v5061_v52  ;;  %v1712_v3 = vadd.f32 %v4567_v6, %v1641_v46 }
 0x163   :  { %v1587_v17 = vmul.f32 %v3303_v31, %v5051_v22  ;;  %2732 = vst [vmem:[%s4867_s3 + $0x10] sm:$0xff] %v2553_v27   ;;  %v1909_v10 = vsel %vm1781_vm10, %v1717_v63, %v1845_v41  ;;  %v1586_v1 = vmul.f32 %v3302_v21, %v5051_v22  ;;  %v1581_v20 = vmul.f32 %v3288_v9, %v5051_v22  ;;  %v5063_v31 = vld [vmem:[#allocation14_spill] sm:$0xff] }
 0x164   :  { %v3287_v60 = vunpack.i.l.bf16 %v3286_v19  ;;  %v1910_v58 = vsel %vm1782_vm11, %v1718_v40, %v1846_v4  ;;  %v1711_v8 = vadd.f32 %v4567_v6, %v1640_v48  ;;  %vm1776_vm12 = vcmp.ge.f32.partialorder %v1712_v3, 0.0 }
 0x165   :  { %v1840_v32 = vmul.f32 0.2, %v1712_v3  ;;  %v2578_v30 = vpack.c.bf16 %v1910_v58, %v1909_v10  ;;  %v1650_v13 = vadd.f32 %v1586_v1, %v4352_v34  ;;  %v1651_v24 = vadd.f32 %v1587_v17, %v4354_v26 }
 0x166   :  { %v1580_v0 = vmul.f32 %v3287_v60, %v5051_v22  ;;  %vm1775_vm13 = vcmp.ge.f32.partialorder %v1711_v8, 0.0  ;;  %v1839_v44 = vmul.f32 0.2, %v1711_v8  ;;  %v1645_v46 = vadd.f32 %v1581_v20, %v5062_v43  ;;  %v3321_v20 = vpop.permute.xlu0 %3320 }
 0x167   :  { %v1904_v63 = vsel %vm1776_vm12, %v1712_v3, %v1840_v32  ;;  %2737 = vst [vmem:[%s4867_s3 + $0x38] sm:$0xff] %v2578_v30   ;;  %v1721_v19 = vadd.f32 %v4567_v6, %v1650_v13  ;;  %v1722_v40 = vadd.f32 %v4567_v6, %v1651_v24  ;;  %v3313_v38 = vunpack.i.h.bf16 %v3311_v47  ;;  %v3306_v24 = vpop.permute.xlu1 %3305 }
 0x168   :  { %v1644_v34 = vadd.f32 %v1580_v0, %v5063_v31  ;;  %v1903_v26 = vsel %vm1775_vm13, %v1711_v8, %v1839_v44  ;;  %v1716_v51 = vadd.f32 %v4567_v6, %v1645_v46  ;;  %v3312_v21 = vunpack.i.l.bf16 %v3311_v47 }
 0x169   :  { %v3298_v9 = vunpack.i.h.bf16 %v3296_v57  ;;  %v2563_v27 = vpack.c.bf16 %v1904_v63, %v1903_v26  ;;  %vm1785_vm14 = vcmp.ge.f32.partialorder %v1721_v19, 0.0  ;;  %vm1786_vm15 = vcmp.ge.f32.partialorder %v1722_v40, 0.0  ;;  %v5064_v26 = vld [vmem:[#allocation23_spill] sm:$0xff] }
 0x16a   :  { %v1849_v41 = vmul.f32 0.2, %v1721_v19  ;;  %v1850_v4 = vmul.f32 0.2, %v1722_v40  ;;  %v1715_v52 = vadd.f32 %v4567_v6, %v1644_v34  ;;  %vm1780_vm0 = vcmp.ge.f32.partialorder %v1716_v51, 0.0 }
 0x16b   :  { %v1844_v48 = vmul.f32 0.2, %v1716_v51  ;;  %2734 = vst [vmem:[%s4867_s3 + $0x20] sm:$0xff] %v2563_v27   ;;  %v1591_v17 = vmul.f32 %v3313_v38, %v5051_v22  ;;  %v1590_v10 = vmul.f32 %v3312_v21, %v5051_v22  ;;  %v1585_v1 = vmul.f32 %v3298_v9, %v5051_v22  ;;  %v3331_v27 = vpop.permute.xlu0 %3330 }
 0x16c   :  { %v1913_v3 = vsel %vm1785_vm14, %v1721_v19, %v1849_v41  ;;  %v1914_v60 = vsel %vm1786_vm15, %v1722_v40, %v1850_v4  ;;  %vm1779_vm1 = vcmp.ge.f32.partialorder %v1715_v52, 0.0  ;;  %v1843_v58 = vmul.f32 0.2, %v1715_v52 }
 0x16d   :  { %v1908_v8 = vsel %vm1780_vm0, %v1716_v51, %v1844_v48  ;;  %v2588_v32 = vpack.c.bf16 %v1914_v60, %v1913_v3  ;;  %v1654_v47 = vadd.f32 %v1590_v10, %v4370_v35  ;;  %v1655_v30 = vadd.f32 %v1591_v17, %v4372_v28 }
 0x16e   :  { %v3297_v13 = vunpack.i.l.bf16 %v3296_v57  ;;  %v1907_v0 = vsel %vm1779_vm1, %v1715_v52, %v1843_v58  ;;  %v1649_v44 = vadd.f32 %v1585_v1, %v4332_v11  ;;  %v3323_v63 = vunpack.i.h.bf16 %v3321_v20  ;;  %v5065_v58 = vld [vmem:[#allocation19_spill] sm:$0xff] }
 0x16f   :  { %v3322_v43 = vunpack.i.l.bf16 %v3321_v20  ;;  %2739 = vst [vmem:[%s4867_s3 + $0x48] sm:$0xff] %v2588_v32   ;;  %v2573_v46 = vpack.c.bf16 %v1908_v8, %v1907_v0  ;;  %v1725_v19 = vadd.f32 %v4567_v6, %v1654_v47  ;;  %v1726_v40 = vadd.f32 %v4567_v6, %v1655_v30 }
 0x170   :  { %v1584_v35 = vmul.f32 %v3297_v13, %v5051_v22  ;;  %v1720_v28 = vadd.f32 %v4567_v6, %v1649_v44  ;;  %v1595_v57 = vmul.f32 %v3323_v63, %v5051_v22  ;;  %v3308_v11 = vunpack.i.h.bf16 %v3306_v24 }
 0x171   :  { %v1594_v31 = vmul.f32 %v3322_v43, %v5051_v22  ;;  %2736 = vst [vmem:[%s4867_s3 + $0x30] sm:$0xff] %v2573_v46   ;;  %vm1789_vm2 = vcmp.ge.f32.partialorder %v1725_v19, 0.0  ;;  %vm1790_vm3 = vcmp.ge.f32.partialorder %v1726_v40, 0.0  ;;  %v1853_v34 = vmul.f32 0.2, %v1725_v19  ;;  %v3316_v43 = vpop.permute.xlu1 %3315  ;;  %v3341_v46 = vpop.permute.xlu0 %3340 }
 0x172   :  { %v1854_v38 = vmul.f32 0.2, %v1726_v40  ;;  %v1648_v51 = vadd.f32 %v1584_v35, %v5064_v26  ;;  %vm1784_vm4 = vcmp.ge.f32.partialorder %v1720_v28, 0.0  ;;  %v1848_v21 = vmul.f32 0.2, %v1720_v28  ;;  %v5066_v35 = vld [vmem:[#allocation20_spill] sm:$0xff] }
 0x173   :  { %v1658_v9 = vadd.f32 %v1594_v31, %v4384_v12  ;;  %v1917_v41 = vsel %vm1789_vm2, %v1725_v19, %v1853_v34  ;;  %v1659_v52 = vadd.f32 %v1595_v57, %v4386_v56  ;;  %v1589_v48 = vmul.f32 %v3308_v11, %v5051_v22 }
 0x174   :  { %v1918_v4 = vsel %vm1790_vm3, %v1726_v40, %v1854_v38  ;;  %v1719_v17 = vadd.f32 %v4567_v6, %v1648_v51  ;;  %v1912_v10 = vsel %vm1784_vm4, %v1720_v28, %v1848_v21  ;;  %v3307_v60 = vunpack.i.l.bf16 %v3306_v24 }
 0x175   :  { %v2598_v3 = vpack.c.bf16 %v1918_v4, %v1917_v41  ;;  %v1729_v1 = vadd.f32 %v4567_v6, %v1658_v9  ;;  %v1730_v20 = vadd.f32 %v4567_v6, %v1659_v52  ;;  %v1653_v8 = vadd.f32 %v1589_v48, %v5065_v58 }
 0x176   :  { %v3333_v32 = vunpack.i.h.bf16 %v3331_v27  ;;  %vm1783_vm5 = vcmp.ge.f32.partialorder %v1719_v17, 0.0  ;;  %v1847_v12 = vmul.f32 0.2, %v1719_v17  ;;  %v1588_v30 = vmul.f32 %v3307_v60, %v5051_v22  ;;  %v5067_v60 = vld [vmem:[#allocation16_spill] sm:$0xff] }
 0x177   :  { %2741 = vst [vmem:[%s4867_s3 + $0x58] sm:$0xff] %v2598_v3   ;;  %vm1793_vm6 = vcmp.ge.f32.partialorder %v1729_v1, 0.0  ;;  %v1857_v56 = vmul.f32 0.2, %v1729_v1  ;;  %vm1794_vm7 = vcmp.ge.f32.partialorder %v1730_v20, 0.0  ;;  %v1724_v13 = vadd.f32 %v4567_v6, %v1653_v8  ;;  %v3326_v8 = vpop.permute.xlu1 %3325 }
 0x178   :  { %v1858_v47 = vmul.f32 0.2, %v1730_v20  ;;  %v1911_v0 = vsel %vm1783_vm5, %v1719_v17, %v1847_v12  ;;  %v1599_v24 = vmul.f32 %v3333_v32, %v5051_v22  ;;  %v3332_v63 = vunpack.i.l.bf16 %v3331_v27  ;;  %v3351_v32 = vpop.permute.xlu0 %3350 }
 0x179   :  { %v1921_v44 = vsel %vm1793_vm6, %v1729_v1, %v1857_v56  ;;  %v2583_v19 = vpack.c.bf16 %v1912_v10, %v1911_v0  ;;  %v1652_v28 = vadd.f32 %v1588_v30, %v5066_v35  ;;  %vm1788_vm8 = vcmp.ge.f32.partialorder %v1724_v13, 0.0 }
 0x17a   :  { %v1922_v40 = vsel %vm1794_vm7, %v1730_v20, %v1858_v47  ;;  %v1852_v31 = vmul.f32 0.2, %v1724_v13  ;;  %v1598_v11 = vmul.f32 %v3332_v63, %v5051_v22  ;;  %v1663_v34 = vadd.f32 %v1599_v24, %v4406_v39 }
 0x17b   :  { %v2608_v57 = vpack.c.bf16 %v1922_v40, %v1921_v44  ;;  %2738 = vst [vmem:[%s4867_s3 + $0x40] sm:$0xff] %v2583_v19   ;;  %v1723_v38 = vadd.f32 %v4567_v6, %v1652_v28  ;;  %v3318_v26 = vunpack.i.h.bf16 %v3316_v43  ;;  %v3317_v51 = vunpack.i.l.bf16 %v3316_v43 }
 0x17c   :  { %v3343_v21 = vunpack.i.h.bf16 %v3341_v46  ;;  %v1916_v9 = vsel %vm1788_vm8, %v1724_v13, %v1852_v31  ;;  %v1662_v27 = vadd.f32 %v1598_v11, %v4404_v37  ;;  %v1734_v41 = vadd.f32 %v4567_v6, %v1663_v34  ;;  %v3336_v34 = vpop.permute.xlu1 %3335 }
 0x17d   :  { %2743 = vst [vmem:[%s4867_s3 + $0x68] sm:$0xff] %v2608_v57   ;;  %v3342_v4 = vunpack.i.l.bf16 %v3341_v46  ;;  %vm1787_vm9 = vcmp.ge.f32.partialorder %v1723_v38, 0.0  ;;  %v1851_v39 = vmul.f32 0.2, %v1723_v38  ;;  %v1593_v52 = vmul.f32 %v3318_v26, %v5051_v22 }
 0x17e   :  { %v1592_v48 = vmul.f32 %v3317_v51, %v5051_v22  ;;  %v1733_v3 = vadd.f32 %v4567_v6, %v1662_v27  ;;  %vm1798_vm10 = vcmp.ge.f32.partialorder %v1734_v41, 0.0  ;;  %v1862_v17 = vmul.f32 0.2, %v1734_v41 }
 0x17f   :  { %v1603_v10 = vmul.f32 %v3343_v21, %v5051_v22  ;;  %v1915_v1 = vsel %vm1787_vm9, %v1723_v38, %v1851_v39  ;;  %v1657_v37 = vadd.f32 %v1593_v52, %v5067_v60  ;;  %v1602_v58 = vmul.f32 %v3342_v4, %v5051_v22  ;;  %v3361_v39 = vpop.permute.xlu0 %3360 }
 0x180   :  { %v1656_v20 = vadd.f32 %v1592_v48, %v4360_v53  ;;  %v2593_v12 = vpack.c.bf16 %v1916_v9, %v1915_v1  ;;  %vm1797_vm11 = vcmp.ge.f32.partialorder %v1733_v3, 0.0  ;;  %v1861_v56 = vmul.f32 0.2, %v1733_v3  ;;  %v5068_v9 = vld [vmem:[#allocation26_spill] sm:$0xff] }
 0x181   :  { %v1926_v47 = vsel %vm1798_vm10, %v1734_v41, %v1862_v17  ;;  %v1728_v13 = vadd.f32 %v4567_v6, %v1657_v37  ;;  %v1666_v0 = vadd.f32 %v1602_v58, %v4424_v61  ;;  %v1667_v44 = vadd.f32 %v1603_v10, %v4426_v14  ;;  %v5069_v41 = vld [vmem:[#allocation42_spill] sm:$0xff] }
 0x182   :  { %v1727_v30 = vadd.f32 %v4567_v6, %v1656_v20  ;;  %2740 = vst [vmem:[%s4867_s3 + $0x50] sm:$0xff] %v2593_v12   ;;  %v1925_v53 = vsel %vm1797_vm11, %v1733_v3, %v1861_v56  ;;  %v3328_v24 = vunpack.i.h.bf16 %v3326_v8  ;;  %v3327_v63 = vunpack.i.l.bf16 %v3326_v8 }
 0x183   :  { %v3353_v43 = vunpack.i.h.bf16 %v3351_v32  ;;  %v2618_v46 = vpack.c.bf16 %v1926_v47, %v1925_v53  ;;  %vm1792_vm13 = vcmp.ge.f32.partialorder %v1728_v13, 0.0  ;;  %v1856_v40 = vmul.f32 0.2, %v1728_v13 }
 0x184   :  { %vm1791_vm12 = vcmp.ge.f32.partialorder %v1727_v30, 0.0  ;;  %v1855_v19 = vmul.f32 0.2, %v1727_v30  ;;  %v1737_v35 = vadd.f32 %v4567_v6, %v1666_v0  ;;  %v1738_v28 = vadd.f32 %v4567_v6, %v1667_v44 }
 0x185   :  { %v1597_v61 = vmul.f32 %v3328_v24, %v5051_v22  ;;  %2745 = vst [vmem:[%s4867_s3 + $0x78] sm:$0xff] %v2618_v46   ;;  %v1596_v57 = vmul.f32 %v3327_v63, %v5051_v22  ;;  %v1607_v31 = vmul.f32 %v3353_v43, %v5051_v22  ;;  %v3352_v11 = vunpack.i.l.bf16 %v3351_v32  ;;  %v3371_v24 = vpop.permute.xlu0 %3370 }
 0x186   :  { %v1919_v14 = vsel %vm1791_vm12, %v1727_v30, %v1855_v19  ;;  %v1920_v38 = vsel %vm1792_vm13, %v1728_v13, %v1856_v40  ;;  %vm1801_vm14 = vcmp.ge.f32.partialorder %v1737_v35, 0.0  ;;  %vm1802_vm15 = vcmp.ge.f32.partialorder %v1738_v28, 0.0  ;;  %v3346_v13 = vpop.permute.xlu1 %3345 }
 0x187   :  { %v1865_v26 = vmul.f32 0.2, %v1737_v35  ;;  %v2603_v51 = vpack.c.bf16 %v1920_v38, %v1919_v14  ;;  %v1866_v21 = vmul.f32 0.2, %v1738_v28  ;;  %v1660_v27 = vadd.f32 %v1596_v57, %v5068_v9 }
 0x188   :  { %v1661_v4 = vadd.f32 %v1597_v61, %v5069_v41  ;;  %v1606_v48 = vmul.f32 %v3352_v11, %v5051_v22  ;;  %v1671_v3 = vadd.f32 %v1607_v31, %v4452_v55  ;;  %v3338_v17 = vunpack.i.h.bf16 %v3336_v34 }
 0x189   :  { %v1929_v52 = vsel %vm1801_vm14, %v1737_v35, %v1865_v26  ;;  %2742 = vst [vmem:[%s4867_s3 + $0x60] sm:$0xff] %v2603_v51   ;;  %v1930_v10 = vsel %vm1802_vm15, %v1738_v28, %v1866_v21  ;;  %v1731_v1 = vadd.f32 %v4567_v6, %v1660_v27  ;;  %v3337_v60 = vunpack.i.l.bf16 %v3336_v34 }
 0x18a   :  { %v1732_v20 = vadd.f32 %v4567_v6, %v1661_v4  ;;  %v2628_v37 = vpack.c.bf16 %v1930_v10, %v1929_v52  ;;  %v1670_v58 = vadd.f32 %v1606_v48, %v4449_v5  ;;  %v1742_v8 = vadd.f32 %v4567_v6, %v1671_v3  ;;  %v3356_v21 = vpop.permute.xlu1 %3355 }
 0x18b   :  { %v1601_v32 = vmul.f32 %v3338_v17, %v5051_v22  ;;  %vm1795_vm0 = vcmp.ge.f32.partialorder %v1731_v1, 0.0  ;;  %v1859_v55 = vmul.f32 0.2, %v1731_v1  ;;  %v1600_v30 = vmul.f32 %v3337_v60, %v5051_v22 }
 0x18c   :  { %vm1796_vm1 = vcmp.ge.f32.partialorder %v1732_v20, 0.0  ;;  %v1860_v12 = vmul.f32 0.2, %v1732_v20  ;;  %2747 = vst [vmem:[%s4867_s3 + $0x88] sm:$0xff] %v2628_v37   ;;  %v1741_v56 = vadd.f32 %v4567_v6, %v1670_v58  ;;  %vm1806_vm2 = vcmp.ge.f32.partialorder %v1742_v8, 0.0 }
 0x18d   :  { %v1870_v47 = vmul.f32 0.2, %v1742_v8  ;;  %v1923_v5 = vsel %vm1795_vm0, %v1731_v1, %v1859_v55  ;;  %v1665_v44 = vadd.f32 %v1601_v32, %v4396_v59  ;;  %v3363_v53 = vunpack.i.h.bf16 %v3361_v39 }
 0x18e   :  { %v1924_v0 = vsel %vm1796_vm1, %v1732_v20, %v1860_v12  ;;  %vm1805_vm3 = vcmp.ge.f32.partialorder %v1741_v56, 0.0  ;;  %v1869_v43 = vmul.f32 0.2, %v1741_v56  ;;  %v1664_v19 = vadd.f32 %v1600_v30, %v4393_v29  ;;  %v3381_v12 = vpop.permute.xlu0 %3380 }
 0x18f   :  { %v2613_v63 = vpack.c.bf16 %v1924_v0, %v1923_v5  ;;  %v1934_v46 = vsel %vm1806_vm2, %v1742_v8, %v1870_v47  ;;  %v1736_v40 = vadd.f32 %v4567_v6, %v1665_v44  ;;  %v1611_v35 = vmul.f32 %v3363_v53, %v5051_v22 }
 0x190   :  { %v3362_v28 = vunpack.i.l.bf16 %v3361_v39  ;;  %v1933_v61 = vsel %vm1805_vm3, %v1741_v56, %v1869_v43  ;;  %v3348_v14 = vunpack.i.h.bf16 %v3346_v13  ;;  %v3347_v59 = vunpack.i.l.bf16 %v3346_v13  ;;  %v3366_v13 = vpop.permute.xlu1 %3365 }
 0x191   :  { %2744 = vst [vmem:[%s4867_s3 + $0x70] sm:$0xff] %v2613_v63   ;;  %v3373_v57 = vunpack.i.h.bf16 %v3371_v24  ;;  %v2638_v31 = vpack.c.bf16 %v1934_v46, %v1933_v61  ;;  %v1735_v11 = vadd.f32 %v4567_v6, %v1664_v19  ;;  %vm1800_vm4 = vcmp.ge.f32.partialorder %v1736_v40, 0.0 }
 0x192   :  { %v1864_v34 = vmul.f32 0.2, %v1736_v40  ;;  %v1610_v29 = vmul.f32 %v3362_v28, %v5051_v22  ;;  %v1675_v38 = vadd.f32 %v1611_v35, %v4474_v7  ;;  %v1605_v26 = vmul.f32 %v3348_v14, %v5051_v22 }
 0x193   :  { %v1604_v51 = vmul.f32 %v3347_v59, %v5051_v22  ;;  %2749 = vst [vmem:[%s4867_s3 + $0x98] sm:$0xff] %v2638_v31   ;;  %vm1799_vm5 = vcmp.ge.f32.partialorder %v1735_v11, 0.0  ;;  %v1863_v9 = vmul.f32 0.2, %v1735_v11  ;;  %v1615_v41 = vmul.f32 %v3373_v57, %v5051_v22 }
 0x194   :  { %v1928_v27 = vsel %vm1800_vm4, %v1736_v40, %v1864_v34  ;;  %v1674_v4 = vadd.f32 %v1610_v29, %v4471_v62  ;;  %v1746_v39 = vadd.f32 %v4567_v6, %v1675_v38  ;;  %v1669_v52 = vadd.f32 %v1605_v26, %v4412_v18 }
 0x195   :  { %v1668_v7 = vadd.f32 %v1604_v51, %v4409_v54  ;;  %v1927_v48 = vsel %vm1799_vm5, %v1735_v11, %v1863_v9  ;;  %v3372_v3 = vunpack.i.l.bf16 %v3371_v24  ;;  %v1679_v17 = vadd.f32 %v1615_v41, %v4500_v15  ;;  %v3391_v11 = vpop.permute.xlu0 %3390 }
 0x196   :  { %v3358_v10 = vunpack.i.h.bf16 %v3356_v21  ;;  %v2623_v1 = vpack.c.bf16 %v1928_v27, %v1927_v48  ;;  %v1745_v20 = vadd.f32 %v4567_v6, %v1674_v4  ;;  %vm1810_vm6 = vcmp.ge.f32.partialorder %v1746_v39, 0.0 }
 0x197   :  { %v1874_v60 = vmul.f32 0.2, %v1746_v39  ;;  %v1739_v37 = vadd.f32 %v4567_v6, %v1668_v7  ;;  %v1740_v62 = vadd.f32 %v4567_v6, %v1669_v52  ;;  %v1614_v58 = vmul.f32 %v3372_v3, %v5051_v22 }
 0x198   :  { %v1750_v54 = vadd.f32 %v4567_v6, %v1679_v17  ;;  %2746 = vst [vmem:[%s4867_s3 + $0x80] sm:$0xff] %v2623_v1   ;;  %vm1809_vm7 = vcmp.ge.f32.partialorder %v1745_v20, 0.0  ;;  %v1873_v18 = vmul.f32 0.2, %v1745_v20  ;;  %v1609_v8 = vmul.f32 %v3358_v10, %v5051_v22 }
 0x199   :  { %v1938_v15 = vsel %vm1810_vm6, %v1746_v39, %v1874_v60  ;;  %vm1803_vm8 = vcmp.ge.f32.partialorder %v1739_v37, 0.0  ;;  %vm1804_vm9 = vcmp.ge.f32.partialorder %v1740_v62, 0.0  ;;  %v1867_v32 = vmul.f32 0.2, %v1739_v37  ;;  %v3376_v39 = vpop.permute.xlu1 %3375 }
 0x19a   :  { %v1868_v55 = vmul.f32 0.2, %v1740_v62  ;;  %v1937_v56 = vsel %vm1809_vm7, %v1745_v20, %v1873_v18  ;;  %v1678_v47 = vadd.f32 %v1614_v58, %v4497_v16  ;;  %vm1814_vm10 = vcmp.ge.f32.partialorder %v1750_v54, 0.0 }
 0x19b   :  { %v1878_v30 = vmul.f32 0.2, %v1750_v54  ;;  %v2648_v5 = vpack.c.bf16 %v1938_v15, %v1937_v56  ;;  %v1931_v0 = vsel %vm1803_vm8, %v1739_v37, %v1867_v32  ;;  %v3357_v53 = vunpack.i.l.bf16 %v3356_v21 }
 0x19c   :  { %v1932_v44 = vsel %vm1804_vm9, %v1740_v62, %v1868_v55  ;;  %v1749_v63 = vadd.f32 %v4567_v6, %v1678_v47  ;;  %v1673_v46 = vadd.f32 %v1609_v8, %v4436_v45  ;;  %v3383_v16 = vunpack.i.h.bf16 %v3381_v12  ;;  %v3401_v8 = vpop.permute.xlu0 %3400 }
 0x19d   :  { %v2633_v24 = vpack.c.bf16 %v1932_v44, %v1931_v0  ;;  %v1942_v43 = vsel %vm1814_vm10, %v1750_v54, %v1878_v30  ;;  %2751 = vst [vmem:[%s4867_s3 + $0xa8] sm:$0xff] %v2648_v5   ;;  %v1608_v19 = vmul.f32 %v3357_v53, %v5051_v22  ;;  %v3382_v40 = vunpack.i.l.bf16 %v3381_v12  ;;  %v3386_v32 = vpop.permute.xlu1 %3385 }
 0x19e   :  { %v3368_v35 = vunpack.i.h.bf16 %v3366_v13  ;;  %vm1813_vm11 = vcmp.ge.f32.partialorder %v1749_v63, 0.0  ;;  %v1877_v28 = vmul.f32 0.2, %v1749_v63  ;;  %v1744_v61 = vadd.f32 %v4567_v6, %v1673_v46 }
 0x19f   :  { %2748 = vst [vmem:[%s4867_s3 + $0x90] sm:$0xff] %v2633_v24   ;;  %v3367_v14 = vunpack.i.l.bf16 %v3366_v13  ;;  %v1672_v45 = vadd.f32 %v1608_v19, %v4433_v23  ;;  %v1619_v59 = vmul.f32 %v3383_v16, %v5051_v22  ;;  %v1618_v57 = vmul.f32 %v3382_v40, %v5051_v22 }
 0x1a0   :  { %v1613_v31 = vmul.f32 %v3368_v35, %v5051_v22  ;;  %v1941_v34 = vsel %vm1813_vm11, %v1749_v63, %v1877_v28  ;;  %vm1808_vm12 = vcmp.ge.f32.partialorder %v1744_v61, 0.0  ;;  %v1872_v29 = vmul.f32 0.2, %v1744_v61 }
 0x1a1   :  { %v1612_v38 = vmul.f32 %v3367_v14, %v5051_v22  ;;  %v2658_v26 = vpack.c.bf16 %v1942_v43, %v1941_v34  ;;  %v1743_v51 = vadd.f32 %v4567_v6, %v1672_v45  ;;  %v1682_v21 = vadd.f32 %v1618_v57, %v4515_v42  ;;  %v5070_v43 = vld [vmem:[#allocation51_spill] sm:$0xff]  ;;  %v3411_v34 = vpop.permute.xlu0 %3410 }
 0x1a2   :  { %v1683_v9 = vadd.f32 %v1619_v59, %v4518_v49  ;;  %v1936_v23 = vsel %vm1808_vm12, %v1744_v61, %v1872_v29  ;;  %v1677_v41 = vadd.f32 %v1613_v31, %v4458_v50  ;;  %v3393_v4 = vunpack.i.h.bf16 %v3391_v11  ;;  %v5071_v59 = vld [vmem:[#allocation38_spill] sm:$0xff]  ;;  %v5072_v31 = vld [vmem:[#allocation53_spill] sm:$0xff] }
 0x1a3   :  { %v1676_v27 = vadd.f32 %v1612_v38, %v4455_v2  ;;  %2753 = vst [vmem:[%s4867_s3 + $0xb8] sm:$0xff] %v2658_v26   ;;  %vm1807_vm13 = vcmp.ge.f32.partialorder %v1743_v51, 0.0  ;;  %v1871_v7 = vmul.f32 0.2, %v1743_v51  ;;  %v1753_v52 = vadd.f32 %v4567_v6, %v1682_v21  ;;  %v3396_v26 = vpop.permute.xlu1 %3395 }
 0x1a4   :  { %v1754_v48 = vadd.f32 %v4567_v6, %v1683_v9  ;;  %v1748_v49 = vadd.f32 %v4567_v6, %v1677_v41  ;;  %v1623_v2 = vmul.f32 %v3393_v4, %v5051_v22  ;;  %v3392_v3 = vunpack.i.l.bf16 %v3391_v11  ;;  %v5073_v41 = vld [vmem:[#allocation34_spill] sm:$0xff] }
 0x1a5   :  { %v1747_v42 = vadd.f32 %v4567_v6, %v1676_v27  ;;  %v1935_v50 = vsel %vm1807_vm13, %v1743_v51, %v1871_v7  ;;  %vm1817_vm14 = vcmp.ge.f32.partialorder %v1753_v52, 0.0  ;;  %v1881_v17 = vmul.f32 0.2, %v1753_v52 }
 0x1a6   :  { %vm1818_vm15 = vcmp.ge.f32.partialorder %v1754_v48, 0.0  ;;  %v2643_v10 = vpack.c.bf16 %v1936_v23, %v1935_v50  ;;  %v1882_v1 = vmul.f32 0.2, %v1754_v48  ;;  %vm1812_vm1 = vcmp.ge.f32.partialorder %v1748_v49, 0.0 }
 0x1a7   :  { %vm1811_vm0 = vcmp.ge.f32.partialorder %v1747_v42, 0.0  ;;  %v1945_v20 = vsel %vm1817_vm14, %v1753_v52, %v1881_v17  ;;  %v1875_v60 = vmul.f32 0.2, %v1747_v42  ;;  %v1876_v37 = vmul.f32 0.2, %v1748_v49 }
 0x1a8   :  { %v1622_v62 = vmul.f32 %v3392_v3, %v5051_v22  ;;  %2750 = vst [vmem:[%s4867_s3 + $0xa0] sm:$0xff] %v2643_v10   ;;  %v1946_v58 = vsel %vm1818_vm15, %v1754_v48, %v1882_v1  ;;  %v1687_v54 = vadd.f32 %v1623_v2, %v4540_v33  ;;  %v3378_v18 = vunpack.i.h.bf16 %v3376_v39  ;;  %v5074_v2 = vld [vmem:[#allocation35_spill] sm:$0xff] }
 0x1a9   :  { %v3377_v15 = vunpack.i.l.bf16 %v3376_v39  ;;  %v2668_v55 = vpack.c.bf16 %v1946_v58, %v1945_v20  ;;  %v1939_v12 = vsel %vm1811_vm0, %v1747_v42, %v1875_v60  ;;  %v1940_v56 = vsel %vm1812_vm1, %v1748_v49, %v1876_v37  ;;  %v3406_v58 = vpop.permute.xlu1 %3405 }
 0x1aa   :  { %v1686_v47 = vadd.f32 %v1622_v62, %v4537_v25  ;;  %v2653_v30 = vpack.c.bf16 %v1940_v56, %v1939_v12  ;;  %v1758_v13 = vadd.f32 %v4567_v6, %v1687_v54  ;;  %v1617_v5 = vmul.f32 %v3378_v18, %v5051_v22  ;;  %v5075_v18 = vld [vmem:[#allocation36_spill] sm:$0xff] }
 0x1ab   :  { %v1616_v0 = vmul.f32 %v3377_v15, %v5051_v22  ;;  %2755 = vst [vmem:[%s4867_s3 + $0xc8] sm:$0xff] %v2668_v55   ;;  %v3403_v44 = vunpack.i.h.bf16 %v3401_v8  ;;  %v3402_v53 = vunpack.i.l.bf16 %v3401_v8  ;;  %v3388_v24 = vunpack.i.h.bf16 %v3386_v32  ;;  %v5076_v8 = vld [vmem:[#allocation37_spill] sm:$0xff] }
 0x1ac   :  { %v1757_v33 = vadd.f32 %v4567_v6, %v1686_v47  ;;  %2752 = vst [vmem:[%s4867_s3 + $0xb0] sm:$0xff] %v2653_v30   ;;  %vm1822_vm2 = vcmp.ge.f32.partialorder %v1758_v13, 0.0  ;;  %v1886_v25 = vmul.f32 0.2, %v1758_v13  ;;  %v1681_v46 = vadd.f32 %v1617_v5, %v5070_v43  ;;  %v5077_v5 = vld [vmem:[#allocation32_spill] sm:$0xff] }
 0x1ad   :  { %v1680_v63 = vadd.f32 %v1616_v0, %v4481_v36  ;;  %v1627_v16 = vmul.f32 %v3403_v44, %v5051_v22  ;;  %v1626_v40 = vmul.f32 %v3402_v53, %v5051_v22  ;;  %v1621_v14 = vmul.f32 %v3388_v24, %v5051_v22 }
 0x1ae   :  { %vm1821_vm3 = vcmp.ge.f32.partialorder %v1757_v33, 0.0  ;;  %v1885_v19 = vmul.f32 0.2, %v1757_v33  ;;  %v1950_v35 = vsel %vm1822_vm2, %v1758_v13, %v1886_v25  ;;  %v1752_v61 = vadd.f32 %v4567_v6, %v1681_v46  ;;  %v5078_v46 = vld [vmem:[#allocation52_spill] sm:$0xff] }
 0x1af   :  { %v1751_v28 = vadd.f32 %v4567_v6, %v1680_v63  ;;  %v1690_v57 = vadd.f32 %v1626_v40, %v5071_v59  ;;  %v1691_v36 = vadd.f32 %v1627_v16, %v5072_v31  ;;  %v3387_v11 = vunpack.i.l.bf16 %v3386_v32  ;;  %v3414_v16 = vld [vmem:[%s4866_s2] ss:$0 sm:$0xff] }
 0x1b0   :  { %v1949_v45 = vsel %vm1821_vm3, %v1757_v33, %v1885_v19  ;;  %vm1816_vm5 = vcmp.ge.f32.partialorder %v1752_v61, 0.0  ;;  %v1880_v51 = vmul.f32 0.2, %v1752_v61  ;;  %v1685_v4 = vadd.f32 %v1621_v14, %v5073_v41 }
 0x1b1   :  { %v2678_v29 = vpack.c.bf16 %v1950_v35, %v1949_v45  ;;  %vm1815_vm4 = vcmp.ge.f32.partialorder %v1751_v28, 0.0  ;;  %v1879_v38 = vmul.f32 0.2, %v1751_v28  ;;  %v1761_v21 = vadd.f32 %v4567_v6, %v1690_v57  ;;  %v5079_v57 = vld [vmem:[#allocation33_spill] sm:$0xff] }
 0x1b2   :  { %v1762_v9 = vadd.f32 %v4567_v6, %v1691_v36  ;;  %v1620_v23 = vmul.f32 %v3387_v11, %v5051_v22  ;;  %v3413_v39 = vunpack.i.h.bf16 %v3411_v34  ;;  %v3412_v7 = vunpack.i.l.bf16 %v3411_v34  ;;  %v5080_v36 = vld [vmem:[#allocation39_spill] sm:$0xff] }
 0x1b3   :  { %2757 = vst [vmem:[%s4867_s3 + $0xd8] sm:$0xff] %v2678_v29   ;;  %v1943_v27 = vsel %vm1815_vm4, %v1751_v28, %v1879_v38  ;;  %v1944_v52 = vsel %vm1816_vm5, %v1752_v61, %v1880_v51  ;;  %vm1825_vm6 = vcmp.ge.f32.partialorder %v1761_v21, 0.0  ;;  %v1889_v48 = vmul.f32 0.2, %v1761_v21 }
 0x1b4   :  { %vm1826_vm7 = vcmp.ge.f32.partialorder %v1762_v9, 0.0  ;;  %v2663_v42 = vpack.c.bf16 %v1944_v52, %v1943_v27  ;;  %v1890_v49 = vmul.f32 0.2, %v1762_v9  ;;  %v1684_v3 = vadd.f32 %v1620_v23, %v5074_v2 }
 0x1b5   :  { %v1756_v50 = vadd.f32 %v4567_v6, %v1685_v4  ;;  %v1953_v17 = vsel %vm1825_vm6, %v1761_v21, %v1889_v48  ;;  %v1631_v10 = vmul.f32 %v3413_v39, %v5051_v22  ;;  %v1630_v1 = vmul.f32 %v3412_v7, %v5051_v22 }
 0x1b6   :  { %v3398_v20 = vunpack.i.h.bf16 %v3396_v26  ;;  %2754 = vst [vmem:[%s4867_s3 + $0xc0] sm:$0xff] %v2663_v42   ;;  %v1954_v60 = vsel %vm1826_vm7, %v1762_v9, %v1890_v49  ;;  %v1755_v37 = vadd.f32 %v4567_v6, %v1684_v3  ;;  %v3397_v47 = vunpack.i.l.bf16 %v3396_v26 }
 0x1b7   :  { %vm1820_vm8 = vcmp.ge.f32.partialorder %v1756_v50, 0.0  ;;  %v1884_v62 = vmul.f32 0.2, %v1756_v50  ;;  %v2688_v54 = vpack.c.bf16 %v1954_v60, %v1953_v17  ;;  %v1694_v15 = vadd.f32 %v1630_v1, %v5075_v18 }
 0x1b8   :  { %v1695_v32 = vadd.f32 %v1631_v10, %v5076_v8  ;;  %v1625_v55 = vmul.f32 %v3398_v20, %v5051_v22  ;;  %vm1819_vm9 = vcmp.ge.f32.partialorder %v1755_v37, 0.0  ;;  %v1883_v12 = vmul.f32 0.2, %v1755_v37 }
 0x1b9   :  { %v1948_v56 = vsel %vm1820_vm8, %v1756_v50, %v1884_v62  ;;  %2759 = vst [vmem:[%s4867_s3 + $0xe8] sm:$0xff] %v2688_v54   ;;  %v1765_v30 = vadd.f32 %v4567_v6, %v1694_v15  ;;  %v3408_v33 = vunpack.i.h.bf16 %v3406_v58  ;;  %v1624_v53 = vmul.f32 %v3397_v47, %v5051_v22 }
 0x1ba   :  { %v1766_v13 = vadd.f32 %v4567_v6, %v1695_v32  ;;  %v1689_v0 = vadd.f32 %v1625_v55, %v5077_v5  ;;  %v1947_v44 = vsel %vm1819_vm9, %v1755_v37, %v1883_v12  ;;  %v3407_v24 = vunpack.i.l.bf16 %v3406_v58 }
 0x1bb   :  { %v2673_v25 = vpack.c.bf16 %v1948_v56, %v1947_v44  ;;  %vm1829_vm10 = vcmp.ge.f32.partialorder %v1765_v30, 0.0  ;;  %v1893_v63 = vmul.f32 0.2, %v1765_v30  ;;  %v1688_v19 = vadd.f32 %v1624_v53, %v5078_v46 }
 0x1bc   :  { %vm1830_vm11 = vcmp.ge.f32.partialorder %v1766_v13, 0.0  ;;  %v1894_v43 = vmul.f32 0.2, %v1766_v13  ;;  %v1760_v40 = vadd.f32 %v3414_v16, %v1689_v0  ;;  %v1629_v6 = vmul.f32 %v3408_v33, %v5051_v22 }
 0x1bd   :  { %2756 = vst [vmem:[%s4867_s3 + $0xd0] sm:$0xff] %v2673_v25   ;;  %v1957_v35 = vsel %vm1829_vm10, %v1765_v30, %v1893_v63  ;;  %v1628_v28 = vmul.f32 %v3407_v24, %v5051_v22  ;;  %v1759_v14 = vadd.f32 %v3414_v16, %v1688_v19 }
 0x1be   :  { %v1958_v61 = vsel %vm1830_vm11, %v1766_v13, %v1894_v43  ;;  %vm1824_vm12 = vcmp.ge.f32.partialorder %v1760_v40, 0.0  ;;  %v1888_v45 = vmul.f32 0.2, %v1760_v40  ;;  %v1693_v11 = vadd.f32 %v1629_v6, %v5080_v36 }
 0x1bf   :  { %v2698_v59 = vpack.c.bf16 %v1958_v61, %v1957_v35  ;;  %v1692_v31 = vadd.f32 %v1628_v28, %v5079_v57  ;;  %vm1823_vm13 = vcmp.ge.f32.partialorder %v1759_v14, 0.0  ;;  %v1887_v34 = vmul.f32 0.2, %v1759_v14 }
 0x1c0   :  { %v1952_v29 = vsel %vm1824_vm12, %v1760_v40, %v1888_v45  ;;  %v1764_v26 = vadd.f32 %v3414_v16, %v1693_v11 }
 0x1c1   :  { %2761 = vst [vmem:[%s4867_s3 + $0xf8] sm:$0xff] %v2698_v59   ;;  %v1763_v38 = vadd.f32 %v3414_v16, %v1692_v31  ;;  %v1951_v51 = vsel %vm1823_vm13, %v1759_v14, %v1887_v34 }
 0x1c2   :  { %v2683_v22 = vpack.c.bf16 %v1952_v29, %v1951_v51  ;;  %vm1828_vm15 = vcmp.ge.f32.partialorder %v1764_v26, 0.0  ;;  %v1892_v9 = vmul.f32 0.2, %v1764_v26 }
 0x1c3   :  { %vm1827_vm14 = vcmp.ge.f32.partialorder %v1763_v38, 0.0  ;;  %v1891_v21 = vmul.f32 0.2, %v1763_v38 }
 0x1c4   :  { %2758 = vst [vmem:[%s4867_s3 + $0xe0] sm:$0xff] %v2683_v22   ;;  %v1956_v27 = vsel %vm1828_vm15, %v1764_v26, %v1892_v9 }
 0x1c5   :  { %v1955_v23 = vsel %vm1827_vm14, %v1763_v38, %v1891_v21 }
 0x1c6   :  { %v2693_v41 = vpack.c.bf16 %v1956_v27, %v1955_v23 }
 0x1c8   :  { %2760 = vst [vmem:[%s4867_s3 + $0xf0] sm:$0xff] %v2693_v41  }

// kernel: _lambda_.6
= control target key start
LH: loop header
LB: loop body
LE: loop exit
PB: predicated region body
PF: predicated region fallthrough
CT: control target
= control target key end

     0   :  { %s1111_s1 = inlined_call_operand.vmem [shape: bf16[256,128], index: 1, kind: input, shape index: {}]   ;;  %s1112_s0 = inlined_call_operand.vmem [shape: bf16[128,256], index: 0, kind: input, shape index: {}]   ;;  %s1113_s2 = inlined_call_operand.vmem [shape: f32[1,128], index: 2, kind: input, shape index: {}]   ;;  %s1114_s3 = inlined_call_operand.vmem [shape: f32[1,128], index: 3, kind: input, shape index: {}]   ;;  %s1115_s4 = inlined_call_operand.vmem [shape: bf16[128,128], index: 4, kind: output, shape index: {}]  }
   0x1   :  { %v806_v0 = vld [vmem:[%s1111_s1 + $0x40] sm:$0xff]   ;;  %v808_v2 = vld [vmem:[%s1111_s1 + $0x48] sm:$0xff]   ;;  %v810_v4 = vld [vmem:[%s1111_s1 + $0x50] sm:$0xff]  }
   0x2   :  { %v807_v1 = vld [vmem:[%s1111_s1] sm:$0xff]   ;;  %726 = vmatprep.subr.bf16.mxu0 %v806_v0  ;;  %790 = vmatprep.subr.bf16.mxu1 %v806_v0  ;;  %v809_v3 = vld [vmem:[%s1111_s1 + $0x8] sm:$0xff]   ;;  %v811_v5 = vld [vmem:[%s1111_s1 + $0x10] sm:$0xff]  }
   0x3   :  { %727 = vmatpush3.bf16.msra.mxu0 %v807_v1  ;;  %798 = vmatpush3.bf16.msra.mxu1 %v807_v1  ;;  %v812_v6 = vld [vmem:[%s1111_s1 + $0x58] sm:$0xff]   ;;  %v814_v8 = vld [vmem:[%s1111_s1 + $0x60] sm:$0xff]   ;;  %v816_v10 = vld [vmem:[%s1111_s1 + $0x68] sm:$0xff]  }
   0x4   :  { %728 = vmatprep.subr.bf16.mxu0 %v808_v2  ;;  %791 = vmatprep.subr.bf16.mxu1 %v808_v2  ;;  %v813_v7 = vld [vmem:[%s1111_s1 + $0x18] sm:$0xff]   ;;  %v815_v9 = vld [vmem:[%s1111_s1 + $0x20] sm:$0xff]   ;;  %v817_v12 = vld [vmem:[%s1111_s1 + $0x28] sm:$0xff]  }
   0x5   :  { %v824_v11 = vld [vmem:[%s1112_s0 + $0x4] ss:$8 sps:$4 sm:$0xff]   ;;  %v818_v14 = vld [vmem:[%s1111_s1 + $0x70] sm:$0xff]   ;;  %v820_v16 = vld [vmem:[%s1111_s1 + $0x78] sm:$0xff]  }
   0x6   :  { %v830_v13 = vld [vmem:[%s1112_s0 + $0x44] ss:$8 sps:$4 sm:$0xff]   ;;  %274 = vmatprep.mubr.bf16.mxu0 %v824_v11  ;;  %v819_v15 = vld [vmem:[%s1111_s1 + $0x30] sm:$0xff]   ;;  %v821_v17 = vld [vmem:[%s1111_s1 + $0x38] sm:$0xff]  }
   0x7   :  { %729 = vmatpush3.bf16.msra.mxu0 %v809_v3  ;;  %799 = vmatpush3.bf16.msra.mxu1 %v809_v3  ;;  %v822_v18 = vld [vmem:[%s1112_s0] ss:$8 sps:$4 sm:$0xff]   ;;  %v825_v20 = vld [vmem:[%s1112_s0 + $0x14] ss:$8 sps:$4 sm:$0xff]   ;;  %v827_v22 = vld [vmem:[%s1112_s0 + $0x10] ss:$8 sps:$4 sm:$0xff]  }
   0x8   :  { %730 = vmatprep.subr.bf16.mxu0 %v810_v4  ;;  %792 = vmatprep.subr.bf16.mxu1 %v810_v4  ;;  %v828_v19 = vld [vmem:[%s1112_s0 + $0x40] ss:$8 sps:$4 sm:$0xff]   ;;  %v834_v21 = vld [vmem:[%s1112_s0 + $0x54] ss:$8 sps:$4 sm:$0xff]   ;;  %v836_v23 = vld [vmem:[%s1112_s0 + $0x50] ss:$8 sps:$4 sm:$0xff]  }
   0x9   :  { %306 = vmatprep.mubr.bf16.mxu1 %v830_v13  ;;  %v831_v24 = vld [vmem:[%s1112_s0 + $0x24] ss:$8 sps:$4 sm:$0xff]   ;;  %v833_v26 = vld [vmem:[%s1112_s0 + $0x20] ss:$8 sps:$4 sm:$0xff]   ;;  %v837_v28 = vld [vmem:[%s1112_s0 + $0x34] ss:$8 sps:$4 sm:$0xff]  }
   0xa   :  { %v840_v25 = vld [vmem:[%s1112_s0 + $0x64] ss:$8 sps:$4 sm:$0xff]   ;;  %v842_v27 = vld [vmem:[%s1112_s0 + $0x60] ss:$8 sps:$4 sm:$0xff]   ;;  %v843_v29 = vld [vmem:[%s1112_s0 + $0x74] ss:$8 sps:$4 sm:$0xff]  }
   0xb   :  { %731 = vmatpush3.bf16.msra.mxu0 %v811_v5  ;;  %800 = vmatpush3.bf16.msra.mxu1 %v811_v5  ;;  %v839_v30 = vld [vmem:[%s1112_s0 + $0x30] ss:$8 sps:$4 sm:$0xff]  }
   0xc   :  { %732 = vmatprep.subr.bf16.mxu0 %v812_v6  ;;  %793 = vmatprep.subr.bf16.mxu1 %v812_v6  ;;  %v845_v31 = vld [vmem:[%s1112_s0 + $0x70] ss:$8 sps:$4 sm:$0xff]  }
   0xf   :  { %733 = vmatpush3.bf16.msra.mxu0 %v813_v7  ;;  %801 = vmatpush3.bf16.msra.mxu1 %v813_v7 }
  0x10   :  { %734 = vmatprep.subr.bf16.mxu0 %v814_v8  ;;  %794 = vmatprep.subr.bf16.mxu1 %v814_v8 }
  0x13   :  { %735 = vmatpush3.bf16.msra.mxu0 %v815_v9  ;;  %802 = vmatpush3.bf16.msra.mxu1 %v815_v9 }
  0x14   :  { %736 = vmatprep.subr.bf16.mxu0 %v816_v10  ;;  %795 = vmatprep.subr.bf16.mxu1 %v816_v10 }
  0x17   :  { %737 = vmatpush3.bf16.msra.mxu0 %v817_v12  ;;  %803 = vmatpush3.bf16.msra.mxu1 %v817_v12 }
  0x18   :  { %738 = vmatprep.subr.bf16.mxu0 %v818_v14  ;;  %796 = vmatprep.subr.bf16.mxu1 %v818_v14 }
  0x1b   :  { %739 = vmatpush3.bf16.msra.mxu0 %v819_v15  ;;  %804 = vmatpush3.bf16.msra.mxu1 %v819_v15 }
  0x1c   :  { %740 = vmatprep.subr.bf16.mxu0 %v820_v16  ;;  %797 = vmatprep.subr.bf16.mxu1 %v820_v16 }
  0x1f   :  { %741 = vmatpush3.bf16.msra.mxu0 %v821_v17  ;;  %805 = vmatpush3.bf16.msra.mxu1 %v821_v17 }
  0x22   :  { %275 = vmatmul.mubr.bf16.vlgmr.msra.gmra.mrb[0].mxu0 %v822_v18  ;;  %307 = vmatmul.mubr.bf16.vlgmr.msra.gmra.mrb[0].mxu1 %v828_v19 }
  0x23   :  { %282 = vmatprep.mubr.bf16.mxu0 %v825_v20  ;;  %314 = vmatprep.mubr.bf16.mxu1 %v834_v21 }
  0x2a   :  { %283 = vmatmul.mubr.bf16.gmra.mrb[4].mxu0 %v827_v22  ;;  %315 = vmatmul.mubr.bf16.gmra.mrb[4].mxu1 %v836_v23 }
  0x2b   :  { %290 = vmatprep.mubr.bf16.mxu0 %v831_v24  ;;  %322 = vmatprep.mubr.bf16.mxu1 %v840_v25 }
  0x32   :  { %291 = vmatmul.mubr.bf16.gmra.mrb[8].mxu0 %v833_v26  ;;  %323 = vmatmul.mubr.bf16.gmra.mrb[8].mxu1 %v842_v27 }
  0x33   :  { %298 = vmatprep.mubr.bf16.mxu0 %v837_v28  ;;  %330 = vmatprep.mubr.bf16.mxu1 %v843_v29 }
  0x3a   :  { %299 = vmatmul.mubr.bf16.gmra.mrb[12].mxu0 %v839_v30  ;;  %331 = vmatmul.mubr.bf16.gmra.mrb[12].mxu1 %v845_v31 }
  0xf5   :  { %v742_v32 = vpop.f32.mrb[0].mxu0  ;;  %v766_v33 = vpop.f32.mrb[0].mxu1 }
  0xf6   :  { %v743_v34 = vpop.f32.mrb[1].mxu0  ;;  %v767_v35 = vpop.f32.mrb[1].mxu1 }
  0xf7   :  { %v969_v36 = vadd.f32 %v743_v34, %v742_v32  ;;  %v745_v37 = vpop.f32.mrb[2].mxu0  ;;  %v971_v38 = vadd.f32 %v767_v35, %v766_v33  ;;  %v769_v39 = vpop.f32.mrb[2].mxu1 }
  0xf8   :  { %v746_v40 = vpop.f32.mrb[3].mxu0  ;;  %v770_v41 = vpop.f32.mrb[3].mxu1 }
  0xf9   :  { %v973_v42 = vadd.f32 %v746_v40, %v745_v37  ;;  %v975_v43 = vadd.f32 %v770_v41, %v769_v39  ;;  %v361_v44 = vmul.f32 %v969_v36, %v969_v36  ;;  %v369_v39 = vmul.f32 %v971_v38, %v971_v38 }
  0xfb   :  { %v339_v45 = vadd.f32 %v973_v42, %v969_v36  ;;  %v362_v46 = vmul.f32 %v973_v42, %v973_v42 }
  0xfd   :  { %v377_v47 = vadd.f32 %v362_v46, %v361_v44  ;;  %v748_v48 = vpop.f32.mrb[4].mxu0  ;;  %v772_v49 = vpop.f32.mrb[4].mxu1  ;;  %v370_v44 = vmul.f32 %v975_v43, %v975_v43 }
  0xfe   :  { %v749_v50 = vpop.f32.mrb[5].mxu0  ;;  %v773_v51 = vpop.f32.mrb[5].mxu1 }
  0xff   :  { %v983_v52 = vadd.f32 %v749_v50, %v748_v48  ;;  %v751_v53 = vpop.f32.mrb[6].mxu0  ;;  %v985_v54 = vadd.f32 %v773_v51, %v772_v49  ;;  %v775_v55 = vpop.f32.mrb[6].mxu1 }
 0x100   :  { %v752_v56 = vpop.f32.mrb[7].mxu0  ;;  %v776_v57 = vpop.f32.mrb[7].mxu1 }
 0x101   :  { %v340_v58 = vadd.f32 %v983_v52, %v339_v45  ;;  %v363_v59 = vmul.f32 %v983_v52, %v983_v52  ;;  %v990_v60 = vadd.f32 %v752_v56, %v751_v53  ;;  %v992_v61 = vadd.f32 %v776_v57, %v775_v55 }
 0x103   :  { %v378_v62 = vadd.f32 %v377_v47, %v363_v59  ;;  %v341_v63 = vadd.f32 %v990_v60, %v340_v58  ;;  %v364_v0 = vmul.f32 %v990_v60, %v990_v60  ;;  %v371_v47 = vmul.f32 %v985_v54, %v985_v54 }
 0x104   :  { %v372_v50 = vmul.f32 %v992_v61, %v992_v61 }
 0x105   :  { %v379_v1 = vadd.f32 %v378_v62, %v364_v0  ;;  %v754_v2 = vpop.f32.mrb[8].mxu0  ;;  %v778_v3 = vpop.f32.mrb[8].mxu1 }
 0x106   :  { %v755_v4 = vpop.f32.mrb[9].mxu0  ;;  %v779_v5 = vpop.f32.mrb[9].mxu1 }
 0x107   :  { %v997_v6 = vadd.f32 %v755_v4, %v754_v2  ;;  %v757_v7 = vpop.f32.mrb[10].mxu0  ;;  %v999_v8 = vadd.f32 %v779_v5, %v778_v3  ;;  %v781_v9 = vpop.f32.mrb[10].mxu1 }
 0x108   :  { %v758_v10 = vpop.f32.mrb[11].mxu0  ;;  %v782_v11 = vpop.f32.mrb[11].mxu1 }
 0x109   :  { %v342_v12 = vadd.f32 %v997_v6, %v341_v63  ;;  %v365_v13 = vmul.f32 %v997_v6, %v997_v6  ;;  %v1004_v14 = vadd.f32 %v758_v10, %v757_v7  ;;  %v1006_v15 = vadd.f32 %v782_v11, %v781_v9 }
 0x10a   :  { %v373_v56 = vmul.f32 %v999_v8, %v999_v8 }
 0x10b   :  { %v380_v16 = vadd.f32 %v379_v1, %v365_v13  ;;  %v343_v17 = vadd.f32 %v1004_v14, %v342_v12  ;;  %v366_v18 = vmul.f32 %v1004_v14, %v1004_v14  ;;  %v374_v62 = vmul.f32 %v1006_v15, %v1006_v15 }
 0x10d   :  { %v381_v19 = vadd.f32 %v380_v16, %v366_v18  ;;  %v760_v20 = vpop.f32.mrb[12].mxu0  ;;  %v784_v21 = vpop.f32.mrb[12].mxu1 }
 0x10e   :  { %v761_v22 = vpop.f32.mrb[13].mxu0  ;;  %v785_v23 = vpop.f32.mrb[13].mxu1 }
 0x10f   :  { %v1011_v24 = vadd.f32 %v761_v22, %v760_v20  ;;  %v763_v25 = vpop.f32.mrb[14].mxu0  ;;  %v1013_v26 = vadd.f32 %v785_v23, %v784_v21  ;;  %v787_v27 = vpop.f32.mrb[14].mxu1 }
 0x110   :  { %v764_v28 = vpop.f32.mrb[15].mxu0  ;;  %v788_v29 = vpop.f32.mrb[15].mxu1 }
 0x111   :  { %v344_v30 = vadd.f32 %v1011_v24, %v343_v17  ;;  %v367_v31 = vmul.f32 %v1011_v24, %v1011_v24  ;;  %v1018_v32 = vadd.f32 %v764_v28, %v763_v25  ;;  %v1020_v33 = vadd.f32 %v788_v29, %v787_v27 }
 0x112   :  { %v375_v63 = vmul.f32 %v1013_v26, %v1013_v26 }
 0x113   :  { %v382_v34 = vadd.f32 %v381_v19, %v367_v31  ;;  %v345_v35 = vadd.f32 %v1018_v32, %v344_v30  ;;  %v368_v37 = vmul.f32 %v1018_v32, %v1018_v32  ;;  %v376_v4 = vmul.f32 %v1020_v33, %v1020_v33 }
 0x115   :  { %v346_v40 = vadd.f32 %v971_v38, %v345_v35  ;;  %v383_v41 = vadd.f32 %v382_v34, %v368_v37 }
 0x117   :  { %v347_v45 = vadd.f32 %v975_v43, %v346_v40  ;;  %v384_v46 = vadd.f32 %v383_v41, %v369_v39 }
 0x119   :  { %v385_v48 = vadd.f32 %v384_v46, %v370_v44  ;;  %v348_v49 = vadd.f32 %v985_v54, %v347_v45 }
 0x11b   :  { %v349_v51 = vadd.f32 %v992_v61, %v348_v49  ;;  %v386_v53 = vadd.f32 %v385_v48, %v371_v47 }
 0x11d   :  { %v350_v55 = vadd.f32 %v999_v8, %v349_v51  ;;  %v387_v57 = vadd.f32 %v386_v53, %v372_v50 }
 0x11f   :  { %v388_v58 = vadd.f32 %v387_v57, %v373_v56  ;;  %v351_v59 = vadd.f32 %v1006_v15, %v350_v55 }
 0x121   :  { %v389_v0 = vadd.f32 %v388_v58, %v374_v62  ;;  %v352_v1 = vadd.f32 %v1013_v26, %v351_v59 }
 0x123   :  { %v390_v2 = vadd.f32 %v389_v0, %v375_v63  ;;  %v353_v3 = vadd.f32 %v1020_v33, %v352_v1  ;;  %v646_v1 = vld [vmem:[%s1114_s3] ss:$0 sm:$0xff] }
 0x125   :  { %v354_v5 = vrot.slane %v353_v3, 4  ;;  %v391_v7 = vadd.f32 %v390_v2, %v376_v4 }
 0x127   :  { %v355_v9 = vadd.f32 %v354_v5, %v353_v3  ;;  %v392_v10 = vrot.slane %v391_v7, 4 }
 0x129   :  { %v356_v11 = vrot.slane %v355_v9, 2  ;;  %v393_v12 = vadd.f32 %v392_v10, %v391_v7 }
 0x12b   :  { %v357_v13 = vadd.f32 %v356_v11, %v355_v9  ;;  %v394_v16 = vrot.slane %v393_v12, 2 }
 0x12d   :  { %v358_v17 = vrot.slane %v357_v13, 1  ;;  %v395_v18 = vadd.f32 %v394_v16, %v393_v12 }
 0x12f   :  { %v359_v19 = vadd.f32 %v358_v17, %v357_v13  ;;  %v396_v20 = vrot.slane %v395_v18, 1 }
 0x131   :  { %v360_v21 = vmul.f32 0.0078125, %v359_v19  ;;  %v397_v22 = vadd.f32 %v396_v20, %v395_v18 }
 0x133   :  { %v398_v23 = vmul.f32 0.0078125, %v397_v22  ;;  %v399_v25 = vmul.f32 %v360_v21, %v360_v21  ;;  %v401_v27 = vsub.f32 %v969_v36, %v360_v21  ;;  %v402_v28 = vsub.f32 %v973_v42, %v360_v21 }
 0x134   :  { %v403_v29 = vsub.f32 %v983_v52, %v360_v21  ;;  %v404_v30 = vsub.f32 %v990_v60, %v360_v21  ;;  %v405_v31 = vsub.f32 %v997_v6, %v360_v21  ;;  %v406_v34 = vsub.f32 %v1004_v14, %v360_v21 }
 0x135   :  { %v400_v35 = vsub.f32 %v398_v23, %v399_v25  ;;  %v407_v37 = vsub.f32 %v1011_v24, %v360_v21  ;;  %v408_v39 = vsub.f32 %v1018_v32, %v360_v21  ;;  %v409_v40 = vsub.f32 %v971_v38, %v360_v21 }
 0x136   :  { %v410_v41 = vsub.f32 %v975_v43, %v360_v21  ;;  %v411_v36 = vsub.f32 %v985_v54, %v360_v21  ;;  %v412_v42 = vsub.f32 %v992_v61, %v360_v21  ;;  %v413_v52 = vsub.f32 %v999_v8, %v360_v21  ;;  %v645_v61 = vld [vmem:[%s1113_s2] ss:$0 sm:$0xff] }
 0x137   :  { %v414_v60 = vsub.f32 %v1006_v15, %v360_v21  ;;  %v415_v6 = vsub.f32 %v1013_v26, %v360_v21  ;;  %v416_v14 = vsub.f32 %v1020_v33, %v360_v21  ;;  %v417_v44 = vadd.f32 1e-05, %v400_v35 }
 0x139   :  { %846 = vrsqrt.f32 %v417_v44 }
 0x143   :  { %v847_v24 = vpop.eup %846 }
 0x144   :  { %v419_v32 = vmul.f32 %v847_v24, %v401_v27  ;;  %v420_v45 = vmul.f32 %v847_v24, %v402_v28  ;;  %v421_v38 = vmul.f32 %v847_v24, %v403_v29  ;;  %v422_v46 = vmul.f32 %v847_v24, %v404_v30 }
 0x145   :  { %v423_v43 = vmul.f32 %v847_v24, %v405_v31  ;;  %v424_v47 = vmul.f32 %v847_v24, %v406_v34  ;;  %v425_v54 = vmul.f32 %v847_v24, %v407_v37  ;;  %v426_v48 = vmul.f32 %v847_v24, %v408_v39 }
 0x146   :  { %v427_v8 = vmul.f32 %v847_v24, %v409_v40  ;;  %v428_v15 = vmul.f32 %v847_v24, %v410_v41  ;;  %v429_v26 = vmul.f32 %v847_v24, %v411_v36  ;;  %v430_v49 = vmul.f32 %v847_v24, %v412_v42 }
 0x147   :  { %v431_v33 = vmul.f32 %v847_v24, %v413_v52  ;;  %v432_v50 = vmul.f32 %v847_v24, %v414_v60  ;;  %v433_v51 = vmul.f32 %v847_v24, %v415_v6  ;;  %v434_v53 = vmul.f32 %v847_v24, %v416_v14 }
 0x148   :  { %v442_v55 = vmul.f32 %v645_v61, %v419_v32  ;;  %v443_v56 = vmul.f32 %v645_v61, %v420_v45  ;;  %v444_v57 = vmul.f32 %v645_v61, %v421_v38  ;;  %v445_v58 = vmul.f32 %v645_v61, %v422_v46 }
 0x149   :  { %v446_v59 = vmul.f32 %v645_v61, %v423_v43  ;;  %v447_v62 = vmul.f32 %v645_v61, %v424_v47  ;;  %v448_v63 = vmul.f32 %v645_v61, %v425_v54  ;;  %v449_v0 = vmul.f32 %v645_v61, %v426_v48 }
 0x14a   :  { %v450_v2 = vmul.f32 %v645_v61, %v427_v8  ;;  %v451_v3 = vmul.f32 %v645_v61, %v428_v15  ;;  %v452_v4 = vmul.f32 %v645_v61, %v429_v26  ;;  %v453_v5 = vmul.f32 %v645_v61, %v430_v49 }
 0x14b   :  { %v454_v7 = vmul.f32 %v645_v61, %v431_v33  ;;  %v455_v9 = vmul.f32 %v645_v61, %v432_v50  ;;  %v456_v10 = vmul.f32 %v645_v61, %v433_v51  ;;  %v457_v11 = vmul.f32 %v645_v61, %v434_v53 }
 0x14c   :  { %v465_v12 = vadd.f32 %v646_v1, %v442_v55  ;;  %v466_v13 = vadd.f32 %v646_v1, %v443_v56  ;;  %v467_v16 = vadd.f32 %v646_v1, %v444_v57  ;;  %v468_v17 = vadd.f32 %v646_v1, %v445_v58 }
 0x14d   :  { %v469_v18 = vadd.f32 %v646_v1, %v446_v59  ;;  %v470_v19 = vadd.f32 %v646_v1, %v447_v62  ;;  %v471_v20 = vadd.f32 %v646_v1, %v448_v63  ;;  %v472_v21 = vadd.f32 %v646_v1, %v449_v0 }
 0x14e   :  { %v473_v22 = vadd.f32 %v646_v1, %v450_v2  ;;  %v474_v23 = vadd.f32 %v646_v1, %v451_v3  ;;  %v475_v25 = vadd.f32 %v646_v1, %v452_v4  ;;  %v476_v27 = vadd.f32 %v646_v1, %v453_v5 }
 0x14f   :  { %v477_v28 = vadd.f32 %v646_v1, %v454_v7  ;;  %v478_v29 = vadd.f32 %v646_v1, %v455_v9  ;;  %v479_v30 = vadd.f32 %v646_v1, %v456_v10  ;;  %v480_v31 = vadd.f32 %v646_v1, %v457_v11 }
 0x150   :  { %vm481_vm0 = vcmp.ge.f32.partialorder %v465_v12, 0.0  ;;  %vm482_vm1 = vcmp.ge.f32.partialorder %v466_v13, 0.0  ;;  %vm483_vm2 = vcmp.ge.f32.partialorder %v467_v16, 0.0  ;;  %vm484_vm3 = vcmp.ge.f32.partialorder %v468_v17, 0.0 }
 0x151   :  { %vm485_vm4 = vcmp.ge.f32.partialorder %v469_v18, 0.0  ;;  %vm486_vm5 = vcmp.ge.f32.partialorder %v470_v19, 0.0  ;;  %vm487_vm6 = vcmp.ge.f32.partialorder %v471_v20, 0.0  ;;  %vm488_vm7 = vcmp.ge.f32.partialorder %v472_v21, 0.0 }
 0x152   :  { %vm489_vm8 = vcmp.ge.f32.partialorder %v473_v22, 0.0  ;;  %vm490_vm9 = vcmp.ge.f32.partialorder %v474_v23, 0.0  ;;  %vm491_vm10 = vcmp.ge.f32.partialorder %v475_v25, 0.0  ;;  %vm492_vm11 = vcmp.ge.f32.partialorder %v476_v27, 0.0 }
 0x153   :  { %vm493_vm12 = vcmp.ge.f32.partialorder %v477_v28, 0.0  ;;  %vm494_vm13 = vcmp.ge.f32.partialorder %v478_v29, 0.0  ;;  %vm495_vm14 = vcmp.ge.f32.partialorder %v479_v30, 0.0  ;;  %vm496_vm15 = vcmp.ge.f32.partialorder %v480_v31, 0.0 }
 0x154   :  { %v497_v34 = vmul.f32 0.2, %v465_v12  ;;  %v498_v35 = vmul.f32 0.2, %v466_v13  ;;  %v499_v37 = vmul.f32 0.2, %v467_v16 }
 0x155   :  { %v500_v39 = vmul.f32 0.2, %v468_v17  ;;  %v501_v40 = vmul.f32 0.2, %v469_v18  ;;  %v502_v41 = vmul.f32 0.2, %v470_v19 }
 0x156   :  { %v503_v36 = vmul.f32 0.2, %v471_v20  ;;  %v504_v42 = vmul.f32 0.2, %v472_v21  ;;  %v505_v52 = vmul.f32 0.2, %v473_v22  ;;  %v513_v60 = vsel %vm481_vm0, %v465_v12, %v497_v34 }
 0x157   :  { %v506_v6 = vmul.f32 0.2, %v474_v23  ;;  %v507_v14 = vmul.f32 0.2, %v475_v25  ;;  %v508_v44 = vmul.f32 0.2, %v476_v27  ;;  %v514_v24 = vsel %vm482_vm1, %v466_v13, %v498_v35 }
 0x158   :  { %v509_v32 = vmul.f32 0.2, %v477_v28  ;;  %v510_v45 = vmul.f32 0.2, %v478_v29  ;;  %v511_v38 = vmul.f32 0.2, %v479_v30  ;;  %v515_v46 = vsel %vm483_vm2, %v467_v16, %v499_v37 }
 0x159   :  { %v512_v43 = vmul.f32 0.2, %v480_v31  ;;  %v516_v47 = vsel %vm484_vm3, %v468_v17, %v500_v39  ;;  %v517_v54 = vsel %vm485_vm4, %v469_v18, %v501_v40  ;;  %v518_v48 = vsel %vm486_vm5, %v470_v19, %v502_v41 }
 0x15a   :  { %v519_v61 = vsel %vm487_vm6, %v471_v20, %v503_v36  ;;  %v520_v8 = vsel %vm488_vm7, %v472_v21, %v504_v42  ;;  %v521_v15 = vsel %vm489_vm8, %v473_v22, %v505_v52  ;;  %v522_v26 = vsel %vm490_vm9, %v474_v23, %v506_v6 }
 0x15b   :  { %v523_v49 = vsel %vm491_vm10, %v475_v25, %v507_v14  ;;  %v524_v33 = vsel %vm492_vm11, %v476_v27, %v508_v44  ;;  %v525_v50 = vsel %vm493_vm12, %v477_v28, %v509_v32  ;;  %v526_v51 = vsel %vm494_vm13, %v478_v29, %v510_v45 }
 0x15c   :  { %v527_v53 = vsel %vm495_vm14, %v479_v30, %v511_v38  ;;  %v528_v55 = vsel %vm496_vm15, %v480_v31, %v512_v43  ;;  %v682_v56 = vpack.c.bf16 %v514_v24, %v513_v60  ;;  %v687_v57 = vpack.c.bf16 %v516_v47, %v515_v46 }
 0x15d   :  { %v692_v58 = vpack.c.bf16 %v518_v48, %v517_v54  ;;  %v697_v59 = vpack.c.bf16 %v520_v8, %v519_v61  ;;  %v702_v62 = vpack.c.bf16 %v522_v26, %v521_v15  ;;  %v707_v63 = vpack.c.bf16 %v524_v33, %v523_v49 }
 0x15e   :  { %683 = vst [vmem:[%s1115_s4] sm:$0xff] %v682_v56   ;;  %719 = vst [vmem:[%s1115_s4 + $0x8] sm:$0xff] %v687_v57   ;;  %v712_v0 = vpack.c.bf16 %v526_v51, %v525_v50  ;;  %v717_v1 = vpack.c.bf16 %v528_v55, %v527_v53 }
 0x15f   :  { %720 = vst [vmem:[%s1115_s4 + $0x10] sm:$0xff] %v692_v58   ;;  %721 = vst [vmem:[%s1115_s4 + $0x18] sm:$0xff] %v697_v59  }
 0x160   :  { %722 = vst [vmem:[%s1115_s4 + $0x20] sm:$0xff] %v702_v62   ;;  %723 = vst [vmem:[%s1115_s4 + $0x28] sm:$0xff] %v707_v63  }
 0x161   :  { %724 = vst [vmem:[%s1115_s4 + $0x30] sm:$0xff] %v712_v0   ;;  %725 = vst [vmem:[%s1115_s4 + $0x38] sm:$0xff] %v717_v1  }

// kernel: _lambda_.7
= control target key start
LH: loop header
LB: loop body
LE: loop exit
PB: predicated region body
PF: predicated region fallthrough
CT: control target
= control target key end

     0   :  { %s834_s1 = inlined_call_operand.vmem [shape: bf16[512,128], index: 1, kind: input, shape index: {}]   ;;  %s835_s0 = inlined_call_operand.vmem [shape: bf16[32,512], index: 0, kind: input, shape index: {}]   ;;  %s836_s2 = inlined_call_operand.vmem [shape: f32[1,128], index: 2, kind: input, shape index: {}]   ;;  %s837_s3 = inlined_call_operand.vmem [shape: f32[1,128], index: 3, kind: input, shape index: {}]   ;;  %s838_s4 = inlined_call_operand.vmem [shape: bf16[32,128], index: 4, kind: output, shape index: {}]  }
   0x1   :  { %v631_v0 = vld [vmem:[%s834_s1 + $0x40] sm:$0xff]   ;;  %v635_v4 = vld [vmem:[%s834_s1 + $0x48] sm:$0xff]   ;;  %v639_v8 = vld [vmem:[%s834_s1 + $0x50] sm:$0xff]  }
   0x2   :  { %v632_v1 = vld [vmem:[%s834_s1 + $0xc0] sm:$0xff]   ;;  %575 = vmatprep.subr.bf16.mxu0 %v631_v0  ;;  %v636_v5 = vld [vmem:[%s834_s1 + $0xc8] sm:$0xff]   ;;  %v640_v9 = vld [vmem:[%s834_s1 + $0xd0] sm:$0xff]  }
   0x3   :  { %v633_v2 = vld [vmem:[%s834_s1] sm:$0xff]   ;;  %603 = vmatprep.subr.bf16.mxu1 %v632_v1  ;;  %v637_v6 = vld [vmem:[%s834_s1 + $0x8] sm:$0xff]   ;;  %v641_v10 = vld [vmem:[%s834_s1 + $0x10] sm:$0xff]  }
   0x4   :  { %v634_v3 = vld [vmem:[%s834_s1 + $0x80] sm:$0xff]   ;;  %576 = vmatpush3.bf16.msra.mxu0 %v633_v2  ;;  %v638_v7 = vld [vmem:[%s834_s1 + $0x88] sm:$0xff]   ;;  %v642_v11 = vld [vmem:[%s834_s1 + $0x90] sm:$0xff]  }
   0x5   :  { %604 = vmatpush3.bf16.msra.mxu1 %v634_v3  ;;  %577 = vmatprep.subr.bf16.mxu0 %v635_v4  ;;  %v643_v12 = vld [vmem:[%s834_s1 + $0x58] sm:$0xff]   ;;  %v647_v16 = vld [vmem:[%s834_s1 + $0x60] sm:$0xff]   ;;  %v651_v20 = vld [vmem:[%s834_s1 + $0x68] sm:$0xff]  }
   0x6   :  { %605 = vmatprep.subr.bf16.mxu1 %v636_v5  ;;  %v644_v13 = vld [vmem:[%s834_s1 + $0xd8] sm:$0xff]   ;;  %v648_v17 = vld [vmem:[%s834_s1 + $0xe0] sm:$0xff]   ;;  %v652_v21 = vld [vmem:[%s834_s1 + $0xe8] sm:$0xff]  }
   0x7   :  { %v645_v14 = vld [vmem:[%s834_s1 + $0x18] sm:$0xff]   ;;  %v649_v18 = vld [vmem:[%s834_s1 + $0x20] sm:$0xff]   ;;  %v653_v22 = vld [vmem:[%s834_s1 + $0x28] sm:$0xff]  }
   0x8   :  { %578 = vmatpush3.bf16.msra.mxu0 %v637_v6  ;;  %v646_v15 = vld [vmem:[%s834_s1 + $0x98] sm:$0xff]   ;;  %v650_v19 = vld [vmem:[%s834_s1 + $0xa0] sm:$0xff]   ;;  %v654_v23 = vld [vmem:[%s834_s1 + $0xa8] sm:$0xff]  }
   0x9   :  { %606 = vmatpush3.bf16.msra.mxu1 %v638_v7  ;;  %579 = vmatprep.subr.bf16.mxu0 %v639_v8  ;;  %v655_v24 = vld [vmem:[%s834_s1 + $0x70] sm:$0xff]   ;;  %v659_v28 = vld [vmem:[%s834_s1 + $0x78] sm:$0xff]  }
   0xa   :  { %607 = vmatprep.subr.bf16.mxu1 %v640_v9  ;;  %v656_v25 = vld [vmem:[%s834_s1 + $0xf0] sm:$0xff]   ;;  %v660_v29 = vld [vmem:[%s834_s1 + $0xf8] sm:$0xff]  }
   0xb   :  { %v657_v26 = vld [vmem:[%s834_s1 + $0x30] sm:$0xff]   ;;  %v661_v30 = vld [vmem:[%s834_s1 + $0x38] sm:$0xff]  }
   0xc   :  { %580 = vmatpush3.bf16.msra.mxu0 %v641_v10  ;;  %v658_v27 = vld [vmem:[%s834_s1 + $0xb0] sm:$0xff]   ;;  %v662_v31 = vld [vmem:[%s834_s1 + $0xb8] sm:$0xff]  }
   0xd   :  { %608 = vmatpush3.bf16.msra.mxu1 %v642_v11  ;;  %581 = vmatprep.subr.bf16.mxu0 %v643_v12  ;;  %v663_v32 = vld [vmem:[%s835_s0] ss:$16 sps:$4 sm:$0xff]   ;;  %v665_v33 = vld [vmem:[%s835_s0 + $0x4] ss:$16 sps:$4 sm:$0xff]   ;;  %v666_v34 = vld [vmem:[%s835_s0 + $0x8] ss:$16 sps:$4 sm:$0xff]  }
   0xe   :  { %609 = vmatprep.subr.bf16.mxu1 %v644_v13  ;;  %v668_v35 = vld [vmem:[%s835_s0 + $0xc] ss:$16 sps:$4 sm:$0xff]   ;;  %354 = vmatprep.mubr.bf16.mxu0 %v665_v33  ;;  %v669_v36 = vld [vmem:[%s835_s0 + $0x24] ss:$16 sps:$4 sm:$0xff]   ;;  %v673_v38 = vld [vmem:[%s835_s0 + $0x20] ss:$16 sps:$4 sm:$0xff]  }
   0xf   :  { %403 = vmatprep.mubr.bf16.mxu1 %v668_v35  ;;  %v671_v37 = vld [vmem:[%s835_s0 + $0x2c] ss:$16 sps:$4 sm:$0xff]   ;;  %v674_v39 = vld [vmem:[%s835_s0 + $0x28] ss:$16 sps:$4 sm:$0xff]  }
  0x10   :  { %582 = vmatpush3.bf16.msra.mxu0 %v645_v14 }
  0x11   :  { %610 = vmatpush3.bf16.msra.mxu1 %v646_v15  ;;  %583 = vmatprep.subr.bf16.mxu0 %v647_v16 }
  0x12   :  { %611 = vmatprep.subr.bf16.mxu1 %v648_v17 }
  0x14   :  { %584 = vmatpush3.bf16.msra.mxu0 %v649_v18 }
  0x15   :  { %612 = vmatpush3.bf16.msra.mxu1 %v650_v19  ;;  %585 = vmatprep.subr.bf16.mxu0 %v651_v20 }
  0x16   :  { %613 = vmatprep.subr.bf16.mxu1 %v652_v21 }
  0x18   :  { %586 = vmatpush3.bf16.msra.mxu0 %v653_v22 }
  0x19   :  { %614 = vmatpush3.bf16.msra.mxu1 %v654_v23  ;;  %587 = vmatprep.subr.bf16.mxu0 %v655_v24 }
  0x1a   :  { %615 = vmatprep.subr.bf16.mxu1 %v656_v25 }
  0x1c   :  { %588 = vmatpush3.bf16.msra.mxu0 %v657_v26 }
  0x1d   :  { %616 = vmatpush3.bf16.msra.mxu1 %v658_v27  ;;  %589 = vmatprep.subr.bf16.mxu0 %v659_v28 }
  0x1e   :  { %617 = vmatprep.subr.bf16.mxu1 %v660_v29 }
  0x20   :  { %590 = vmatpush3.bf16.msra.mxu0 %v661_v30 }
  0x21   :  { %618 = vmatpush3.bf16.msra.mxu1 %v662_v31 }
  0x23   :  { %355 = vmatmul.mubr.bf16.vlgmr.msra.gmra.mrb[0].mxu0 %v663_v32 }
  0x24   :  { %404 = vmatmul.mubr.bf16.vlgmr.msra.gmra.mrb[0].mxu1 %v666_v34  ;;  %362 = vmatprep.mubr.bf16.mxu0 %v669_v36  ;;  %v554_v36 = vld [vmem:[%s836_s2] ss:$0 sm:$0xff] }
  0x25   :  { %411 = vmatprep.mubr.bf16.mxu1 %v671_v37 }
  0x2b   :  { %363 = vmatmul.mubr.bf16.gmra.mrb[4].mxu0 %v673_v38 }
  0x2c   :  { %412 = vmatmul.mubr.bf16.gmra.mrb[4].mxu1 %v674_v39 }
  0xf6   :  { %v591_v40 = vpop.f32.mrb[0].mxu0 }
  0xf7   :  { %v619_v41 = vpop.f32.mrb[0].mxu1  ;;  %v592_v42 = vpop.f32.mrb[1].mxu0 }
  0xf8   :  { %v593_v43 = vadd.f32 %v592_v42, %v591_v40  ;;  %v620_v44 = vpop.f32.mrb[1].mxu1  ;;  %v594_v45 = vpop.f32.mrb[2].mxu0 }
  0xf9   :  { %v621_v46 = vadd.f32 %v620_v44, %v619_v41  ;;  %v622_v47 = vpop.f32.mrb[2].mxu1  ;;  %v595_v48 = vpop.f32.mrb[3].mxu0  ;;  %v555_v41 = vld [vmem:[%s837_s3] ss:$0 sm:$0xff] }
  0xfa   :  { %v596_v49 = vadd.f32 %v595_v48, %v594_v45  ;;  %v623_v50 = vpop.f32.mrb[3].mxu1 }
  0xfb   :  { %v406_v51 = vadd.f32 %v621_v46, %v593_v43  ;;  %v624_v52 = vadd.f32 %v623_v50, %v622_v47 }
  0xfd   :  { %v409_v53 = vadd.f32 %v624_v52, %v596_v49  ;;  %v430_v55 = vmul.f32 %v406_v51, %v406_v51 }
  0xfe   :  { %v597_v54 = vpop.f32.mrb[4].mxu0 }
  0xff   :  { %v420_v56 = vadd.f32 %v409_v53, %v406_v51  ;;  %v431_v57 = vmul.f32 %v409_v53, %v409_v53  ;;  %v625_v58 = vpop.f32.mrb[4].mxu1  ;;  %v598_v59 = vpop.f32.mrb[5].mxu0 }
 0x100   :  { %v599_v60 = vadd.f32 %v598_v59, %v597_v54  ;;  %v626_v61 = vpop.f32.mrb[5].mxu1  ;;  %v600_v62 = vpop.f32.mrb[6].mxu0 }
 0x101   :  { %v434_v63 = vadd.f32 %v431_v57, %v430_v55  ;;  %v627_v0 = vadd.f32 %v626_v61, %v625_v58  ;;  %v628_v1 = vpop.f32.mrb[6].mxu1  ;;  %v601_v2 = vpop.f32.mrb[7].mxu0 }
 0x102   :  { %v602_v3 = vadd.f32 %v601_v2, %v600_v62  ;;  %v629_v4 = vpop.f32.mrb[7].mxu1 }
 0x103   :  { %v414_v5 = vadd.f32 %v627_v0, %v599_v60  ;;  %v630_v6 = vadd.f32 %v629_v4, %v628_v1 }
 0x105   :  { %v421_v7 = vadd.f32 %v420_v56, %v414_v5  ;;  %v432_v8 = vmul.f32 %v414_v5, %v414_v5  ;;  %v417_v9 = vadd.f32 %v630_v6, %v602_v3 }
 0x107   :  { %v435_v10 = vadd.f32 %v434_v63, %v432_v8  ;;  %v422_v11 = vadd.f32 %v421_v7, %v417_v9  ;;  %v433_v12 = vmul.f32 %v417_v9, %v417_v9 }
 0x109   :  { %v423_v13 = vrot.slane %v422_v11, 4  ;;  %v436_v14 = vadd.f32 %v435_v10, %v433_v12 }
 0x10b   :  { %v424_v15 = vadd.f32 %v423_v13, %v422_v11  ;;  %v437_v16 = vrot.slane %v436_v14, 4 }
 0x10d   :  { %v425_v17 = vrot.slane %v424_v15, 2  ;;  %v438_v18 = vadd.f32 %v437_v16, %v436_v14 }
 0x10f   :  { %v426_v19 = vadd.f32 %v425_v17, %v424_v15  ;;  %v439_v20 = vrot.slane %v438_v18, 2 }
 0x111   :  { %v427_v21 = vrot.slane %v426_v19, 1  ;;  %v440_v22 = vadd.f32 %v439_v20, %v438_v18 }
 0x113   :  { %v428_v23 = vadd.f32 %v427_v21, %v426_v19  ;;  %v441_v24 = vrot.slane %v440_v22, 1 }
 0x115   :  { %v429_v25 = vmul.f32 0.03125, %v428_v23  ;;  %v442_v26 = vadd.f32 %v441_v24, %v440_v22 }
 0x117   :  { %v443_v27 = vmul.f32 0.03125, %v442_v26  ;;  %v444_v28 = vmul.f32 %v429_v25, %v429_v25  ;;  %v446_v29 = vsub.f32 %v406_v51, %v429_v25  ;;  %v447_v30 = vsub.f32 %v409_v53, %v429_v25 }
 0x118   :  { %v448_v31 = vsub.f32 %v414_v5, %v429_v25  ;;  %v449_v32 = vsub.f32 %v417_v9, %v429_v25 }
 0x119   :  { %v445_v33 = vsub.f32 %v443_v27, %v444_v28 }
 0x11b   :  { %v450_v34 = vadd.f32 1e-05, %v445_v33 }
 0x11d   :  { %675 = vrsqrt.f32 %v450_v34 }
 0x127   :  { %v676_v35 = vpop.eup %675 }
 0x128   :  { %v452_v37 = vmul.f32 %v676_v35, %v446_v29  ;;  %v453_v38 = vmul.f32 %v676_v35, %v447_v30  ;;  %v454_v39 = vmul.f32 %v676_v35, %v448_v31  ;;  %v455_v40 = vmul.f32 %v676_v35, %v449_v32 }
 0x12a   :  { %v463_v42 = vmul.f32 %v554_v36, %v452_v37  ;;  %v464_v43 = vmul.f32 %v554_v36, %v453_v38  ;;  %v465_v44 = vmul.f32 %v554_v36, %v454_v39  ;;  %v466_v45 = vmul.f32 %v554_v36, %v455_v40 }
 0x12c   :  { %v474_v46 = vadd.f32 %v555_v41, %v463_v42  ;;  %v475_v47 = vadd.f32 %v555_v41, %v464_v43  ;;  %v476_v48 = vadd.f32 %v555_v41, %v465_v44  ;;  %v477_v49 = vadd.f32 %v555_v41, %v466_v45 }
 0x12e   :  { %vm478_vm0 = vcmp.ge.f32.partialorder %v474_v46, 0.0  ;;  %vm479_vm1 = vcmp.ge.f32.partialorder %v475_v47, 0.0  ;;  %vm480_vm2 = vcmp.ge.f32.partialorder %v476_v48, 0.0  ;;  %vm481_vm3 = vcmp.ge.f32.partialorder %v477_v49, 0.0 }
 0x12f   :  { %v482_v50 = vmul.f32 0.2, %v474_v46  ;;  %v483_v51 = vmul.f32 0.2, %v475_v47  ;;  %v484_v52 = vmul.f32 0.2, %v476_v48 }
 0x130   :  { %v485_v53 = vmul.f32 0.2, %v477_v49 }
 0x131   :  { %v486_v54 = vsel %vm478_vm0, %v474_v46, %v482_v50  ;;  %v487_v55 = vsel %vm479_vm1, %v475_v47, %v483_v51  ;;  %v488_v56 = vsel %vm480_vm2, %v476_v48, %v484_v52 }
 0x132   :  { %v489_v57 = vsel %vm481_vm3, %v477_v49, %v485_v53  ;;  %v567_v58 = vpack.c.bf16 %v487_v55, %v486_v54 }
 0x133   :  { %v572_v59 = vpack.c.bf16 %v489_v57, %v488_v56 }
 0x134   :  { %568 = vst [vmem:[%s838_s4] sm:$0xff] %v567_v58  }
 0x135   :  { %574 = vst [vmem:[%s838_s4 + $0x8] sm:$0xff] %v572_v59  }

// kernel: _lambda_.8
= control target key start
LH: loop header
LB: loop body
LE: loop exit
PB: predicated region body
PF: predicated region fallthrough
CT: control target
= control target key end

     0   :  { %s1242_s1 = inlined_call_operand.vmem [shape: bf16[1024,128], index: 1, kind: input, shape index: {}]   ;;  %s1243_s0 = inlined_call_operand.vmem [shape: bf16[8,1024], index: 0, kind: input, shape index: {}]   ;;  %s1244_s2 = inlined_call_operand.vmem [shape: f32[1,128], index: 2, kind: input, shape index: {}]   ;;  %s1245_s3 = inlined_call_operand.vmem [shape: f32[1,128], index: 3, kind: input, shape index: {}]   ;;  %s1246_s4 = inlined_call_operand.vmem [shape: bf16[8,128], index: 4, kind: output, shape index: {}]  }
   0x1   :  { %v930_v0 = vld [vmem:[%s1242_s1 + $0x40] sm:$0xff]   ;;  %v934_v4 = vld [vmem:[%s1242_s1 + $0x48] sm:$0xff]   ;;  %v938_v8 = vld [vmem:[%s1242_s1 + $0x50] sm:$0xff]  }
   0x2   :  { %v931_v1 = vld [vmem:[%s1242_s1 + $0xc0] sm:$0xff]   ;;  %842 = vmatprep.subr.bf16.mxu0 %v930_v0  ;;  %v935_v5 = vld [vmem:[%s1242_s1 + $0xc8] sm:$0xff]   ;;  %v939_v9 = vld [vmem:[%s1242_s1 + $0xd0] sm:$0xff]  }
   0x3   :  { %v932_v2 = vld [vmem:[%s1242_s1] sm:$0xff]   ;;  %864 = vmatprep.subr.bf16.mxu1 %v931_v1  ;;  %v936_v6 = vld [vmem:[%s1242_s1 + $0x8] sm:$0xff]   ;;  %v940_v10 = vld [vmem:[%s1242_s1 + $0x10] sm:$0xff]  }
   0x4   :  { %v933_v3 = vld [vmem:[%s1242_s1 + $0x80] sm:$0xff]   ;;  %843 = vmatpush3.bf16.msra.mxu0 %v932_v2  ;;  %v937_v7 = vld [vmem:[%s1242_s1 + $0x88] sm:$0xff]   ;;  %v941_v11 = vld [vmem:[%s1242_s1 + $0x90] sm:$0xff]  }
   0x5   :  { %865 = vmatpush3.bf16.msra.mxu1 %v933_v3  ;;  %844 = vmatprep.subr.bf16.mxu0 %v934_v4  ;;  %v942_v12 = vld [vmem:[%s1242_s1 + $0x58] sm:$0xff]   ;;  %v946_v16 = vld [vmem:[%s1242_s1 + $0x60] sm:$0xff]   ;;  %v950_v20 = vld [vmem:[%s1242_s1 + $0x68] sm:$0xff]  }
   0x6   :  { %866 = vmatprep.subr.bf16.mxu1 %v935_v5  ;;  %v943_v13 = vld [vmem:[%s1242_s1 + $0xd8] sm:$0xff]   ;;  %v947_v17 = vld [vmem:[%s1242_s1 + $0xe0] sm:$0xff]   ;;  %v951_v21 = vld [vmem:[%s1242_s1 + $0xe8] sm:$0xff]  }
   0x7   :  { %v944_v14 = vld [vmem:[%s1242_s1 + $0x18] sm:$0xff]   ;;  %v948_v18 = vld [vmem:[%s1242_s1 + $0x20] sm:$0xff]   ;;  %v952_v22 = vld [vmem:[%s1242_s1 + $0x28] sm:$0xff]  }
   0x8   :  { %845 = vmatpush3.bf16.msra.mxu0 %v936_v6  ;;  %v945_v15 = vld [vmem:[%s1242_s1 + $0x98] sm:$0xff]   ;;  %v949_v19 = vld [vmem:[%s1242_s1 + $0xa0] sm:$0xff]   ;;  %v953_v23 = vld [vmem:[%s1242_s1 + $0xa8] sm:$0xff]  }
   0x9   :  { %867 = vmatpush3.bf16.msra.mxu1 %v937_v7  ;;  %846 = vmatprep.subr.bf16.mxu0 %v938_v8  ;;  %v954_v24 = vld [vmem:[%s1242_s1 + $0x70] sm:$0xff]   ;;  %v958_v28 = vld [vmem:[%s1242_s1 + $0x78] sm:$0xff]   ;;  %v18_v32 = vld [vmem:[%s1243_s0] sm:$0xff] }
   0xa   :  { %868 = vmatprep.subr.bf16.mxu1 %v939_v9  ;;  %v955_v25 = vld [vmem:[%s1242_s1 + $0xf0] sm:$0xff]   ;;  %v959_v29 = vld [vmem:[%s1242_s1 + $0xf8] sm:$0xff]   ;;  %v19_v33 = vld [vmem:[%s1243_s0 + $0x8] sm:$0xff]  ;;  %v768_v34 = vcombine.low %v18_v32, %v18_v32  ;;  %v769_v35 = vcombine.high %v18_v32, %v18_v32 }
   0xb   :  { %v956_v26 = vld [vmem:[%s1242_s1 + $0x30] sm:$0xff]   ;;  %v960_v30 = vld [vmem:[%s1242_s1 + $0x38] sm:$0xff]   ;;  %v770_v36 = vcombine.low %v19_v33, %v19_v33  ;;  %v771_v37 = vcombine.high %v19_v33, %v19_v33  ;;  %v966_v38 = vld [vmem:[%s1242_s1 + $0x140] sm:$0xff]  }
   0xc   :  { %847 = vmatpush3.bf16.msra.mxu0 %v940_v10  ;;  %v957_v27 = vld [vmem:[%s1242_s1 + $0xb0] sm:$0xff]   ;;  %v961_v31 = vld [vmem:[%s1242_s1 + $0xb8] sm:$0xff]   ;;  %v967_v39 = vld [vmem:[%s1242_s1 + $0x1c0] sm:$0xff]   ;;  %594 = vmatprep.mubr.bf16.mxu0 %v769_v35 }
   0xd   :  { %869 = vmatpush3.bf16.msra.mxu1 %v941_v11  ;;  %848 = vmatprep.subr.bf16.mxu0 %v942_v12  ;;  %v968_v40 = vld [vmem:[%s1242_s1 + $0x100] sm:$0xff]   ;;  %v970_v42 = vld [vmem:[%s1242_s1 + $0x148] sm:$0xff]   ;;  %v974_v46 = vld [vmem:[%s1242_s1 + $0x150] sm:$0xff]  }
   0xe   :  { %870 = vmatprep.subr.bf16.mxu1 %v943_v13  ;;  %634 = vmatprep.mubr.bf16.mxu1 %v771_v37  ;;  %v969_v41 = vld [vmem:[%s1242_s1 + $0x180] sm:$0xff]   ;;  %v971_v43 = vld [vmem:[%s1242_s1 + $0x1c8] sm:$0xff]   ;;  %v975_v47 = vld [vmem:[%s1242_s1 + $0x1d0] sm:$0xff]  }
   0xf   :  { %v972_v44 = vld [vmem:[%s1242_s1 + $0x108] sm:$0xff]   ;;  %v976_v48 = vld [vmem:[%s1242_s1 + $0x110] sm:$0xff]   ;;  %v978_v50 = vld [vmem:[%s1242_s1 + $0x158] sm:$0xff]  }
  0x10   :  { %849 = vmatpush3.bf16.msra.mxu0 %v944_v14  ;;  %v973_v45 = vld [vmem:[%s1242_s1 + $0x188] sm:$0xff]   ;;  %v977_v49 = vld [vmem:[%s1242_s1 + $0x190] sm:$0xff]   ;;  %v979_v51 = vld [vmem:[%s1242_s1 + $0x1d8] sm:$0xff]  }
  0x11   :  { %871 = vmatpush3.bf16.msra.mxu1 %v945_v15  ;;  %850 = vmatprep.subr.bf16.mxu0 %v946_v16  ;;  %v980_v52 = vld [vmem:[%s1242_s1 + $0x118] sm:$0xff]   ;;  %v982_v54 = vld [vmem:[%s1242_s1 + $0x160] sm:$0xff]   ;;  %v986_v58 = vld [vmem:[%s1242_s1 + $0x168] sm:$0xff]  }
  0x12   :  { %872 = vmatprep.subr.bf16.mxu1 %v947_v17  ;;  %v981_v53 = vld [vmem:[%s1242_s1 + $0x198] sm:$0xff]   ;;  %v983_v55 = vld [vmem:[%s1242_s1 + $0x1e0] sm:$0xff]   ;;  %v987_v59 = vld [vmem:[%s1242_s1 + $0x1e8] sm:$0xff]  }
  0x13   :  { %v984_v56 = vld [vmem:[%s1242_s1 + $0x120] sm:$0xff]   ;;  %v988_v60 = vld [vmem:[%s1242_s1 + $0x128] sm:$0xff]   ;;  %v990_v62 = vld [vmem:[%s1242_s1 + $0x170] sm:$0xff]  }
  0x14   :  { %851 = vmatpush3.bf16.msra.mxu0 %v948_v18  ;;  %v985_v57 = vld [vmem:[%s1242_s1 + $0x1a0] sm:$0xff]   ;;  %v989_v61 = vld [vmem:[%s1242_s1 + $0x1a8] sm:$0xff]   ;;  %v991_v63 = vld [vmem:[%s1242_s1 + $0x1f0] sm:$0xff]  }
  0x15   :  { %873 = vmatpush3.bf16.msra.mxu1 %v949_v19  ;;  %852 = vmatprep.subr.bf16.mxu0 %v950_v20  ;;  %v992_v0 = vld [vmem:[%s1242_s1 + $0x130] sm:$0xff]   ;;  %v994_v2 = vld [vmem:[%s1242_s1 + $0x178] sm:$0xff]  }
  0x16   :  { %874 = vmatprep.subr.bf16.mxu1 %v951_v21  ;;  %v993_v1 = vld [vmem:[%s1242_s1 + $0x1b0] sm:$0xff]   ;;  %v995_v3 = vld [vmem:[%s1242_s1 + $0x1f8] sm:$0xff]  }
  0x17   :  { %v996_v4 = vld [vmem:[%s1242_s1 + $0x138] sm:$0xff]   ;;  %v20_v6 = vld [vmem:[%s1243_s0 + $0x10] sm:$0xff] }
  0x18   :  { %853 = vmatpush3.bf16.msra.mxu0 %v952_v22  ;;  %v997_v5 = vld [vmem:[%s1242_s1 + $0x1b8] sm:$0xff]   ;;  %v772_v7 = vcombine.low %v20_v6, %v20_v6  ;;  %v773_v8 = vcombine.high %v20_v6, %v20_v6 }
  0x19   :  { %875 = vmatpush3.bf16.msra.mxu1 %v953_v23  ;;  %854 = vmatprep.subr.bf16.mxu0 %v954_v24  ;;  %v21_v9 = vld [vmem:[%s1243_s0 + $0x18] sm:$0xff] }
  0x1a   :  { %876 = vmatprep.subr.bf16.mxu1 %v955_v25  ;;  %v774_v10 = vcombine.low %v21_v9, %v21_v9  ;;  %v775_v11 = vcombine.high %v21_v9, %v21_v9 }
  0x1c   :  { %855 = vmatpush3.bf16.msra.mxu0 %v956_v26 }
  0x1d   :  { %877 = vmatpush3.bf16.msra.mxu1 %v957_v27  ;;  %856 = vmatprep.subr.bf16.mxu0 %v958_v28 }
  0x1e   :  { %878 = vmatprep.subr.bf16.mxu1 %v959_v29 }
  0x20   :  { %857 = vmatpush3.bf16.msra.mxu0 %v960_v30 }
  0x21   :  { %879 = vmatpush3.bf16.msra.mxu1 %v961_v31  ;;  %886 = vmatprep.subr.bf16.mxu0 %v966_v38 }
  0x22   :  { %908 = vmatprep.subr.bf16.mxu1 %v967_v39 }
  0x23   :  { %595 = vmatmul.mubr.bf16.vlgmr.msra.gmra.mrb[0].mxu0 %v768_v34 }
  0x24   :  { %635 = vmatmul.mubr.bf16.vlgmr.msra.gmra.mrb[0].mxu1 %v770_v36  ;;  %887 = vmatpush3.bf16.msra.mxu0 %v968_v40 }
  0x25   :  { %909 = vmatpush3.bf16.msra.mxu1 %v969_v41  ;;  %888 = vmatprep.subr.bf16.mxu0 %v970_v42 }
  0x26   :  { %910 = vmatprep.subr.bf16.mxu1 %v971_v43  ;;  %674 = vmatprep.mubr.bf16.mxu0 %v773_v8 }
  0x27   :  { %714 = vmatprep.mubr.bf16.mxu1 %v775_v11 }
  0x28   :  { %889 = vmatpush3.bf16.msra.mxu0 %v972_v44 }
  0x29   :  { %911 = vmatpush3.bf16.msra.mxu1 %v973_v45  ;;  %890 = vmatprep.subr.bf16.mxu0 %v974_v46 }
  0x2a   :  { %912 = vmatprep.subr.bf16.mxu1 %v975_v47 }
  0x2c   :  { %891 = vmatpush3.bf16.msra.mxu0 %v976_v48 }
  0x2d   :  { %913 = vmatpush3.bf16.msra.mxu1 %v977_v49  ;;  %892 = vmatprep.subr.bf16.mxu0 %v978_v50 }
  0x2e   :  { %914 = vmatprep.subr.bf16.mxu1 %v979_v51 }
  0x30   :  { %893 = vmatpush3.bf16.msra.mxu0 %v980_v52 }
  0x31   :  { %915 = vmatpush3.bf16.msra.mxu1 %v981_v53  ;;  %894 = vmatprep.subr.bf16.mxu0 %v982_v54 }
  0x32   :  { %916 = vmatprep.subr.bf16.mxu1 %v983_v55  ;;  %v840_v55 = vld [vmem:[%s1244_s2] ss:$0 sm:$0xff] }
  0x34   :  { %895 = vmatpush3.bf16.msra.mxu0 %v984_v56 }
  0x35   :  { %917 = vmatpush3.bf16.msra.mxu1 %v985_v57  ;;  %896 = vmatprep.subr.bf16.mxu0 %v986_v58  ;;  %v841_v57 = vld [vmem:[%s1245_s3] ss:$0 sm:$0xff] }
  0x36   :  { %918 = vmatprep.subr.bf16.mxu1 %v987_v59 }
  0x38   :  { %897 = vmatpush3.bf16.msra.mxu0 %v988_v60 }
  0x39   :  { %919 = vmatpush3.bf16.msra.mxu1 %v989_v61  ;;  %898 = vmatprep.subr.bf16.mxu0 %v990_v62 }
  0x3a   :  { %920 = vmatprep.subr.bf16.mxu1 %v991_v63 }
  0x3c   :  { %899 = vmatpush3.bf16.msra.mxu0 %v992_v0 }
  0x3d   :  { %921 = vmatpush3.bf16.msra.mxu1 %v993_v1  ;;  %900 = vmatprep.subr.bf16.mxu0 %v994_v2 }
  0x3e   :  { %922 = vmatprep.subr.bf16.mxu1 %v995_v3 }
  0x40   :  { %901 = vmatpush3.bf16.msra.mxu0 %v996_v4 }
  0x41   :  { %923 = vmatpush3.bf16.msra.mxu1 %v997_v5 }
  0x43   :  { %675 = vmatmul.mubr.bf16.vlgmr.msra.gmra.mrb[4].mxu0 %v772_v7 }
  0x44   :  { %715 = vmatmul.mubr.bf16.vlgmr.msra.gmra.mrb[4].mxu1 %v774_v10 }
  0xf6   :  { %v858_v12 = vpop.f32.mrb[0].mxu0 }
  0xf7   :  { %v880_v13 = vpop.f32.mrb[0].mxu1  ;;  %v859_v14 = vpop.f32.mrb[1].mxu0 }
  0xf8   :  { %v881_v15 = vpop.f32.mrb[1].mxu1  ;;  %v860_v16 = vadd.f32 %v859_v14, %v858_v12  ;;  %v861_v18 = vpop.f32.mrb[2].mxu0 }
  0xf9   :  { %v882_v17 = vadd.f32 %v881_v15, %v880_v13  ;;  %v883_v19 = vpop.f32.mrb[2].mxu1  ;;  %v862_v20 = vpop.f32.mrb[3].mxu0 }
  0xfa   :  { %v884_v21 = vpop.f32.mrb[3].mxu1 }
  0xfb   :  { %v637_v22 = vadd.f32 %v882_v17, %v860_v16 }
 0x116   :  { %v902_v23 = vpop.f32.mrb[4].mxu0 }
 0x117   :  { %v924_v24 = vpop.f32.mrb[4].mxu1  ;;  %v903_v25 = vpop.f32.mrb[5].mxu0 }
 0x118   :  { %v925_v26 = vpop.f32.mrb[5].mxu1  ;;  %v904_v27 = vadd.f32 %v903_v25, %v902_v23  ;;  %v905_v29 = vpop.f32.mrb[6].mxu0 }
 0x119   :  { %v926_v28 = vadd.f32 %v925_v26, %v924_v24  ;;  %v927_v30 = vpop.f32.mrb[6].mxu1  ;;  %v906_v31 = vpop.f32.mrb[7].mxu0 }
 0x11a   :  { %v928_v32 = vpop.f32.mrb[7].mxu1  ;;  %v677_v33 = vadd.f32 %v904_v27, %v637_v22 }
 0x11c   :  { %v717_v34 = vadd.f32 %v926_v28, %v677_v33 }
 0x11e   :  { %v722_v35 = vrot.slane %v717_v34, 4  ;;  %v729_v36 = vmul.f32 %v717_v34, %v717_v34 }
 0x120   :  { %v723_v37 = vadd.f32 %v722_v35, %v717_v34  ;;  %v730_v38 = vrot.slane %v729_v36, 4 }
 0x122   :  { %v724_v39 = vrot.slane %v723_v37, 2  ;;  %v731_v40 = vadd.f32 %v730_v38, %v729_v36 }
 0x124   :  { %v725_v41 = vadd.f32 %v724_v39, %v723_v37  ;;  %v732_v42 = vrot.slane %v731_v40, 2 }
 0x126   :  { %v726_v43 = vrot.slane %v725_v41, 1  ;;  %v733_v44 = vadd.f32 %v732_v42, %v731_v40 }
 0x128   :  { %v727_v45 = vadd.f32 %v726_v43, %v725_v41  ;;  %v734_v46 = vrot.slane %v733_v44, 1 }
 0x12a   :  { %v728_v47 = vmul.f32 0.125, %v727_v45  ;;  %v735_v48 = vadd.f32 %v734_v46, %v733_v44 }
 0x12c   :  { %v736_v49 = vmul.f32 0.125, %v735_v48  ;;  %v737_v50 = vmul.f32 %v728_v47, %v728_v47  ;;  %v739_v53 = vsub.f32 %v717_v34, %v728_v47 }
 0x12e   :  { %v738_v51 = vsub.f32 %v736_v49, %v737_v50 }
 0x130   :  { %v740_v52 = vadd.f32 1e-05, %v738_v51 }
 0x132   :  { %1002 = vrsqrt.f32 %v740_v52 }
 0x13c   :  { %v1003_v54 = vpop.eup %1002 }
 0x13d   :  { %v742_v56 = vmul.f32 %v1003_v54, %v739_v53 }
 0x13f   :  { %v750_v58 = vmul.f32 %v840_v55, %v742_v56 }
 0x141   :  { %v758_v59 = vadd.f32 %v841_v57, %v750_v58 }
 0x143   :  { %vm759_vm0 = vcmp.ge.f32.partialorder %v758_v59, 0.0  ;;  %v760_v60 = vmul.f32 0.2, %v758_v59 }
 0x145   :  { %v761_v61 = vsel %vm759_vm0, %v758_v59, %v760_v60 }
 0x146   :  { %v762_v62 = vpack.c.bf16 %v761_v61, %v761_v61 }
 0x148   :  { %763 = vst [vmem:[%s1246_s4] sm:$0xf] %v762_v62 }

// kernel: _lambda_.9
= control target key start
LH: loop header
LB: loop body
LE: loop exit
PB: predicated region body
PF: predicated region fallthrough
CT: control target
= control target key end

     0   :  { %v1934_v22 = vmov 1966171168   ;;  %v286_v24 = vlaneseq  ;;  %s2385_s1 = inlined_call_operand.vmem [shape: bf16[2048,128], index: 1, kind: input, shape index: {}]   ;;  %s2386_s0 = inlined_call_operand.vmem [shape: bf16[2,2048], index: 0, kind: input, shape index: {}]   ;;  %s2387_s2 = inlined_call_operand.vmem [shape: f32[1,128], index: 2, kind: input, shape index: {}]   ;;  %s2388_s3 = inlined_call_operand.vmem [shape: f32[2,128], index: 3, kind: output, shape index: {}]  }
   0x1   :  { %v1800_v0 = vld [vmem:[%s2385_s1 + $0x40] sm:$0xff]   ;;  %v1804_v4 = vld [vmem:[%s2385_s1 + $0x48] sm:$0xff]   ;;  %v1808_v8 = vld [vmem:[%s2385_s1 + $0x50] sm:$0xff]   ;;  %v284_v23 = vunpack.c.l.s4 %v1934_v22 }
   0x2   :  { %v1801_v1 = vld [vmem:[%s2385_s1 + $0xc0] sm:$0xff]   ;;  %1623 = vmatprep.subr.bf16.mxu0 %v1800_v0  ;;  %v1805_v5 = vld [vmem:[%s2385_s1 + $0xc8] sm:$0xff]   ;;  %v1809_v9 = vld [vmem:[%s2385_s1 + $0xd0] sm:$0xff]   ;;  %v287_v30 = vshrl.u32 %v286_v24, 7 }
   0x3   :  { %v1802_v2 = vld [vmem:[%s2385_s1] sm:$0xff]   ;;  %1645 = vmatprep.subr.bf16.mxu1 %v1801_v1  ;;  %v1806_v6 = vld [vmem:[%s2385_s1 + $0x8] sm:$0xff]   ;;  %v1810_v10 = vld [vmem:[%s2385_s1 + $0x10] sm:$0xff]   ;;  %v285_v29 = vunpack.c.0.s8 %v284_v23 }
   0x4   :  { %v1803_v3 = vld [vmem:[%s2385_s1 + $0x80] sm:$0xff]   ;;  %1624 = vmatpush3.bf16.msra.mxu0 %v1802_v2  ;;  %v1807_v7 = vld [vmem:[%s2385_s1 + $0x88] sm:$0xff]   ;;  %v1811_v11 = vld [vmem:[%s2385_s1 + $0x90] sm:$0xff]  }
   0x5   :  { %1646 = vmatpush3.bf16.msra.mxu1 %v1803_v3  ;;  %1625 = vmatprep.subr.bf16.mxu0 %v1804_v4  ;;  %v1812_v12 = vld [vmem:[%s2385_s1 + $0x58] sm:$0xff]   ;;  %v1816_v16 = vld [vmem:[%s2385_s1 + $0x60] sm:$0xff]   ;;  %v1820_v20 = vld [vmem:[%s2385_s1 + $0x68] sm:$0xff]   ;;  %v2045_v35 = vsub.s32 %v285_v29, %v287_v30 }
   0x6   :  { %1647 = vmatprep.subr.bf16.mxu1 %v1805_v5  ;;  %v1813_v13 = vld [vmem:[%s2385_s1 + $0xd8] sm:$0xff]   ;;  %v1817_v17 = vld [vmem:[%s2385_s1 + $0xe0] sm:$0xff]   ;;  %v1821_v21 = vld [vmem:[%s2385_s1 + $0xe8] sm:$0xff]  }
   0x7   :  { %v1814_v14 = vld [vmem:[%s2385_s1 + $0x18] sm:$0xff]   ;;  %v1818_v18 = vld [vmem:[%s2385_s1 + $0x20] sm:$0xff]   ;;  %v1822_v25 = vld [vmem:[%s2385_s1 + $0x28] sm:$0xff]  }
   0x8   :  { %1626 = vmatpush3.bf16.msra.mxu0 %v1806_v6  ;;  %v1815_v15 = vld [vmem:[%s2385_s1 + $0x98] sm:$0xff]   ;;  %v1819_v19 = vld [vmem:[%s2385_s1 + $0xa0] sm:$0xff]   ;;  %v1823_v26 = vld [vmem:[%s2385_s1 + $0xa8] sm:$0xff]  }
   0x9   :  { %1648 = vmatpush3.bf16.msra.mxu1 %v1807_v7  ;;  %1627 = vmatprep.subr.bf16.mxu0 %v1808_v8  ;;  %v1824_v27 = vld [vmem:[%s2385_s1 + $0x70] sm:$0xff]   ;;  %v1828_v33 = vld [vmem:[%s2385_s1 + $0x78] sm:$0xff]   ;;  %v15_v38 = vld [vmem:[%s2386_s0] sm:$0xff] }
   0xa   :  { %1649 = vmatprep.subr.bf16.mxu1 %v1809_v9  ;;  %v1825_v28 = vld [vmem:[%s2385_s1 + $0xf0] sm:$0xff]   ;;  %v1829_v34 = vld [vmem:[%s2385_s1 + $0xf8] sm:$0xff]   ;;  %v282_v39 = vcombine.high %v15_v38, %v15_v38  ;;  %v289_v40 = vrot.slane %v15_v38, %v2045_v35  ;;  %v1834_v41 = vld [vmem:[%s2385_s1 + $0x140] sm:$0xff]  }
   0xb   :  { %v1826_v31 = vld [vmem:[%s2385_s1 + $0x30] sm:$0xff]   ;;  %v1830_v36 = vld [vmem:[%s2385_s1 + $0x38] sm:$0xff]   ;;  %v1835_v42 = vld [vmem:[%s2385_s1 + $0x1c0] sm:$0xff]  }
   0xc   :  { %1628 = vmatpush3.bf16.msra.mxu0 %v1810_v10  ;;  %v1827_v32 = vld [vmem:[%s2385_s1 + $0xb0] sm:$0xff]   ;;  %v1831_v37 = vld [vmem:[%s2385_s1 + $0xb8] sm:$0xff]   ;;  %v297_v43 = vcombine.high %v289_v40, %v289_v40  ;;  %v305_v44 = vrot.slane %v289_v40, %v2045_v35  ;;  %v2065_v45 = vrot.slane %v282_v39, %v2045_v35  ;;  %v1836_v47 = vld [vmem:[%s2385_s1 + $0x100] sm:$0xff]  }
   0xd   :  { %1650 = vmatpush3.bf16.msra.mxu1 %v1811_v11  ;;  %1629 = vmatprep.subr.bf16.mxu0 %v1812_v12  ;;  %v1838_v50 = vld [vmem:[%s2385_s1 + $0x148] sm:$0xff]   ;;  %v1837_v52 = vld [vmem:[%s2385_s1 + $0x180] sm:$0xff]   ;;  %v1842_v57 = vld [vmem:[%s2385_s1 + $0x150] sm:$0xff]  }
   0xe   :  { %1651 = vmatprep.subr.bf16.mxu1 %v1813_v13  ;;  %v319_v46 = vrot.slane %v297_v43, %v2045_v35  ;;  %v298_v48 = vcombine.high %v2065_v45, %v2065_v45  ;;  %v327_v49 = vcombine.high %v305_v44, %v305_v44  ;;  %v1839_v54 = vld [vmem:[%s2385_s1 + $0x1c8] sm:$0xff]   ;;  %v1843_v59 = vld [vmem:[%s2385_s1 + $0x1d0] sm:$0xff]   ;;  %v1846_v61 = vld [vmem:[%s2385_s1 + $0x158] sm:$0xff]  }
   0xf   :  { %v1840_v55 = vld [vmem:[%s2385_s1 + $0x108] sm:$0xff]   ;;  %v1844_v60 = vld [vmem:[%s2385_s1 + $0x110] sm:$0xff]   ;;  %v1847_v63 = vld [vmem:[%s2385_s1 + $0x1d8] sm:$0xff]  }
  0x10   :  { %1630 = vmatpush3.bf16.msra.mxu0 %v1814_v14  ;;  %1196 = vmatprep.mubr.bf16.mxu0 %v319_v46  ;;  %v329_v51 = vcombine.high %v319_v46, %v319_v46  ;;  %v326_v53 = vrot.slane %v298_v48, %v2045_v35  ;;  %v1841_v58 = vld [vmem:[%s2385_s1 + $0x188] sm:$0xff]   ;;  %v1845_v62 = vld [vmem:[%s2385_s1 + $0x190] sm:$0xff]   ;;  %v1848_v0 = vld [vmem:[%s2385_s1 + $0x118] sm:$0xff]  }
  0x11   :  { %1652 = vmatpush3.bf16.msra.mxu1 %v1815_v15  ;;  %1631 = vmatprep.subr.bf16.mxu0 %v1816_v16  ;;  %v1850_v1 = vld [vmem:[%s2385_s1 + $0x160] sm:$0xff]   ;;  %v1849_v2 = vld [vmem:[%s2385_s1 + $0x198] sm:$0xff]   ;;  %v2125_v5 = vld [vmem:[%s2386_s0 + $0x8] sm:$0xff] }
  0x12   :  { %1653 = vmatprep.subr.bf16.mxu1 %v1817_v17  ;;  %1236 = vmatprep.mubr.bf16.mxu1 %v329_v51  ;;  %v330_v56 = vcombine.high %v326_v53, %v326_v53  ;;  %v1851_v3 = vld [vmem:[%s2385_s1 + $0x1e0] sm:$0xff]   ;;  %v1854_v6 = vld [vmem:[%s2385_s1 + $0x168] sm:$0xff]   ;;  %v1858_v10 = vld [vmem:[%s2385_s1 + $0x170] sm:$0xff]   ;;  %v2147_v12 = vrot.slane %v2125_v5, %v2045_v35  ;;  %v331_v46 = vcombine.high %v2125_v5, %v2125_v5 }
  0x13   :  { %v1852_v4 = vld [vmem:[%s2385_s1 + $0x120] sm:$0xff]   ;;  %v1855_v8 = vld [vmem:[%s2385_s1 + $0x1e8] sm:$0xff]   ;;  %v1859_v13 = vld [vmem:[%s2385_s1 + $0x1f0] sm:$0xff]  }
  0x14   :  { %1632 = vmatpush3.bf16.msra.mxu0 %v1818_v18  ;;  %v1853_v7 = vld [vmem:[%s2385_s1 + $0x1a0] sm:$0xff]   ;;  %v1856_v9 = vld [vmem:[%s2385_s1 + $0x128] sm:$0xff]   ;;  %v1860_v14 = vld [vmem:[%s2385_s1 + $0x130] sm:$0xff]   ;;  %v346_v17 = vcombine.high %v2147_v12, %v2147_v12 }
  0x15   :  { %1654 = vmatpush3.bf16.msra.mxu1 %v1819_v19  ;;  %1633 = vmatprep.subr.bf16.mxu0 %v1820_v20  ;;  %v1857_v11 = vld [vmem:[%s2385_s1 + $0x1a8] sm:$0xff]   ;;  %v1862_v15 = vld [vmem:[%s2385_s1 + $0x178] sm:$0xff]   ;;  %v1861_v16 = vld [vmem:[%s2385_s1 + $0x1b0] sm:$0xff]   ;;  %v312_v20 = vrot.slane %v2065_v45, %v2045_v35 }
  0x16   :  { %1655 = vmatprep.subr.bf16.mxu1 %v1821_v21  ;;  %v1863_v18 = vld [vmem:[%s2385_s1 + $0x1f8] sm:$0xff]   ;;  %v1866_v21 = vld [vmem:[%s2385_s1 + $0x240] sm:$0xff]   ;;  %v368_v23 = vrot.slane %v346_v17, %v2045_v35  ;;  %v1871_v30 = vld [vmem:[%s2385_s1 + $0x2c8] sm:$0xff]  }
  0x17   :  { %v1864_v19 = vld [vmem:[%s2385_s1 + $0x138] sm:$0xff]   ;;  %v1867_v24 = vld [vmem:[%s2385_s1 + $0x2c0] sm:$0xff]   ;;  %v1877_v38 = vld [vmem:[%s2385_s1 + $0x290] sm:$0xff]  }
  0x18   :  { %1634 = vmatpush3.bf16.msra.mxu0 %v1822_v25  ;;  %v1865_v22 = vld [vmem:[%s2385_s1 + $0x1b8] sm:$0xff]   ;;  %v1868_v25 = vld [vmem:[%s2385_s1 + $0x200] sm:$0xff]   ;;  %v378_v29 = vcombine.high %v368_v23, %v368_v23  ;;  %v1886_v45 = vld [vmem:[%s2385_s1 + $0x268] sm:$0xff]  }
  0x19   :  { %1656 = vmatpush3.bf16.msra.mxu1 %v1823_v26  ;;  %1635 = vmatprep.subr.bf16.mxu0 %v1824_v27  ;;  %v328_v26 = vcombine.high %v312_v20, %v312_v20  ;;  %v1870_v27 = vld [vmem:[%s2385_s1 + $0x248] sm:$0xff]   ;;  %v1879_v39 = vld [vmem:[%s2385_s1 + $0x2d8] sm:$0xff]   ;;  %v1883_v43 = vld [vmem:[%s2385_s1 + $0x2e0] sm:$0xff]  }
  0x1a   :  { %1657 = vmatprep.subr.bf16.mxu1 %v1825_v28  ;;  %v1869_v28 = vld [vmem:[%s2385_s1 + $0x280] sm:$0xff]   ;;  %v1880_v40 = vld [vmem:[%s2385_s1 + $0x218] sm:$0xff]   ;;  %v1887_v48 = vld [vmem:[%s2385_s1 + $0x2e8] sm:$0xff]  }
  0x1b   :  { %v1889_v51 = vld [vmem:[%s2385_s1 + $0x2a8] sm:$0xff]   ;;  %v1913_v17 = vld [vmem:[%s2385_s1 + $0x398] sm:$0xff]  }
  0x1c   :  { %1636 = vmatpush3.bf16.msra.mxu0 %v1826_v31  ;;  %v1872_v31 = vld [vmem:[%s2385_s1 + $0x208] sm:$0xff]  }
  0x1d   :  { %1658 = vmatpush3.bf16.msra.mxu1 %v1827_v32  ;;  %1637 = vmatprep.subr.bf16.mxu0 %v1828_v33  ;;  %v1874_v32 = vld [vmem:[%s2385_s1 + $0x250] sm:$0xff]   ;;  %v1873_v33 = vld [vmem:[%s2385_s1 + $0x288] sm:$0xff]  }
  0x1e   :  { %1659 = vmatprep.subr.bf16.mxu1 %v1829_v34  ;;  %v1875_v34 = vld [vmem:[%s2385_s1 + $0x2d0] sm:$0xff]  }
  0x20   :  { %1638 = vmatpush3.bf16.msra.mxu0 %v1830_v36  ;;  %v1876_v36 = vld [vmem:[%s2385_s1 + $0x210] sm:$0xff]  }
  0x21   :  { %1660 = vmatpush3.bf16.msra.mxu1 %v1831_v37  ;;  %1667 = vmatprep.subr.bf16.mxu0 %v1834_v41  ;;  %v1878_v37 = vld [vmem:[%s2385_s1 + $0x258] sm:$0xff]   ;;  %v1882_v41 = vld [vmem:[%s2385_s1 + $0x260] sm:$0xff]  }
  0x22   :  { %1689 = vmatprep.subr.bf16.mxu1 %v1835_v42  ;;  %v1881_v42 = vld [vmem:[%s2385_s1 + $0x298] sm:$0xff]  }
  0x23   :  { %1197 = vmatmul.mubr.bf16.vlgmr.msra.gmra.mrb[0].mxu0 %v305_v44  ;;  %v1884_v44 = vld [vmem:[%s2385_s1 + $0x220] sm:$0xff]  }
  0x24   :  { %1668 = vmatpush3.bf16.msra.mxu0 %v1836_v47  ;;  %1237 = vmatmul.mubr.bf16.vlgmr.msra.gmra.mrb[0].mxu1 %v327_v49  ;;  %v1885_v47 = vld [vmem:[%s2385_s1 + $0x2a0] sm:$0xff]   ;;  %v1888_v49 = vld [vmem:[%s2385_s1 + $0x228] sm:$0xff]  }
  0x25   :  { %1669 = vmatprep.subr.bf16.mxu0 %v1838_v50  ;;  %1690 = vmatpush3.bf16.msra.mxu1 %v1837_v52  ;;  %v1890_v50 = vld [vmem:[%s2385_s1 + $0x270] sm:$0xff]   ;;  %v2253_v52 = vrot.slane %v331_v46, %v2045_v35 }
  0x26   :  { %1276 = vmatprep.mubr.bf16.mxu0 %v326_v53  ;;  %1691 = vmatprep.subr.bf16.mxu1 %v1839_v54  ;;  %v1891_v53 = vld [vmem:[%s2385_s1 + $0x2f0] sm:$0xff]  }
  0x27   :  { %1316 = vmatprep.mubr.bf16.mxu1 %v330_v56  ;;  %v1892_v54 = vld [vmem:[%s2385_s1 + $0x230] sm:$0xff]  }
  0x28   :  { %1670 = vmatpush3.bf16.msra.mxu0 %v1840_v55  ;;  %v1894_v55 = vld [vmem:[%s2385_s1 + $0x278] sm:$0xff]   ;;  %v1893_v56 = vld [vmem:[%s2385_s1 + $0x2b0] sm:$0xff]  }
  0x29   :  { %1671 = vmatprep.subr.bf16.mxu0 %v1842_v57  ;;  %1692 = vmatpush3.bf16.msra.mxu1 %v1841_v58  ;;  %v347_v57 = vcombine.high %v2253_v52, %v2253_v52  ;;  %v1895_v58 = vld [vmem:[%s2385_s1 + $0x2f8] sm:$0xff]  }
  0x2a   :  { %1693 = vmatprep.subr.bf16.mxu1 %v1843_v59  ;;  %v1896_v59 = vld [vmem:[%s2385_s1 + $0x238] sm:$0xff]  }
  0x2c   :  { %1672 = vmatpush3.bf16.msra.mxu0 %v1844_v60  ;;  %v354_v60 = vrot.slane %v2147_v12, %v2045_v35  ;;  %v1910_v12 = vld [vmem:[%s2385_s1 + $0x358] sm:$0xff]  }
  0x2d   :  { %1673 = vmatprep.subr.bf16.mxu0 %v1846_v61  ;;  %1694 = vmatpush3.bf16.msra.mxu1 %v1845_v62  ;;  %v1898_v61 = vld [vmem:[%s2385_s1 + $0x340] sm:$0xff]   ;;  %v1897_v62 = vld [vmem:[%s2385_s1 + $0x2b8] sm:$0xff]  }
  0x2e   :  { %1695 = vmatprep.subr.bf16.mxu1 %v1847_v63  ;;  %v375_v63 = vrot.slane %v347_v57, %v2045_v35 }
  0x30   :  { %1674 = vmatpush3.bf16.msra.mxu0 %v1848_v0  ;;  %v1899_v0 = vld [vmem:[%s2385_s1 + $0x3c0] sm:$0xff]   ;;  %v379_v5 = vcombine.high %v375_v63, %v375_v63 }
  0x31   :  { %1675 = vmatprep.subr.bf16.mxu0 %v1850_v1  ;;  %1696 = vmatpush3.bf16.msra.mxu1 %v1849_v2  ;;  %v1900_v1 = vld [vmem:[%s2385_s1 + $0x300] sm:$0xff]   ;;  %v376_v2 = vcombine.high %v354_v60, %v354_v60 }
  0x32   :  { %1697 = vmatprep.subr.bf16.mxu1 %v1851_v3  ;;  %v1902_v3 = vld [vmem:[%s2385_s1 + $0x348] sm:$0xff]  }
  0x34   :  { %1676 = vmatpush3.bf16.msra.mxu0 %v1852_v4  ;;  %v1901_v4 = vld [vmem:[%s2385_s1 + $0x380] sm:$0xff]  }
  0x35   :  { %1677 = vmatprep.subr.bf16.mxu0 %v1854_v6  ;;  %1698 = vmatpush3.bf16.msra.mxu1 %v1853_v7  ;;  %v1903_v6 = vld [vmem:[%s2385_s1 + $0x3c8] sm:$0xff]  }
  0x36   :  { %1699 = vmatprep.subr.bf16.mxu1 %v1855_v8  ;;  %v1904_v7 = vld [vmem:[%s2385_s1 + $0x308] sm:$0xff]   ;;  %v1906_v8 = vld [vmem:[%s2385_s1 + $0x350] sm:$0xff]  }
  0x38   :  { %1678 = vmatpush3.bf16.msra.mxu0 %v1856_v9  ;;  %v1905_v9 = vld [vmem:[%s2385_s1 + $0x388] sm:$0xff]  }
  0x39   :  { %1679 = vmatprep.subr.bf16.mxu0 %v1858_v10  ;;  %1700 = vmatpush3.bf16.msra.mxu1 %v1857_v11  ;;  %v1907_v10 = vld [vmem:[%s2385_s1 + $0x3d0] sm:$0xff]  }
  0x3a   :  { %1701 = vmatprep.subr.bf16.mxu1 %v1859_v13  ;;  %v1908_v11 = vld [vmem:[%s2385_s1 + $0x310] sm:$0xff]  }
  0x3b   :  { %v1909_v13 = vld [vmem:[%s2385_s1 + $0x390] sm:$0xff]  }
  0x3c   :  { %1680 = vmatpush3.bf16.msra.mxu0 %v1860_v14  ;;  %v1911_v14 = vld [vmem:[%s2385_s1 + $0x3d8] sm:$0xff]  }
  0x3d   :  { %1681 = vmatprep.subr.bf16.mxu0 %v1862_v15  ;;  %1702 = vmatpush3.bf16.msra.mxu1 %v1861_v16  ;;  %v1912_v15 = vld [vmem:[%s2385_s1 + $0x318] sm:$0xff]   ;;  %v1914_v16 = vld [vmem:[%s2385_s1 + $0x360] sm:$0xff]  }
  0x3e   :  { %1703 = vmatprep.subr.bf16.mxu1 %v1863_v18  ;;  %v1915_v18 = vld [vmem:[%s2385_s1 + $0x3e0] sm:$0xff]  }
  0x40   :  { %1682 = vmatpush3.bf16.msra.mxu0 %v1864_v19  ;;  %v1916_v19 = vld [vmem:[%s2385_s1 + $0x320] sm:$0xff]  }
  0x41   :  { %1711 = vmatprep.subr.bf16.mxu0 %v1866_v21  ;;  %1704 = vmatpush3.bf16.msra.mxu1 %v1865_v22  ;;  %v1917_v21 = vld [vmem:[%s2385_s1 + $0x3a0] sm:$0xff]   ;;  %v1919_v22 = vld [vmem:[%s2385_s1 + $0x3e8] sm:$0xff]  }
  0x42   :  { %1733 = vmatprep.subr.bf16.mxu1 %v1867_v24  ;;  %v1922_v24 = vld [vmem:[%s2385_s1 + $0x370] sm:$0xff]  }
  0x43   :  { %1277 = vmatmul.mubr.bf16.vlgmr.msra.gmra.mrb[4].mxu0 %v312_v20  ;;  %v1918_v20 = vld [vmem:[%s2385_s1 + $0x368] sm:$0xff]  }
  0x44   :  { %1712 = vmatpush3.bf16.msra.mxu0 %v1868_v25  ;;  %1356 = vmatprep.mubr.bf16.mxu0 %v368_v23  ;;  %v1920_v23 = vld [vmem:[%s2385_s1 + $0x328] sm:$0xff]  }
  0x45   :  { %1317 = vmatmul.mubr.bf16.vlgmr.msra.gmra.mrb[4].mxu1 %v328_v26  ;;  %1713 = vmatprep.subr.bf16.mxu0 %v1870_v27  ;;  %v1921_v25 = vld [vmem:[%s2385_s1 + $0x3a8] sm:$0xff]   ;;  %v1923_v26 = vld [vmem:[%s2385_s1 + $0x3f0] sm:$0xff]  }
  0x46   :  { %1734 = vmatpush3.bf16.msra.mxu1 %v1869_v28  ;;  %1396 = vmatprep.mubr.bf16.mxu1 %v378_v29  ;;  %v1924_v27 = vld [vmem:[%s2385_s1 + $0x330] sm:$0xff]   ;;  %v1926_v28 = vld [vmem:[%s2385_s1 + $0x378] sm:$0xff]  }
  0x47   :  { %1735 = vmatprep.subr.bf16.mxu1 %v1871_v30  ;;  %v1925_v29 = vld [vmem:[%s2385_s1 + $0x3b0] sm:$0xff]   ;;  %v1927_v30 = vld [vmem:[%s2385_s1 + $0x3f8] sm:$0xff]  }
  0x48   :  { %1714 = vmatpush3.bf16.msra.mxu0 %v1872_v31  ;;  %v1928_v31 = vld [vmem:[%s2385_s1 + $0x338] sm:$0xff]  }
  0x49   :  { %1715 = vmatprep.subr.bf16.mxu0 %v1874_v32  ;;  %v361_v32 = vrot.slane %v2253_v52, %v2045_v35 }
  0x4a   :  { %1736 = vmatpush3.bf16.msra.mxu1 %v1873_v33  ;;  %v1929_v33 = vld [vmem:[%s2385_s1 + $0x3b8] sm:$0xff]  }
  0x4b   :  { %1737 = vmatprep.subr.bf16.mxu1 %v1875_v34  ;;  %v377_v34 = vcombine.high %v361_v32, %v361_v32 }
  0x4c   :  { %1716 = vmatpush3.bf16.msra.mxu0 %v1876_v36 }
  0x4d   :  { %1717 = vmatprep.subr.bf16.mxu0 %v1878_v37  ;;  %v1494_v37 = vld [vmem:[%s2387_s2] ss:$0 sm:$0xff] }
  0x4e   :  { %1738 = vmatpush3.bf16.msra.mxu1 %v1877_v38 }
  0x4f   :  { %1739 = vmatprep.subr.bf16.mxu1 %v1879_v39 }
  0x50   :  { %1718 = vmatpush3.bf16.msra.mxu0 %v1880_v40 }
  0x51   :  { %1719 = vmatprep.subr.bf16.mxu0 %v1882_v41 }
  0x52   :  { %1740 = vmatpush3.bf16.msra.mxu1 %v1881_v42 }
  0x53   :  { %1741 = vmatprep.subr.bf16.mxu1 %v1883_v43 }
  0x54   :  { %1720 = vmatpush3.bf16.msra.mxu0 %v1884_v44 }
  0x55   :  { %1721 = vmatprep.subr.bf16.mxu0 %v1886_v45 }
  0x56   :  { %1742 = vmatpush3.bf16.msra.mxu1 %v1885_v47 }
  0x57   :  { %1743 = vmatprep.subr.bf16.mxu1 %v1887_v48 }
  0x58   :  { %1722 = vmatpush3.bf16.msra.mxu0 %v1888_v49 }
  0x59   :  { %1723 = vmatprep.subr.bf16.mxu0 %v1890_v50 }
  0x5a   :  { %1744 = vmatpush3.bf16.msra.mxu1 %v1889_v51 }
  0x5b   :  { %1745 = vmatprep.subr.bf16.mxu1 %v1891_v53 }
  0x5c   :  { %1724 = vmatpush3.bf16.msra.mxu0 %v1892_v54 }
  0x5d   :  { %1725 = vmatprep.subr.bf16.mxu0 %v1894_v55 }
  0x5e   :  { %1746 = vmatpush3.bf16.msra.mxu1 %v1893_v56 }
  0x5f   :  { %1747 = vmatprep.subr.bf16.mxu1 %v1895_v58 }
  0x60   :  { %1726 = vmatpush3.bf16.msra.mxu0 %v1896_v59 }
  0x61   :  { %1755 = vmatprep.subr.bf16.mxu0 %v1898_v61 }
  0x62   :  { %1748 = vmatpush3.bf16.msra.mxu1 %v1897_v62 }
  0x63   :  { %1357 = vmatmul.mubr.bf16.vlgmr.msra.gmra.mrb[8].mxu0 %v354_v60  ;;  %1777 = vmatprep.subr.bf16.mxu1 %v1899_v0 }
  0x64   :  { %1756 = vmatpush3.bf16.msra.mxu0 %v1900_v1  ;;  %1436 = vmatprep.mubr.bf16.mxu0 %v375_v63 }
  0x65   :  { %1397 = vmatmul.mubr.bf16.vlgmr.msra.gmra.mrb[8].mxu1 %v376_v2  ;;  %1757 = vmatprep.subr.bf16.mxu0 %v1902_v3 }
  0x66   :  { %1778 = vmatpush3.bf16.msra.mxu1 %v1901_v4  ;;  %1476 = vmatprep.mubr.bf16.mxu1 %v379_v5 }
  0x67   :  { %1779 = vmatprep.subr.bf16.mxu1 %v1903_v6 }
  0x68   :  { %1758 = vmatpush3.bf16.msra.mxu0 %v1904_v7 }
  0x69   :  { %1759 = vmatprep.subr.bf16.mxu0 %v1906_v8 }
  0x6a   :  { %1780 = vmatpush3.bf16.msra.mxu1 %v1905_v9 }
  0x6b   :  { %1781 = vmatprep.subr.bf16.mxu1 %v1907_v10 }
  0x6c   :  { %1760 = vmatpush3.bf16.msra.mxu0 %v1908_v11 }
  0x6d   :  { %1761 = vmatprep.subr.bf16.mxu0 %v1910_v12 }
  0x6e   :  { %1782 = vmatpush3.bf16.msra.mxu1 %v1909_v13 }
  0x6f   :  { %1783 = vmatprep.subr.bf16.mxu1 %v1911_v14 }
  0x70   :  { %1762 = vmatpush3.bf16.msra.mxu0 %v1912_v15 }
  0x71   :  { %1763 = vmatprep.subr.bf16.mxu0 %v1914_v16 }
  0x72   :  { %1784 = vmatpush3.bf16.msra.mxu1 %v1913_v17 }
  0x73   :  { %1785 = vmatprep.subr.bf16.mxu1 %v1915_v18 }
  0x74   :  { %1764 = vmatpush3.bf16.msra.mxu0 %v1916_v19 }
  0x75   :  { %1765 = vmatprep.subr.bf16.mxu0 %v1918_v20 }
  0x76   :  { %1786 = vmatpush3.bf16.msra.mxu1 %v1917_v21 }
  0x77   :  { %1787 = vmatprep.subr.bf16.mxu1 %v1919_v22 }
  0x78   :  { %1766 = vmatpush3.bf16.msra.mxu0 %v1920_v23 }
  0x79   :  { %1767 = vmatprep.subr.bf16.mxu0 %v1922_v24 }
  0x7a   :  { %1788 = vmatpush3.bf16.msra.mxu1 %v1921_v25 }
  0x7b   :  { %1789 = vmatprep.subr.bf16.mxu1 %v1923_v26 }
  0x7c   :  { %1768 = vmatpush3.bf16.msra.mxu0 %v1924_v27 }
  0x7d   :  { %1769 = vmatprep.subr.bf16.mxu0 %v1926_v28 }
  0x7e   :  { %1790 = vmatpush3.bf16.msra.mxu1 %v1925_v29 }
  0x7f   :  { %1791 = vmatprep.subr.bf16.mxu1 %v1927_v30 }
  0x80   :  { %1770 = vmatpush3.bf16.msra.mxu0 %v1928_v31 }
  0x82   :  { %1792 = vmatpush3.bf16.msra.mxu1 %v1929_v33 }
  0x83   :  { %1437 = vmatmul.mubr.bf16.vlgmr.msra.gmra.mrb[12].mxu0 %v361_v32 }
  0x85   :  { %1477 = vmatmul.mubr.bf16.vlgmr.msra.gmra.mrb[12].mxu1 %v377_v34 }
  0xf6   :  { %v1639_v36 = vpop.f32.mrb[0].mxu0 }
  0xf7   :  { %v1640_v38 = vpop.f32.mrb[1].mxu0  ;;  %v1661_v39 = vpop.f32.mrb[0].mxu1 }
  0xf8   :  { %v1641_v40 = vadd.f32 %v1640_v38, %v1639_v36  ;;  %v1642_v35 = vpop.f32.mrb[2].mxu0  ;;  %v1662_v41 = vpop.f32.mrb[1].mxu1 }
  0xf9   :  { %v1643_v42 = vpop.f32.mrb[3].mxu0  ;;  %v1663_v44 = vadd.f32 %v1662_v41, %v1661_v39  ;;  %v1664_v45 = vpop.f32.mrb[2].mxu1 }
  0xfa   :  { %v1199_v43 = vadd.f32 %v1641_v40, %v1494_v37  ;;  %v1665_v46 = vpop.f32.mrb[3].mxu1 }
  0xfc   :  { %v1239_v47 = vadd.f32 %v1663_v44, %v1199_v43 }
 0x116   :  { %v1683_v48 = vpop.f32.mrb[4].mxu0 }
 0x117   :  { %v1684_v49 = vpop.f32.mrb[5].mxu0 }
 0x118   :  { %v1705_v50 = vpop.f32.mrb[4].mxu1  ;;  %v1685_v51 = vadd.f32 %v1684_v49, %v1683_v48  ;;  %v1686_v52 = vpop.f32.mrb[6].mxu0 }
 0x119   :  { %v1706_v53 = vpop.f32.mrb[5].mxu1  ;;  %v1687_v54 = vpop.f32.mrb[7].mxu0 }
 0x11a   :  { %v1279_v55 = vadd.f32 %v1685_v51, %v1239_v47  ;;  %v1707_v56 = vadd.f32 %v1706_v53, %v1705_v50  ;;  %v1708_v57 = vpop.f32.mrb[6].mxu1 }
 0x11b   :  { %v1709_v58 = vpop.f32.mrb[7].mxu1 }
 0x11c   :  { %v1319_v59 = vadd.f32 %v1707_v56, %v1279_v55 }
 0x136   :  { %v1727_v60 = vpop.f32.mrb[8].mxu0 }
 0x137   :  { %v1728_v61 = vpop.f32.mrb[9].mxu0 }
 0x138   :  { %v1749_v62 = vpop.f32.mrb[8].mxu1  ;;  %v1729_v63 = vadd.f32 %v1728_v61, %v1727_v60  ;;  %v1730_v0 = vpop.f32.mrb[10].mxu0 }
 0x139   :  { %v1750_v1 = vpop.f32.mrb[9].mxu1  ;;  %v1731_v2 = vpop.f32.mrb[11].mxu0 }
 0x13a   :  { %v1359_v3 = vadd.f32 %v1729_v63, %v1319_v59  ;;  %v1751_v4 = vadd.f32 %v1750_v1, %v1749_v62  ;;  %v1752_v5 = vpop.f32.mrb[10].mxu1 }
 0x13b   :  { %v1753_v6 = vpop.f32.mrb[11].mxu1 }
 0x13c   :  { %v1399_v7 = vadd.f32 %v1751_v4, %v1359_v3 }
 0x156   :  { %v1771_v8 = vpop.f32.mrb[12].mxu0 }
 0x157   :  { %v1772_v9 = vpop.f32.mrb[13].mxu0 }
 0x158   :  { %v1793_v10 = vpop.f32.mrb[12].mxu1  ;;  %v1773_v11 = vadd.f32 %v1772_v9, %v1771_v8  ;;  %v1774_v12 = vpop.f32.mrb[14].mxu0 }
 0x159   :  { %v1794_v13 = vpop.f32.mrb[13].mxu1  ;;  %v1775_v14 = vpop.f32.mrb[15].mxu0 }
 0x15a   :  { %v1439_v15 = vadd.f32 %v1773_v11, %v1399_v7  ;;  %v1795_v16 = vadd.f32 %v1794_v13, %v1793_v10  ;;  %v1796_v17 = vpop.f32.mrb[14].mxu1 }
 0x15b   :  { %v1797_v18 = vpop.f32.mrb[15].mxu1 }
 0x15c   :  { %v1479_v19 = vadd.f32 %v1795_v16, %v1439_v15 }
 0x15e   :  { %v1484_v20 = vsub.f32 0.0, %v1479_v19 }
 0x160   :  { %v1485_v21 = vmul.f32 1.442695, %v1484_v20 }
 0x162   :  { %1930 = vpow2.f32 %v1485_v21 }
 0x16c   :  { %v1931_v22 = vpop.eup %1930 }
 0x16d   :  { %v1487_v23 = vadd.f32 1.0, %v1931_v22 }
 0x16f   :  { %1932 = vrcp.f32 %v1487_v23 }
 0x179   :  { %v1933_v24 = vpop.eup %1932 }
 0x17a   :  { %1489 = vst [vmem:[%s2388_s3] sm:$0x3] %v1933_v24 }

</bundles_post_ra>
